<compile_context>
chip_gen: v7x
topology: tpu7x:2x2x1
jax: 0.10.0
libtpu: 0.0.40
codegen_flags: <defaults>
</compile_context>

<pallas_src>
import math

import jax
import jax.numpy as jnp
from jax.experimental import pallas as pl
from jax.experimental.pallas import tpu as pltpu

# Per-instance hyper-params (small, consistent with the module signature).
M = 8            # rows of x1
N = 8            # rows of x3 (must equal M for the final matmul)
D_MODEL = 32
H = 16
D_VAL = 8        # columns of x2 / "value" width
D_KEY = 64
SCALE = math.sqrt(D_KEY)
DROPOUT_P = 0.1  # TODO(synk): dropout is identity in eval mode; not applied in-kernel.

NUM_STEPS = 2        # 2 parallel grid steps: one per TC on v7x; near-free extra step on v5e/v6e
NEG_INF = -1e30      # additive mask value (exp underflows to exactly 0)
HI = jax.lax.Precision.HIGHEST


def model_kernel(x1_ref, x2_ref, x3_ref, w_ref, b_ref, amask_ref, o_ref):
    # ---- x1 = linear(x1): one (G*M, D_MODEL) @ (D_MODEL, H) MXU pass ----------
    h = jnp.dot(x1_ref[...], w_ref[...],
                preferred_element_type=jnp.float32, precision=HI) + b_ref[...]    # (GM, H)

    # ---- lane-dense scores: S = h @ x2_packed -> (GM, G*D_VAL) ---------------
    # Both scale multiplies folded into one SCALE*SCALE after the unscaled matmul.
    s = jnp.dot(h, x2_ref[...],
                preferred_element_type=jnp.float32, precision=HI) * (SCALE * SCALE)

    # ---- block-diagonal masked softmax -> v2_bd (== block-diag expansion of v2)
    # amask is 0.0 on each row's own D_VAL block and NEG_INF elsewhere, so the
    # off-block lanes are excluded from both the row max and the exp-sum.
    s = s + amask_ref[...]
    s = s - jnp.max(s, axis=-1, keepdims=True)
    e = jnp.exp(s)                                   # off-block entries are exactly 0
    v2_bd = e / jnp.sum(e, axis=-1, keepdims=True)   # exact division (no approx recip)

    # v3 = dropout(v2) -> identity (eval mode)

    # ---- out[:, g*Dv:(g+1)*Dv] = x3[g]^T @ v2[g] as ONE matmul ----------------
    # Contract x3 on axis 0 (no in-kernel transpose); result is a lane-dense
    # (D_MODEL, G*D_VAL) tile -> unmasked vector stores.
    o_ref[...] = jax.lax.dot_general(
        x3_ref[...], v2_bd,
        dimension_numbers=(((0,), (0,)), ((), ())),
        preferred_element_type=jnp.float32, precision=HI)


def model_forward(x1, x2, x3, w, b):
    """x1: (B, M, D_MODEL), x2: (B, H, D_VAL), x3: (B, N, D_MODEL) -> (B, D_MODEL, D_VAL)."""
    batch = x1.shape[0]
    assert M == N, "matmul(x3^T, v3) requires N == M"
    assert x1.shape == (batch, M, D_MODEL)
    assert x2.shape == (batch, H, D_VAL)
    assert x3.shape == (batch, N, D_MODEL)
    assert batch % NUM_STEPS == 0
    G = batch // NUM_STEPS           # instances per grid step
    GM = G * M                       # rows per step
    GV = G * D_VAL                   # output lanes per step (multiple of 128)

    # Host-side packing (layout plumbing, fuses into surrounding XLA ops).
    x1_flat = x1.reshape(batch * M, D_MODEL)
    x2_packed = x2.transpose(1, 0, 2).reshape(H, batch * D_VAL)   # lane-dense x2
    x3_flat = x3.reshape(batch * N, D_MODEL)

    # Grid-invariant block-diagonal additive mask (hoisted out of the kernel).
    row_g = jnp.arange(GM) // M
    col_g = jnp.arange(GV) // D_VAL
    amask = jnp.where(row_g[:, None] == col_g[None, :], 0.0, NEG_INF).astype(jnp.float32)

    cost = pl.CostEstimate(
        flops=2 * NUM_STEPS * (GM * D_MODEL * H + GM * H * GV + D_MODEL * GM * GV),
        transcendentals=NUM_STEPS * GM * GV,
        bytes_accessed=4 * (x1_flat.size + x2_packed.size + x3_flat.size
                            + w.size + b.size + amask.size + D_MODEL * batch * D_VAL),
    )

    out_wide = pl.pallas_call(
        model_kernel,
        out_shape=jax.ShapeDtypeStruct((D_MODEL, batch * D_VAL), jnp.float32),
        grid=(NUM_STEPS,),
        in_specs=[
            pl.BlockSpec((GM, D_MODEL), lambda i: (i, 0)),   # x1 rows for G instances
            pl.BlockSpec((H, GV), lambda i: (0, i)),         # lane-dense x2 columns
            pl.BlockSpec((GM, D_MODEL), lambda i: (i, 0)),   # x3 rows for G instances
            pl.BlockSpec((D_MODEL, H), lambda i: (0, 0)),    # shared Linear weight
            pl.BlockSpec((1, H), lambda i: (0, 0)),          # shared Linear bias
            pl.BlockSpec((GM, GV), lambda i: (0, 0)),        # grid-invariant block-diag mask
        ],
        out_specs=pl.BlockSpec((D_MODEL, GV), lambda i: (0, i)),  # lane-dense (32, 256)
        compiler_params=pltpu.CompilerParams(
            dimension_semantics=("parallel",)),
        cost_estimate=cost,
    )(x1_flat, x2_packed, x3_flat, w, b, amask)

    # (D_MODEL, B*D_VAL) -> (B, D_MODEL, D_VAL)   (host-side layout plumbing)
    return out_wide.reshape(D_MODEL, batch, D_VAL).transpose(1, 0, 2)


def reference_forward(x1, x2, x3, w, b):
    h = jnp.einsum("bmd,dh->bmh", x1, w, precision=HI) + b                 # (B, M, H)
    v1 = jnp.einsum("bmh,bhv->bmv", h, x2 * SCALE, precision=HI)           # (B, M, D_VAL)
    v2 = jax.nn.softmax(v1 * SCALE, axis=-1)
    return jnp.einsum("bnd,bnv->bdv", x3, v2, precision=HI)                # (B, D_MODEL, D_VAL)


if __name__ == "__main__":
    key = jax.random.PRNGKey(0)
    k1, k2, k3, kw = jax.random.split(key, 4)

    B = 64  # independent instances (amortizes pallas_call overhead; grid of 2 parallel steps)

    # x1 = randint(0, 10, (M, D_model)), cast to float for the Linear layer.
    x1 = jax.random.randint(k1, (B, M, D_MODEL), 0, 10).astype(jnp.float32)
    # x2 = f(x1): opaque in the source; synthesize a deterministic tensor
    # (scaled small so the heavily-scaled softmax stays numerically benign).
    x2 = 0.05 * jax.random.normal(k2, (B, H, D_VAL), dtype=jnp.float32)
    # x3 = randn(N, D_model)
    x3 = jax.random.normal(k3, (B, N, D_MODEL), dtype=jnp.float32)

    # Linear(D_model, H): weight ~ N(0, 1), bias = 0 (as in __init__). Pre-transposed.
    w = jax.random.normal(kw, (D_MODEL, H), dtype=jnp.float32)
    b = jnp.zeros((1, H), dtype=jnp.float32)

    out = model_forward(x1, x2, x3, w, b)
    jax.block_until_ready(out)

    ref = reference_forward(x1, x2, x3, w, b)
    assert out.shape == (B, D_MODEL, D_VAL)
    err = float(jnp.max(jnp.abs(out - ref)))
    assert jnp.allclose(out, ref, atol=2e-3, rtol=2e-3), err

    print("KERNEL_OK")
</pallas_src>

<mosaic_0001>
module attributes {stable_mosaic.version = 11 : i64} {
  func.func @model_kernel(%arg0: i32, %arg1: memref<256x32xf32, #tpu.memory_space<vmem>>, %arg2: memref<16x256xf32, #tpu.memory_space<vmem>>, %arg3: memref<256x32xf32, #tpu.memory_space<vmem>>, %arg4: memref<32x16xf32, #tpu.memory_space<vmem>>, %arg5: memref<1x16xf32, #tpu.memory_space<vmem>>, %arg6: memref<256x256xf32, #tpu.memory_space<vmem>>, %arg7: memref<32x256xf32, #tpu.memory_space<vmem>>) attributes {dimension_semantics = [#tpu.dimension_semantics<parallel>], iteration_bounds = array<i64: 2>, scalar_prefetch = 0 : i64, scratch_operands = 0 : i64, tpu.core_type = #tpu.core_type<tc>, window_params = [{transform_indices = @transform_0, window_bounds = array<i64: 256, 32>}, {transform_indices = @transform_1, window_bounds = array<i64: 16, 256>}, {transform_indices = @transform_2, window_bounds = array<i64: 256, 32>}, {pipeline_mode = #tpu.pipeline_mode<synchronous>, transform_indices = @transform_3, window_bounds = array<i64: 32, 16>}, {pipeline_mode = #tpu.pipeline_mode<synchronous>, transform_indices = @transform_4, window_bounds = array<i64: 1, 16>}, {pipeline_mode = #tpu.pipeline_mode<synchronous>, transform_indices = @transform_5, window_bounds = array<i64: 256, 256>}, {transform_indices = @transform_6, window_bounds = array<i64: 32, 256>}]} {
    %c0 = arith.constant 0 : index
    %c0_0 = arith.constant 0 : index
    %0 = vector.load %arg1[%c0, %c0_0] : memref<256x32xf32, #tpu.memory_space<vmem>>, vector<256x32xf32>
    %c0_1 = arith.constant 0 : index
    %c0_2 = arith.constant 0 : index
    %1 = vector.load %arg4[%c0_1, %c0_2] : memref<32x16xf32, #tpu.memory_space<vmem>>, vector<32x16xf32>
    %cst = arith.constant dense<0.000000e+00> : vector<256x16xf32>
    %2 = tpu.matmul %0, %1, %cst {dimension_numbers = #tpu.dot_dimension_numbers<[1], [0], [0], [1], [0, 0, 1, 1], [], []>, precision = #tpu.contract_precision<fp32>} : vector<256x32xf32>, vector<32x16xf32>, vector<256x16xf32> -> vector<256x16xf32>
    %c0_3 = arith.constant 0 : index
    %c0_4 = arith.constant 0 : index
    %3 = vector.load %arg5[%c0_3, %c0_4] : memref<1x16xf32, #tpu.memory_space<vmem>>, vector<1x16xf32>
    %4 = vector.broadcast %3 : vector<1x16xf32> to vector<256x16xf32>
    %5 = arith.addf %2, %4 : vector<256x16xf32>
    %c0_5 = arith.constant 0 : index
    %c0_6 = arith.constant 0 : index
    %6 = vector.load %arg2[%c0_5, %c0_6] : memref<16x256xf32, #tpu.memory_space<vmem>>, vector<16x256xf32>
    %cst_7 = arith.constant dense<0.000000e+00> : vector<256x256xf32>
    %7 = tpu.matmul %5, %6, %cst_7 {dimension_numbers = #tpu.dot_dimension_numbers<[1], [0], [0], [1], [0, 0, 1, 1], [], []>, precision = #tpu.contract_precision<fp32>} : vector<256x16xf32>, vector<16x256xf32>, vector<256x256xf32> -> vector<256x256xf32>
    %cst_8 = arith.constant 6.400000e+01 : f32
    %8 = vector.broadcast %cst_8 : f32 to vector<256x256xf32>
    %9 = arith.mulf %7, %8 : vector<256x256xf32>
    %c0_9 = arith.constant 0 : index
    %c0_10 = arith.constant 0 : index
    %10 = vector.load %arg6[%c0_9, %c0_10] : memref<256x256xf32, #tpu.memory_space<vmem>>, vector<256x256xf32>
    %11 = arith.addf %9, %10 : vector<256x256xf32>
    %cst_11 = arith.constant dense<0xFF800000> : vector<256xf32>
    %12 = vector.multi_reduction <maximumf>, %11, %cst_11 [1] : vector<256x256xf32> to vector<256xf32>
    %13 = vector.shape_cast %12 : vector<256xf32> to vector<256x1xf32>
    %14 = vector.broadcast %13 : vector<256x1xf32> to vector<256x256xf32>
    %15 = arith.subf %11, %14 : vector<256x256xf32>
    %16 = math.exp %15 : vector<256x256xf32>
    %cst_12 = arith.constant dense<0.000000e+00> : vector<256xf32>
    %17 = vector.multi_reduction <add>, %16, %cst_12 [1] : vector<256x256xf32> to vector<256xf32>
    %18 = vector.shape_cast %17 : vector<256xf32> to vector<256x1xf32>
    %19 = vector.broadcast %18 : vector<256x1xf32> to vector<256x256xf32>
    %20 = arith.divf %16, %19 : vector<256x256xf32>
    %c0_13 = arith.constant 0 : index
    %c0_14 = arith.constant 0 : index
    %21 = vector.load %arg3[%c0_13, %c0_14] : memref<256x32xf32, #tpu.memory_space<vmem>>, vector<256x32xf32>
    %cst_15 = arith.constant dense<0.000000e+00> : vector<32x256xf32>
    %22 = tpu.matmul %21, %20, %cst_15 {dimension_numbers = #tpu.dot_dimension_numbers<[0], [0], [1], [1], [0, 1, 1, 1], [], []>, precision = #tpu.contract_precision<fp32>} : vector<256x32xf32>, vector<256x256xf32>, vector<32x256xf32> -> vector<32x256xf32>
    %c0_16 = arith.constant 0 : index
    %c0_17 = arith.constant 0 : index
    %23 = vector.load %arg7[%c0_16, %c0_17] : memref<32x256xf32, #tpu.memory_space<vmem>>, vector<32x256xf32>
    tpu.vector_store %arg7[%c0_16, %c0_17], %22 {strides = array<i32>} : memref<32x256xf32, #tpu.memory_space<vmem>>, vector<32x256xf32>,
    return
  }
  func.func @transform_0(%arg0: i32) -> (i32, i32) {
    %c0_i32 = arith.constant 0 : i32
    %c0_i32_0 = arith.constant 0 : i32
    return %arg0, %c0_i32 : i32, i32
  }
  func.func @transform_1(%arg0: i32) -> (i32, i32) {
    %c0_i32 = arith.constant 0 : i32
    %c0_i32_0 = arith.constant 0 : i32
    return %c0_i32, %arg0 : i32, i32
  }
  func.func @transform_2(%arg0: i32) -> (i32, i32) {
    %c0_i32 = arith.constant 0 : i32
    %c0_i32_0 = arith.constant 0 : i32
    return %arg0, %c0_i32 : i32, i32
  }
  func.func @transform_3(%arg0: i32) -> (i32, i32) {
    %c0_i32 = arith.constant 0 : i32
    %c0_i32_0 = arith.constant 0 : i32
    %c0_i32_1 = arith.constant 0 : i32
    return %c0_i32, %c0_i32_0 : i32, i32
  }
  func.func @transform_4(%arg0: i32) -> (i32, i32) {
    %c0_i32 = arith.constant 0 : i32
    %c0_i32_0 = arith.constant 0 : i32
    %c0_i32_1 = arith.constant 0 : i32
    return %c0_i32, %c0_i32_0 : i32, i32
  }
  func.func @transform_5(%arg0: i32) -> (i32, i32) {
    %c0_i32 = arith.constant 0 : i32
    %c0_i32_0 = arith.constant 0 : i32
    %c0_i32_1 = arith.constant 0 : i32
    return %c0_i32, %c0_i32_0 : i32, i32
  }
  func.func @transform_6(%arg0: i32) -> (i32, i32) {
    %c0_i32 = arith.constant 0 : i32
    %c0_i32_0 = arith.constant 0 : i32
    return %c0_i32, %arg0 : i32, i32
  }
}

</mosaic_0001>

<bundles_post_ra>
// kernel: tpu_custom_call.1
= control target key start
LH: loop header
LB: loop body
LE: loop exit
PB: predicated region body
PF: predicated region fallthrough
CT: control target
= control target key end

     0   :  { %11 = vsyncpa [#allocation4], 0  ;;  %s12055_s0 = inlined_call_operand.vmem [shape: f32[512,32], index: 0, kind: input, shape index: {}]   ;;  %s12056_s1 = inlined_call_operand.vmem [shape: f32[16,512], index: 1, kind: input, shape index: {}]   ;;  %s12057_s2 = inlined_call_operand.vmem [shape: f32[512,32], index: 2, kind: input, shape index: {}]   ;;  %s12058_s3 = inlined_call_operand.vmem [shape: f32[32,16], index: 3, kind: input, shape index: {}]   ;;  %s12059_s4 = inlined_call_operand.vmem [shape: f32[1,16], index: 4, kind: input, shape index: {}]   ;;  %s12060_s5 = inlined_call_operand.vmem [shape: f32[256,256], index: 5, kind: input, shape index: {}]   ;;  %s12061_s6 = inlined_call_operand.hbm [shape: f32[32,512], index: 6, kind: output, shape index: {}]  }
   0x1   :  { %13 = vsyncpa [#allocation4 + $0x1], 0  ;;  %s8663_s21 = smov 0   ;;  %s8665_s22 = smov 0  }
   0x2   :  { %s8667_s23 = smov 0   ;;  %s8669_s24 = smov 0  }
   0x3 LB: > { %s8684_s25 = sadd.s32 4294967295, %s8621_s24   ;;  %s6743_s26 = sadd.s32 4294967294, %s8621_s24   ;;  %s8621_s24 = sphi %s8669_s24, %s13100_s24   ;;  %s8617_s23 = sphi %s8667_s23, %s13099_s23   ;;  %s8613_s22 = sphi %s8665_s22, %s13098_s22   ;;  %s8609_s21 = sphi %s8663_s21, %s13097_s21  }
   0x4   : > { %s8688_s27 = sadd.s32 1, %s8621_s24   ;;  %s52_s28 = sadd.s32 1, %s8617_s23 }
   0x5   : > { %s49_s29 = ssub.s32 %s8621_s24, %s8688_s27  ;;  %p59_p0 = scmp.ne.s32.totalorder %s8617_s23, %s8613_s22 }
   0x6   : > { %p50_p1 = scmp.eq.s32.totalorder %s49_s29, 0  ;;  %p60_p2 = scmp.eq.s32.totalorder %s8621_s24, 0 }
   0x7   : > { %p178_p3 = scmp.eq.s32.totalorder %s8684_s25, 1  ;;  %p183_p4 = scmp.ne.s32.totalorder %s8613_s22, %s8609_s21 }
   0x8   : > { %s8700_s30 = scalar_select %p50_p1, %s8617_s23, %s52_s28  }
   0x9   : > { %p61_p5 = por %p60_p2, %p59_p0  ;;  %p8702_p6 = por %p178_p3, %p59_p0 }
   0xa   : > { %p184_p7 = scmp.eq.s32.totalorder %s6743_s26, 1  ;;  %p6745_p9 = scmp.ge.s32.totalorder %s8621_s24, 2 }
   0xc   : > { %p8706_p8 = por %p184_p7, %p183_p4  ;;  %209 = sbr.rel (%p6745_p9) target bundleno = 26 (0x1a), region = 28 }
  0x13   : > { %221 = sbr.rel (!%p61_p5) target bundleno = 26 (0x1a), region = 36  ;;  %s223_s9 = sand.u32 (%p61_p5), 1, %s8617_s23  }
  0x14   : > { %s6762_s10 = sshll.u32 (%p61_p5), %s8621_s24, 4  ;;  %s6746_s11 = sshll.u32 (%p61_p5), %s223_s9, 5 }
  0x15   : > { %s228_s14 = scalar_lea.vmem (%p61_p5), %s12056_s1, %s6762_s10  ;;  %s225_s15 = scalar_lea.vmem (%p61_p5), [#allocation2], %s6746_s11 }
  0x16   : > { %v241_v0 = vld [vmem:[%s228_s14] sm:$0xff] (%p61_p5)  ;;  %v243_v1 = vld [vmem:[%s228_s14 + $0x8] sm:$0xff] (%p61_p5) }
  0x17   : > { %v245_v2 = vld [vmem:[%s228_s14 + $0x20] sm:$0xff] (%p61_p5)  ;;  %242 = vst [vmem:[%s225_s15] sm:$0xff] (%p61_p5), %v241_v0  ;;  %244 = vst [vmem:[%s225_s15 + $0x8] sm:$0xff] (%p61_p5), %v243_v1  ;;  %v247_v3 = vld [vmem:[%s228_s14 + $0x28] sm:$0xff] (%p61_p5) }
  0x18   : > { %246 = vst [vmem:[%s225_s15 + $0x10] sm:$0xff] (%p61_p5), %v245_v2  ;;  %248 = vst [vmem:[%s225_s15 + $0x18] sm:$0xff] (%p61_p5), %v247_v3 }
  0x1a PF: > { %p6749_p10 = scmp.ge.s32.totalorder %s8621_s24, 1  ;;  %p262_p11 = scmp.lt.s32.totalorder %s8621_s24, 3 }
  0x1c   : > { %p263_p12 = pnand %p6749_p10, %p262_p11 }
  0x1e   : > { %266 = sbr.rel (%p263_p12) target bundleno = 2496 (0x9c0), region = 63 }
  0x25   : > { %v354_v4 = vld [vmem:[%s12058_s3] sm:$0xff]  ;;  %v355_v5 = vld [vmem:[%s12058_s3 + $0x8] sm:$0xff]  ;;  %v356_v6 = vld [vmem:[%s12058_s3 + $0x10] sm:$0xff]  ;;  %s6752_s28 = sshll.u32 %s8684_s25, 5  ;;  %vm365_vm0 = vcmask 261120   ;;  %s9347_s14 = sand.u32 1, %s8613_s22  }
  0x26   : > { %v463_v7 = vand.u32 4294901760, %v354_v4  ;;  %v466_v8 = vand.u32 4294901760, %v355_v5  ;;  %v357_v9 = vld [vmem:[%s12058_s3 + $0x18] sm:$0xff]  ;;  %v469_v10 = vand.u32 4294901760, %v356_v6  ;;  %p309_p13 = scmp.lt.s32.totalorder %s6752_s28, 63  ;;  %s6750_s15 = sshll.u32 %s9347_s14, 5 }
  0x27   : > { %v472_v11 = vand.u32 4294901760, %v357_v9  ;;  %s271_s16 = scalar_lea.vmem [#allocation2], %s6750_s15  ;;  %vm2284_vm1 = vcmask 130048   ;;  %s6763_s19 = sshll.u32 %s8684_s25, 8 }
  0x28   : > { %v8733_v12 = vpack.c.bf16 %v466_v8, %v463_v7  ;;  %s13102_s28 = smov (!%p309_p13, %s6752_s28), 63  ;;  %v8737_v13 = vsub.f32 %v354_v4, %v463_v7  ;;  %v8739_v14 = vsub.f32 %v355_v5, %v466_v8  ;;  %v8741_v15 = vsub.f32 %v356_v6, %v469_v10  ;;  %s12011_s29 = scalar_lea.hbm %s12061_s6, %s6763_s19 }
  0x29   : > { %v8743_v16 = vpack.c.bf16 %v472_v11, %v469_v10  ;;  %v8745_v17 = vsub.f32 %v357_v9, %v472_v11  ;;  %s6753_s10 = sshll.u32 %s13102_s28, 3  ;;  %s6751_s28 = sshll.u32 %s9347_s14, 6 }
  0x2a   : > { %7317 = vmatprep.subr.bf16.mxu0 %v8733_v12  ;;  %v12079_v18 = vand.u32 4294901760, %v8737_v13  ;;  %v12077_v19 = vand.u32 4294901760, %v8739_v14  ;;  %s8757_s13 = scalar_lea.vmem %s12055_s0, %s6753_s10  ;;  %v12074_v25 = vand.u32 4294901760, %v8741_v15  ;;  %s10857_s17 = scalar_lea.vmem %s12057_s2, %s6753_s10 }
  0x2b   : > { %7319 = vmatpush3.bf16.msra.mxu0 %v8733_v12  ;;  %v322_v20 = vld [vmem:[%s8757_s13] sm:$0xff]  ;;  %v323_v23 = vld [vmem:[%s8757_s13 + $0x8] sm:$0xff]  ;;  %v324_v24 = vld [vmem:[%s8757_s13 + $0x10] sm:$0xff]  ;;  %v12073_v26 = vand.u32 4294901760, %v8745_v17  ;;  %s307_s10 = scalar_lea.vmem [#allocation3], %s6751_s28  ;;  %s6638_s9 = scalar_lea.sflag [#allocation4], %s9347_s14 }
  0x2c   : > { %7321 = vmatprep.subr.bf16.mxu0 %v8743_v16  ;;  %v855_v21 = vsub.f32 %v8737_v13, %v12079_v18  ;;  %v862_v22 = vsub.f32 %v8739_v14, %v12077_v19  ;;  %v367_v27 = vsel %vm365_vm0, %v322_v20, 0  ;;  %v370_v28 = vsel %vm365_vm0, %v323_v23, 0  ;;  %v325_v30 = vld [vmem:[%s8757_s13 + $0x18] sm:$0xff]  ;;  %v326_v31 = vld [vmem:[%s8757_s13 + $0x20] sm:$0xff]  ;;  %v327_v32 = vld [vmem:[%s8757_s13 + $0x28] sm:$0xff]  ;;  %s6651_s18 = sshll.u32 %s307_s10, 4  ;;  %s12006_s18 = int_to_ptr.vmem [resolvable:$true] %s6651_s18 }
  0x2d   : > { %v373_v29 = vsel %vm365_vm0, %v324_v24, 0  ;;  %v8777_v33 = vand.u32 4294901760, %v367_v27  ;;  %v8779_v36 = vand.u32 4294901760, %v370_v28  ;;  %v328_v37 = vld [vmem:[%s8757_s13 + $0x30] sm:$0xff]  ;;  %v376_v39 = vsel %vm365_vm0, %v325_v30, 0  ;;  %v329_v46 = vld [vmem:[%s8757_s13 + $0x38] sm:$0xff] }
  0x2e   : > { %v856_v34 = vand.u32 4294901760, %v855_v21  ;;  %v863_v35 = vand.u32 4294901760, %v862_v22  ;;  %v8783_v38 = vand.u32 4294901760, %v373_v29  ;;  %v379_v40 = vsel %vm365_vm0, %v326_v31, 0  ;;  %v330_v3 = vld [vmem:[%s8757_s13 + $0x40] sm:$0xff]  ;;  %v331_v4 = vld [vmem:[%s8757_s13 + $0x48] sm:$0xff] }
  0x2f   : > { %7323 = vmatpush3.bf16.msra.mxu0 %v8743_v16  ;;  %v382_v41 = vsel %vm365_vm0, %v327_v32, 0  ;;  %v8789_v42 = vsub.f32 %v367_v27, %v8777_v33  ;;  %v8792_v44 = vsub.f32 %v370_v28, %v8779_v36  ;;  %v8794_v45 = vand.u32 4294901760, %v376_v39  ;;  %v332_v21 = vld [vmem:[%s8757_s13 + $0x50] sm:$0xff]  ;;  %v333_v22 = vld [vmem:[%s8757_s13 + $0x58] sm:$0xff]  ;;  %v334_v28 = vld [vmem:[%s8757_s13 + $0x60] sm:$0xff]  ;;  %s8559_s11 = scalar_lea.vmem %s12006_s18, 1024 }
  0x30   : > { %v7324_v43 = vpack.c.bf16 %v863_v35, %v856_v34  ;;  %v8798_v47 = vsub.f32 %v373_v29, %v8783_v38  ;;  %v8800_v48 = vand.u32 4294901760, %v379_v40  ;;  %v8802_v49 = vand.u32 4294901760, %v382_v41  ;;  %v335_v35 = vld [vmem:[%s8757_s13 + $0x68] sm:$0xff]  ;;  %p8560_p0 = scmp.ne.s32.totalorder %s12006_s18, %s8559_s11  ;;  %s8624_s25 = smov [#allocation3]  }
  0x31   : > { %v385_v50 = vsel %vm365_vm0, %v328_v37, 0  ;;  %v12075_v51 = vand.u32 4294901760, %v8789_v42  ;;  %v12072_v52 = vand.u32 4294901760, %v8792_v44  ;;  %v8808_v53 = vsub.f32 %v376_v39, %v8794_v45  ;;  %v336_v37 = vld [vmem:[%s8757_s13 + $0x70] sm:$0xff]  ;;  %v343_v19 = vld [vmem:[%s8757_s13 + $0xa8] sm:$0xff]  ;;  %s8563_s12 = sshll.u32 %s8624_s25, 4  ;;  %s8564_s12 = int_to_ptr.vmem [resolvable:$false] %s8563_s12 }
  0x32   : > { %7325 = vmatprep.subr.bf16.mxu0 %v7324_v43  ;;  %v8810_v54 = vand.u32 4294901760, %v385_v50  ;;  %v12071_v55 = vand.u32 4294901760, %v8798_v47  ;;  %v8814_v56 = vsub.f32 %v379_v40, %v8800_v48  ;;  %v8817_v57 = vsub.f32 %v382_v41, %v8802_v49  ;;  %p8561_p1 = pnand %p8560_p0, %p8702_p6  ;;  %p8566_p3 = scmp.lt.s32.totalorder %s12006_s18, %s8564_s12 }
  0x33   : > { %v388_v58 = vsel %vm365_vm0, %v329_v46, 0  ;;  %v534_v59 = vsub.f32 %v8789_v42, %v12075_v51  ;;  %v544_v60 = vsub.f32 %v8792_v44, %v12072_v52  ;;  %v12070_v61 = vand.u32 4294901760, %v8808_v53  ;;  %v342_v52 = vld [vmem:[%s8757_s13 + $0xa0] sm:$0xff] }
  0x34   : > { %12443 = vst [vmem:[#allocation6_spill] sm:$0xff] %v8817_v57  ;;  %v8828_v62 = vsub.f32 %v385_v50, %v8810_v54  ;;  %v554_v63 = vsub.f32 %v8798_v47, %v12071_v55  ;;  %v12068_v0 = vand.u32 4294901760, %v8814_v56  ;;  %v12066_v1 = vand.u32 4294901760, %v8817_v57  ;;  %v341_v55 = vld [vmem:[%s8757_s13 + $0x98] sm:$0xff]  ;;  %p8562_p2 = pneg %p8561_p1 }
  0x35   : > { %v8835_v2 = vand.u32 4294901760, %v388_v58  ;;  %v535_v5 = vand.u32 4294901760, %v534_v59  ;;  %v545_v6 = vand.u32 4294901760, %v544_v60  ;;  %v564_v7 = vsub.f32 %v8808_v53, %v12070_v61 }
  0x36   : > { %12444 = vst [vmem:[#allocation7_spill] sm:$0xff] %v8828_v62  ;;  %v12065_v8 = vand.u32 4294901760, %v8828_v62  ;;  %v555_v9 = vand.u32 4294901760, %v554_v63  ;;  %v574_v10 = vsub.f32 %v8814_v56, %v12068_v0  ;;  %v584_v11 = vsub.f32 %v8817_v57, %v12066_v1  ;;  %v340_v0 = vld [vmem:[%s8757_s13 + $0x90] sm:$0xff] }
  0x37   : > { %v8850_v20 = vsub.f32 %v388_v58, %v8835_v2  ;;  %6988 = vmatprep.mubr.f32.mxu0 %v535_v5  ;;  %v391_v24 = vsel %vm365_vm0, %v330_v3, 0  ;;  %v394_v27 = vsel %vm365_vm0, %v331_v4, 0  ;;  %v8863_v29 = vsub.f32 %v8741_v15, %v12074_v25  ;;  %v337_v5 = vld [vmem:[%s8757_s13 + $0x78] sm:$0xff] }
  0x38   : > { %v594_v23 = vsub.f32 %v8828_v62, %v12065_v8  ;;  %6989 = vmatmul.mubr.f32.vlgmr.msra.gmra.mrb[0].mxu0 %v545_v6  ;;  %v565_v30 = vand.u32 4294901760, %v564_v7  ;;  %v575_v31 = vand.u32 4294901760, %v574_v10  ;;  %v8866_v34 = vand.u32 4294901760, %v391_v24 }
  0x39   : > { %12445 = vst [vmem:[#allocation8_spill] sm:$0xff] %v8850_v20  ;;  %v12063_v32 = vand.u32 4294901760, %v8850_v20  ;;  %7327 = vmatpush3.bf16.msra.mxu0 %v7324_v43  ;;  %6991 = vmatprep.mubr.f32.mxu0 %v555_v9  ;;  %v585_v39 = vand.u32 4294901760, %v584_v11  ;;  %v8870_v40 = vand.u32 4294901760, %v394_v27  ;;  %v397_v41 = vsel %vm365_vm0, %v332_v21, 0 }
  0x3a   : > { %v400_v46 = vsel %vm365_vm0, %v333_v22, 0  ;;  %v595_v50 = vand.u32 4294901760, %v594_v23  ;;  %v8875_v58 = vsub.f32 %v391_v24, %v8866_v34  ;;  %v8877_v59 = vand.u32 4294901760, %v397_v41 }
  0x3b   : > { %v8879_v60 = vand.u32 4294901760, %v400_v46  ;;  %v8882_v63 = vsub.f32 %v394_v27, %v8870_v40  ;;  %v403_v43 = vsel %vm365_vm0, %v334_v28, 0  ;;  %v406_v3 = vsel %vm365_vm0, %v335_v35, 0 }
  0x3c   : > { %12446 = vst [vmem:[#allocation9_spill] sm:$0xff] %v8875_v58  ;;  %v409_v4 = vsel %vm365_vm0, %v336_v37, 0  ;;  %6992 = vmatmul.mubr.f32.gmra.mrb[2].mxu0 %v565_v30  ;;  %v604_v6 = vsub.f32 %v8850_v20, %v12063_v32  ;;  %v12062_v7 = vand.u32 4294901760, %v8875_v58  ;;  %v8893_v9 = vsub.f32 %v397_v41, %v8877_v59  ;;  %v352_v20 = vld [vmem:[%s8757_s13 + $0xf0] sm:$0xff] }
  0x3d   : > { %12447 = vst [vmem:[#allocation10_spill] sm:$0xff] %v8882_v63  ;;  %v8896_v10 = vsub.f32 %v400_v46, %v8879_v60  ;;  %6994 = vmatprep.mubr.f32.mxu0 %v575_v31  ;;  %v12064_v11 = vand.u32 4294901760, %v8882_v63  ;;  %v8899_v21 = vand.u32 4294901760, %v403_v43  ;;  %v8901_v22 = vand.u32 4294901760, %v406_v3  ;;  %v338_v46 = vld [vmem:[%s8757_s13 + $0x80] sm:$0xff] }
  0x3e   : > { %12448 = vst [vmem:[#allocation11_spill] sm:$0xff] %v8893_v9  ;;  %v8903_v23 = vand.u32 4294901760, %v409_v4  ;;  %v614_v24 = vsub.f32 %v8875_v58, %v12062_v7  ;;  %v12067_v27 = vand.u32 4294901760, %v8893_v9  ;;  %v412_v30 = vsel %vm365_vm0, %v337_v5, 0  ;;  %v351_v58 = vld [vmem:[%s8757_s13 + $0xe8] sm:$0xff] }
  0x3f   : > { %12449 = vst [vmem:[#allocation12_spill] sm:$0xff] %v8896_v10  ;;  %v12069_v28 = vand.u32 4294901760, %v8896_v10  ;;  %v624_v31 = vsub.f32 %v8882_v63, %v12064_v11  ;;  %v8915_v35 = vsub.f32 %v403_v43, %v8899_v21  ;;  %v8918_v37 = vsub.f32 %v406_v3, %v8901_v22 }
  0x40   : > { %v8921_v41 = vsub.f32 %v409_v4, %v8903_v23  ;;  %6995 = vmatmul.mubr.f32.gmra.mrb[4].mxu0 %v585_v39  ;;  %v605_v7 = vand.u32 4294901760, %v604_v6  ;;  %v615_v32 = vand.u32 4294901760, %v614_v24  ;;  %v8924_v5 = vand.u32 4294901760, %v412_v30  ;;  %v339_v6 = vld [vmem:[%s8757_s13 + $0x88] sm:$0xff] }
  0x41   : > { %12450 = vst [vmem:[#allocation13_spill] sm:$0xff] %v8915_v35  ;;  %12451 = vst [vmem:[#allocation14_spill] sm:$0xff] %v8918_v37  ;;  %v876_v11 = vsub.f32 %v8745_v17, %v12073_v26  ;;  %6997 = vmatprep.mubr.f32.mxu0 %v595_v50  ;;  %v634_v43 = vsub.f32 %v8893_v9, %v12067_v27  ;;  %v644_v3 = vsub.f32 %v8896_v10, %v12069_v28 }
  0x42   : > { %12452 = vst [vmem:[#allocation15_spill] sm:$0xff] %v8921_v41  ;;  %v12076_v39 = vand.u32 4294901760, %v8915_v35  ;;  %v12078_v4 = vand.u32 4294901760, %v8918_v37  ;;  %v12080_v24 = vand.u32 4294901760, %v8921_v41  ;;  %v415_v8 = vsel %vm365_vm0, %v338_v46, 0 }
  0x43   : > { %v625_v50 = vand.u32 4294901760, %v624_v31  ;;  %v8941_v1 = vsub.f32 %v412_v30, %v8924_v5  ;;  %v8943_v27 = vand.u32 4294901760, %v415_v8  ;;  %v8948_v28 = vpack.c.bf16 %v8739_v14, %v8737_v13 }
  0x44   : > { %6998 = vmatmul.mubr.f32.gmra.mrb[6].mxu0 %v605_v7  ;;  %v654_v61 = vsub.f32 %v8915_v35, %v12076_v39  ;;  %v870_v46 = vand.u32 4294901760, %v8863_v29  ;;  %v877_v31 = vand.u32 4294901760, %v876_v11  ;;  %v418_v30 = vsel %vm365_vm0, %v339_v6, 0 }
  0x45   : > { %12453 = vst [vmem:[#allocation16_spill] sm:$0xff] %v8941_v1  ;;  %7000 = vmatprep.mubr.f32.mxu0 %v615_v32  ;;  %v635_v26 = vand.u32 4294901760, %v634_v43  ;;  %v645_v25 = vand.u32 4294901760, %v644_v3  ;;  %v664_v7 = vsub.f32 %v8918_v37, %v12078_v4  ;;  %v8961_v51 = vsub.f32 %v415_v8, %v8943_v27  ;;  %v344_v32 = vld [vmem:[%s8757_s13 + $0xb0] sm:$0xff] }
  0x46   : > { %v674_v39 = vsub.f32 %v8921_v41, %v12080_v24  ;;  %v7328_v29 = vpack.c.bf16 %v877_v31, %v870_v46  ;;  %v8966_v11 = vand.u32 4294901760, %v418_v30  ;;  %v421_v6 = vsel %vm365_vm0, %v340_v0, 0 }
  0x47   : > { %12454 = vst [vmem:[#allocation17_spill] sm:$0xff] %v8961_v51  ;;  %v8972_v3 = vand.u32 4294901760, %v421_v6  ;;  %v424_v8 = vsel %vm365_vm0, %v341_v55, 0  ;;  %v427_v4 = vsel %vm365_vm0, %v342_v52, 0  ;;  %v655_v18 = vand.u32 4294901760, %v654_v61  ;;  %v345_v61 = vld [vmem:[%s8757_s13 + $0xb8] sm:$0xff] }
  0x48   : > { %7001 = vmatmul.mubr.f32.gmra.mrb[8].mxu0 %v625_v50  ;;  %7329 = vmatprep.subr.bf16.mxu0 %v7328_v29  ;;  %v8978_v31 = vsub.f32 %v418_v30, %v8966_v11  ;;  %v8980_v0 = vand.u32 4294901760, %v424_v8  ;;  %v8985_v43 = vand.u32 4294901760, %v427_v4  ;;  %v430_v55 = vsel %vm365_vm0, %v343_v19, 0  ;;  %v346_v50 = vld [vmem:[%s8757_s13 + $0xc0] sm:$0xff] }
  0x49   : > { %7003 = vmatprep.mubr.f32.mxu0 %v635_v26  ;;  %7331 = vmatpush3.bf16.msra.mxu0 %v7328_v29  ;;  %v8983_v24 = vsub.f32 %v421_v6, %v8972_v3  ;;  %v433_v52 = vsel %vm365_vm0, %v344_v32, 0  ;;  %v665_v30 = vand.u32 4294901760, %v664_v7  ;;  %v675_v46 = vand.u32 4294901760, %v674_v39 }
  0x4a   : > { %12455 = vst [vmem:[#allocation18_spill] sm:$0xff] %v8978_v31  ;;  %12456 = vst [vmem:[#allocation19_spill] sm:$0xff] %v8980_v0  ;;  %7333 = vmatprep.subr.bf16.mxu0 %v8948_v28  ;;  %v8992_v41 = vand.u32 4294901760, %v430_v55  ;;  %v8994_v26 = vand.u32 4294901760, %v433_v52  ;;  %v12461_v29 = vand.u32 4294901760, %v8941_v1  ;;  %v9001_v32 = vsub.f32 %v424_v8, %v8980_v0 }
  0x4b   : > { %12457 = vst [vmem:[#allocation20_spill] sm:$0xff] %v8983_v24  ;;  %12458 = vst [vmem:[#allocation21_spill] sm:$0xff] %v8985_v43  ;;  %v436_v37 = vsel %vm365_vm0, %v345_v61, 0  ;;  %v12463_v39 = vand.u32 4294901760, %v8961_v51  ;;  %v439_v10 = vsel %vm365_vm0, %v346_v50, 0  ;;  %v348_v61 = vld [vmem:[%s8757_s13 + $0xd0] sm:$0xff] }
  0x4c   : > { %12459 = vst [vmem:[#allocation22_spill] sm:$0xff] %v8992_v41  ;;  %12460 = vst [vmem:[#allocation23_spill] sm:$0xff] %v8994_v26  ;;  %7004 = vmatmul.mubr.f32.gmra.mrb[10].mxu0 %v645_v25  ;;  %v684_v6 = vsub.f32 %v8941_v1, %v12461_v29  ;;  %v9009_v25 = vsub.f32 %v427_v4, %v8985_v43  ;;  %v347_v29 = vld [vmem:[%s8757_s13 + $0xc8] sm:$0xff]  ;;  %v9014_v19 = vsub.f32 %v430_v55, %v8992_v41 }
  0x4d   : > { %12462 = vst [vmem:[#allocation24_spill] sm:$0xff] %v9001_v32  ;;  %7006 = vmatprep.mubr.f32.mxu0 %v655_v18  ;;  %v694_v7 = vsub.f32 %v8961_v51, %v12463_v39  ;;  %v9017_v8 = vsub.f32 %v433_v52, %v8994_v26  ;;  %v9019_v18 = vand.u32 4294901760, %v436_v37  ;;  %v12468_v35 = vand.u32 4294901760, %v8978_v31 }
  0x4e   : > { %12464 = vst [vmem:[#allocation25_spill] sm:$0xff] %v9009_v25  ;;  %12465 = vst [vmem:[#allocation26_spill] sm:$0xff] %v9014_v19  ;;  %v685_v39 = vand.u32 4294901760, %v684_v6  ;;  %v9026_v51 = vand.u32 4294901760, %v439_v10  ;;  %v12470_v1 = vand.u32 4294901760, %v8983_v24  ;;  %v442_v63 = vsel %vm365_vm0, %v347_v29, 0 }
  0x4f   : > { %12466 = vst [vmem:[#allocation27_spill] sm:$0xff] %v9017_v8  ;;  %12467 = vst [vmem:[#allocation28_spill] sm:$0xff] %v9019_v18  ;;  %v704_v4 = vsub.f32 %v8978_v31, %v12468_v35  ;;  %v695_v55 = vand.u32 4294901760, %v694_v7  ;;  %v349_v6 = vld [vmem:[%s8757_s13 + $0xd8] sm:$0xff]  ;;  %v9038_v31 = vsub.f32 %v436_v37, %v9019_v18  ;;  %v12475_v50 = vand.u32 4294901760, %v9009_v25 }
  0x50   : > { %7007 = vmatmul.mubr.f32.gmra.mrb[12].mxu0 %v665_v30  ;;  %12469 = vst [vmem:[#allocation29_spill] sm:$0xff] %v9026_v51  ;;  %v714_v52 = vsub.f32 %v8983_v24, %v12470_v1  ;;  %v445_v30 = vsel %vm365_vm0, %v348_v61, 0  ;;  %v12472_v1 = vand.u32 4294901760, %v9001_v32  ;;  %v9045_v29 = vsub.f32 %v439_v10, %v9026_v51 }
  0x51   : > { %7009 = vmatprep.mubr.f32.mxu0 %v675_v46  ;;  %12471 = vst [vmem:[#allocation30_spill] sm:$0xff] %v9038_v31  ;;  %v350_v46 = vld [vmem:[%s8757_s13 + $0xe0] sm:$0xff]  ;;  %v705_v7 = vand.u32 4294901760, %v704_v4  ;;  %v9047_v61 = vand.u32 4294901760, %v442_v63  ;;  %v734_v37 = vsub.f32 %v9009_v25, %v12475_v50  ;;  %v9052_v24 = vand.u32 4294901760, %v445_v30 }
  0x52   : > { %v724_v9 = vsub.f32 %v9001_v32, %v12472_v1  ;;  %12473 = vst [vmem:[#allocation31_spill] sm:$0xff] %v9045_v29  ;;  %v715_v35 = vand.u32 4294901760, %v714_v52  ;;  %v451_v4 = vsel %vm365_vm0, %v350_v46, 0  ;;  %v12477_v1 = vand.u32 4294901760, %v9014_v19 }
  0x53   : > { %12474 = vst [vmem:[#allocation32_spill] sm:$0xff] %v9047_v61  ;;  %12476 = vst [vmem:[#allocation33_spill] sm:$0xff] %v9052_v24  ;;  %v12478_v32 = vand.u32 4294901760, %v9017_v8  ;;  %v735_v62 = vand.u32 4294901760, %v734_v37  ;;  %v457_v52 = vsel %vm365_vm0, %v352_v20, 0  ;;  %v12481_v25 = vand.u32 4294901760, %v9038_v31 }
  0x54   : > { %7010 = vmatmul.mubr.f32.gmra.mrb[14].mxu0 %v685_v39  ;;  %v448_v39 = vsel %vm365_vm0, %v349_v6, 0  ;;  %v744_v10 = vsub.f32 %v9014_v19, %v12477_v1  ;;  %v725_v50 = vand.u32 4294901760, %v724_v9  ;;  %v9067_v6 = vsub.f32 %v442_v63, %v9047_v61 }
  0x55   : > { %7012 = vmatprep.mubr.f32.mxu0 %v695_v55  ;;  %v754_v55 = vsub.f32 %v9017_v8, %v12478_v32  ;;  %v9069_v46 = vand.u32 4294901760, %v448_v39  ;;  %v9072_v1 = vsub.f32 %v445_v30, %v9052_v24  ;;  %v9074_v19 = vand.u32 4294901760, %v451_v4 }
  0x56   : > { %v454_v32 = vsel %vm365_vm0, %v351_v58, 0  ;;  %v745_v9 = vand.u32 4294901760, %v744_v10  ;;  %v764_v63 = vsub.f32 %v9038_v31, %v12481_v25  ;;  %v12121_v30 = vand.u32 4294901760, %v9067_v6 }
  0x57   : > { %12479 = vst [vmem:[#allocation34_spill] sm:$0xff] %v9069_v46  ;;  %12480 = vst [vmem:[#allocation35_spill] sm:$0xff] %v9074_v19  ;;  %v755_v8 = vand.u32 4294901760, %v754_v55  ;;  %v9087_v57 = vsub.f32 %v448_v39, %v9069_v46  ;;  %v9089_v58 = vand.u32 4294901760, %v454_v32  ;;  %v12122_v20 = vand.u32 4294901760, %v9072_v1 }
  0x58   : > { %7013 = vmatmul.mubr.f32.gmra.mrb[16].mxu0 %v705_v7  ;;  %v353_v7 = vld [vmem:[%s8757_s13 + $0xf8] sm:$0xff]  ;;  %v9093_v10 = vsub.f32 %v451_v4, %v9074_v19  ;;  %v9095_v55 = vand.u32 4294901760, %v457_v52  ;;  %s8565_s13 = scalar_lea.vmem %s8564_s12, 2048 }
  0x59   : > { %7015 = vmatprep.mubr.f32.mxu0 %v715_v35  ;;  %v12482_v35 = vand.u32 4294901760, %v9045_v29  ;;  %12483 = vst [vmem:[#allocation36_spill] sm:$0xff] %v9087_v57  ;;  %12484 = vst [vmem:[#allocation37_spill] sm:$0xff] %v9089_v58  ;;  %v460_v25 = vsel %vm365_vm0, %v353_v7, 0  ;;  %v12123_v39 = vand.u32 4294901760, %v9087_v57  ;;  %v794_v31 = vsub.f32 %v9072_v1, %v12122_v20  ;;  %p8567_p4 = scmp.lt.s32.totalorder %s8565_s13, %s8559_s11 }
  0x5a   : > { %12485 = vst [vmem:[#allocation38_spill] sm:$0xff] %v9095_v55  ;;  %v12129_v7 = vand.u32 4294901760, %v9093_v10 }
  0x5b   : > { %v774_v37 = vsub.f32 %v9045_v29, %v12482_v35  ;;  %v784_v35 = vsub.f32 %v9067_v6, %v12121_v30  ;;  %v9103_v29 = vsub.f32 %v454_v32, %v9089_v58  ;;  %v804_v32 = vsub.f32 %v9087_v57, %v12123_v39  ;;  %p8568_p5 = por %p8567_p4, %p8566_p3 }
  0x5c   : > { %7016 = vmatmul.mubr.f32.gmra.mrb[18].mxu0 %v725_v50  ;;  %v765_v50 = vand.u32 4294901760, %v764_v63  ;;  %v814_v20 = vsub.f32 %v9093_v10, %v12129_v7  ;;  %v12504_v7 = vld [vmem:[#allocation25_spill] sm:$0xff] }
  0x5d   : > { %7018 = vmatprep.mubr.f32.mxu0 %v735_v62  ;;  %v9105_v62 = vand.u32 4294901760, %v460_v25  ;;  %v775_v4 = vand.u32 4294901760, %v774_v37  ;;  %v785_v63 = vand.u32 4294901760, %v784_v35  ;;  %v12128_v30 = vand.u32 4294901760, %v9103_v29  ;;  %p8569_p7 = pnand %p8568_p5, %p8562_p2 }
  0x5e   : > { %v795_v37 = vand.u32 4294901760, %v794_v31  ;;  %v815_v57 = vand.u32 4294901760, %v814_v20  ;;  %v7336_v20 = vpack.c.bf16 %v8745_v17, %v8741_v15 }
  0x5f   : > { %12486 = vst [vmem:[#allocation39_spill] sm:$0xff] %v9105_v62  ;;  %v824_v35 = vsub.f32 %v9103_v29, %v12128_v30  ;;  %v12503_v30 = vld [vmem:[#allocation24_spill] sm:$0xff] }
  0x60   : > { %7019 = vmatmul.mubr.f32.gmra.mrb[20].mxu0 %v745_v9  ;;  %v9112_v9 = vsub.f32 %v457_v52, %v9095_v55 }
  0x61   : > { %7021 = vmatprep.mubr.f32.mxu0 %v755_v8  ;;  %v9119_v8 = vsub.f32 %v460_v25, %v9105_v62  ;;  %v825_v25 = vand.u32 4294901760, %v824_v35  ;;  %v12490_v35 = vld [vmem:[#allocation7_spill] sm:$0xff] }
  0x62   : > { %v12127_v52 = vand.u32 4294901760, %v9112_v9 }
  0x63   : > { %v12126_v39 = vand.u32 4294901760, %v9119_v8 }
  0x64   : > { %7022 = vmatmul.mubr.f32.gmra.mrb[22].mxu0 %v765_v50  ;;  %v805_v50 = vand.u32 4294901760, %v804_v32  ;;  %v834_v31 = vsub.f32 %v9112_v9, %v12127_v52  ;;  %v12502_v52 = vld [vmem:[#allocation20_spill] sm:$0xff] }
  0x65   : > { %7024 = vmatprep.mubr.f32.mxu0 %v775_v4  ;;  %v844_v4 = vsub.f32 %v9119_v8, %v12126_v39  ;;  %v12501_v39 = vld [vmem:[#allocation18_spill] sm:$0xff] }
  0x67   : > { %v845_v32 = vand.u32 4294901760, %v844_v4  ;;  %v12493_v4 = vld [vmem:[#allocation10_spill] sm:$0xff] }
  0x68   : > { %7025 = vmatmul.mubr.f32.gmra.mrb[24].mxu0 %v785_v63  ;;  %v835_v63 = vand.u32 4294901760, %v834_v31  ;;  %v12491_v31 = vld [vmem:[#allocation8_spill] sm:$0xff] }
  0x69   : > { %7027 = vmatprep.mubr.f32.mxu0 %v795_v37 }
  0x6c   : > { %7028 = vmatmul.mubr.f32.gmra.mrb[26].mxu0 %v805_v50  ;;  %v12489_v50 = vld [vmem:[#allocation6_spill] sm:$0xff] }
  0x6d   : > { %7030 = vmatprep.mubr.f32.mxu0 %v815_v57  ;;  %v12487_v57 = vand.u32 4294901760, %v8737_v13  ;;  %v12494_v13 = vld [vmem:[#allocation11_spill] sm:$0xff] }
  0x70   : > { %7031 = vmatmul.mubr.f32.gmra.mrb[28].mxu0 %v825_v25  ;;  %v12492_v25 = vld [vmem:[#allocation9_spill] sm:$0xff] }
  0x71   : > { %7033 = vmatprep.mubr.f32.mxu0 %v835_v63  ;;  %v12496_v63 = vld [vmem:[#allocation13_spill] sm:$0xff] }
  0x74   : > { %7034 = vmatmul.mubr.f32.gmra.mrb[30].mxu0 %v845_v32  ;;  %v12497_v32 = vld [vmem:[#allocation14_spill] sm:$0xff] }
  0x75   : > { %7044 = vmatprep.mubr.f32.mxu0 %v8777_v33 }
  0x78   : > { %7045 = vmatmul.mubr.f32.vlgmr.msra.gmra.mrb[0].mxu0 %v8779_v36 }
  0x79   : > { %7335 = vmatpush3.bf16.msra.mxu0 %v8948_v28  ;;  %7047 = vmatprep.mubr.f32.mxu0 %v8783_v38  ;;  %v12488_v28 = vand.u32 4294901760, %v8739_v14  ;;  %v12495_v14 = vld [vmem:[#allocation12_spill] sm:$0xff] }
  0x7a   : > { %7337 = vmatprep.subr.bf16.mxu0 %v7336_v20 }
  0x7b   : > { %v7348_v37 = vpack.c.bf16 %v12488_v28, %v12487_v57  ;;  %v12499_v57 = vld [vmem:[#allocation16_spill] sm:$0xff]  ;;  %v12500_v28 = vld [vmem:[#allocation17_spill] sm:$0xff] }
  0x7c   : > { %7048 = vmatmul.mubr.f32.gmra.mrb[2].mxu0 %v8794_v45 }
  0x7d   : > { %7050 = vmatprep.mubr.f32.mxu0 %v8800_v48  ;;  %7339 = vmatpush3.bf16.msra.mxu0 %v7336_v20  ;;  %v12498_v20 = vld [vmem:[#allocation15_spill] sm:$0xff] }
  0x7e   : > { %7341 = vmatprep.subr.bf16.mxu0 %v8733_v12 }
  0x80   : > { %7051 = vmatmul.mubr.f32.gmra.mrb[4].mxu0 %v8802_v49 }
  0x81   : > { %7053 = vmatprep.mubr.f32.mxu0 %v8810_v54 }
  0x84   : > { %7054 = vmatmul.mubr.f32.gmra.mrb[6].mxu0 %v8835_v2 }
  0x85   : > { %7056 = vmatprep.mubr.f32.mxu0 %v8866_v34 }
  0x88   : > { %7057 = vmatmul.mubr.f32.gmra.mrb[8].mxu0 %v8870_v40 }
  0x89   : > { %7059 = vmatprep.mubr.f32.mxu0 %v8877_v59 }
  0x8c   : > { %7060 = vmatmul.mubr.f32.gmra.mrb[10].mxu0 %v8879_v60 }
  0x8d   : > { %7062 = vmatprep.mubr.f32.mxu0 %v8899_v21 }
  0x90   : > { %7063 = vmatmul.mubr.f32.gmra.mrb[12].mxu0 %v8901_v22 }
  0x91   : > { %7065 = vmatprep.mubr.f32.mxu0 %v8903_v23 }
  0x94   : > { %7066 = vmatmul.mubr.f32.gmra.mrb[14].mxu0 %v8924_v5 }
  0x95   : > { %7068 = vmatprep.mubr.f32.mxu0 %v8943_v27 }
  0x98   : > { %7069 = vmatmul.mubr.f32.gmra.mrb[16].mxu0 %v8966_v11 }
  0x99   : > { %7071 = vmatprep.mubr.f32.mxu0 %v8972_v3 }
  0x9c   : > { %7072 = vmatmul.mubr.f32.gmra.mrb[18].mxu0 %v8980_v0  ;;  %v12516_v0 = vand.u32 4294901760, %v8814_v56 }
  0x9d   : > { %7074 = vmatprep.mubr.f32.mxu0 %v8985_v43  ;;  %v12515_v43 = vand.u32 4294901760, %v8808_v53 }
  0xa0   : > { %7075 = vmatmul.mubr.f32.gmra.mrb[20].mxu0 %v8992_v41  ;;  %v12514_v41 = vand.u32 4294901760, %v8798_v47 }
  0xa1   : > { %7077 = vmatprep.mubr.f32.mxu0 %v8994_v26  ;;  %v12513_v26 = vand.u32 4294901760, %v8792_v44 }
  0xa4   : > { %7078 = vmatmul.mubr.f32.gmra.mrb[22].mxu0 %v9019_v18 }
  0xa5   : > { %7080 = vmatprep.mubr.f32.mxu0 %v9026_v51  ;;  %v12512_v51 = vand.u32 4294901760, %v8745_v17  ;;  %v12518_v17 = vand.u32 4294901760, %v12490_v35 }
  0xa8   : > { %7081 = vmatmul.mubr.f32.gmra.mrb[24].mxu0 %v9047_v61  ;;  %v12511_v61 = vand.u32 4294901760, %v8741_v15  ;;  %v12517_v15 = vand.u32 4294901760, %v12489_v50 }
  0xa9   : > { %7083 = vmatprep.mubr.f32.mxu0 %v9052_v24  ;;  %v12510_v24 = vand.u32 4294901760, %v8789_v42 }
  0xaa   : > { %v7352_v18 = vpack.c.bf16 %v12512_v51, %v12511_v61  ;;  %v12522_v51 = vand.u32 4294901760, %v12494_v13  ;;  %v12531_v61 = vand.u32 4294901760, %v12503_v30 }
  0xac   : > { %7084 = vmatmul.mubr.f32.gmra.mrb[26].mxu0 %v9069_v46  ;;  %v12509_v46 = vld [vmem:[#allocation36_spill] sm:$0xff] }
  0xad   : > { %7086 = vmatprep.mubr.f32.mxu0 %v9074_v19  ;;  %v12508_v19 = vld [vmem:[#allocation31_spill] sm:$0xff] }
  0xb0   : > { %7087 = vmatmul.mubr.f32.gmra.mrb[28].mxu0 %v9089_v58  ;;  %v12507_v58 = vld [vmem:[#allocation30_spill] sm:$0xff] }
  0xb1   : > { %7089 = vmatprep.mubr.f32.mxu0 %v9095_v55  ;;  %v12506_v55 = vld [vmem:[#allocation27_spill] sm:$0xff] }
  0xb4   : > { %7090 = vmatmul.mubr.f32.gmra.mrb[30].mxu0 %v9105_v62  ;;  %v12505_v62 = vld [vmem:[#allocation26_spill] sm:$0xff] }
  0xb5   : > { %7100 = vmatprep.mubr.f32.mxu0 %v8789_v42  ;;  %v12519_v42 = vand.u32 4294901760, %v12491_v31 }
  0xb8   : > { %7101 = vmatmul.mubr.f32.vlgmr.msra.gmra.mrb[0].mxu0 %v8792_v44  ;;  %v12520_v44 = vand.u32 4294901760, %v12492_v25 }
  0xb9   : > { %7343 = vmatpush3.bf16.msra.mxu0 %v8733_v12  ;;  %7103 = vmatprep.mubr.f32.mxu0 %v8798_v47  ;;  %v12521_v47 = vand.u32 4294901760, %v12493_v4 }
  0xba   : > { %7345 = vmatprep.subr.bf16.mxu0 %v8743_v16 }
  0xbc   : > { %7104 = vmatmul.mubr.f32.gmra.mrb[2].mxu0 %v8808_v53  ;;  %v12523_v53 = vand.u32 4294901760, %v12495_v14 }
  0xbd   : > { %7106 = vmatprep.mubr.f32.mxu0 %v8814_v56  ;;  %7347 = vmatpush3.bf16.msra.mxu0 %v8743_v16  ;;  %v12524_v56 = vand.u32 4294901760, %v12496_v63 }
  0xbe   : > { %7349 = vmatprep.subr.bf16.mxu0 %v7348_v37 }
  0xc0   : > { %7107 = vmatmul.mubr.f32.gmra.mrb[4].mxu0 %v12489_v50  ;;  %v12533_v50 = vand.u32 4294901760, %v12505_v62 }
  0xc1   : > { %7109 = vmatprep.mubr.f32.mxu0 %v12490_v35  ;;  %v12534_v35 = vand.u32 4294901760, %v12506_v55 }
  0xc4   : > { %7110 = vmatmul.mubr.f32.gmra.mrb[6].mxu0 %v12491_v31  ;;  %v12535_v31 = vand.u32 4294901760, %v12507_v58 }
  0xc5   : > { %7112 = vmatprep.mubr.f32.mxu0 %v12492_v25  ;;  %v12553_v25 = vld [vmem:[#allocation35_spill] sm:$0xff] }
  0xc8   : > { %7113 = vmatmul.mubr.f32.gmra.mrb[8].mxu0 %v12493_v4  ;;  %v12554_v4 = vld [vmem:[#allocation37_spill] sm:$0xff] }
  0xc9   : > { %7115 = vmatprep.mubr.f32.mxu0 %v12494_v13  ;;  %v12555_v13 = vld [vmem:[#allocation38_spill] sm:$0xff] }
  0xcc   : > { %7116 = vmatmul.mubr.f32.gmra.mrb[10].mxu0 %v12495_v14  ;;  %v12556_v14 = vld [vmem:[#allocation39_spill] sm:$0xff] }
  0xcd   : > { %7118 = vmatprep.mubr.f32.mxu0 %v12496_v63 }
  0xd0   : > { %7119 = vmatmul.mubr.f32.gmra.mrb[12].mxu0 %v12497_v32 }
  0xd1   : > { %7121 = vmatprep.mubr.f32.mxu0 %v12498_v20 }
  0xd4   : > { %7122 = vmatmul.mubr.f32.gmra.mrb[14].mxu0 %v12499_v57 }
  0xd5   : > { %7124 = vmatprep.mubr.f32.mxu0 %v12500_v28 }
  0xd8   : > { %7125 = vmatmul.mubr.f32.gmra.mrb[16].mxu0 %v12501_v39 }
  0xd9   : > { %7127 = vmatprep.mubr.f32.mxu0 %v12502_v52 }
  0xdc   : > { %7128 = vmatmul.mubr.f32.gmra.mrb[18].mxu0 %v12503_v30  ;;  %v12538_v30 = vand.u32 4294901760, %v9072_v1 }
  0xdd   : > { %7130 = vmatprep.mubr.f32.mxu0 %v12504_v7 }
  0xe0   : > { %7131 = vmatmul.mubr.f32.gmra.mrb[20].mxu0 %v12505_v62  ;;  %v12540_v62 = vand.u32 4294901760, %v9093_v10 }
  0xe1   : > { %7133 = vmatprep.mubr.f32.mxu0 %v12506_v55  ;;  %v12541_v55 = vand.u32 4294901760, %v9103_v29 }
  0xe4   : > { %7134 = vmatmul.mubr.f32.gmra.mrb[22].mxu0 %v12507_v58  ;;  %v12542_v58 = vand.u32 4294901760, %v9112_v9 }
  0xe5   : > { %7136 = vmatprep.mubr.f32.mxu0 %v12508_v19 }
  0xe8   : > { %7137 = vmatmul.mubr.f32.gmra.mrb[24].mxu0 %v9067_v6 }
  0xe9   : > { %7139 = vmatprep.mubr.f32.mxu0 %v9072_v1  ;;  %v12549_v1 = vld [vmem:[#allocation29_spill] sm:$0xff] }
  0xec   : > { %7140 = vmatmul.mubr.f32.gmra.mrb[26].mxu0 %v12509_v46 }
  0xed   : > { %7142 = vmatprep.mubr.f32.mxu0 %v9093_v10  ;;  %v12550_v10 = vld [vmem:[#allocation32_spill] sm:$0xff] }
  0xf0   : > { %7143 = vmatmul.mubr.f32.gmra.mrb[28].mxu0 %v9103_v29  ;;  %v12546_v29 = vld [vmem:[#allocation22_spill] sm:$0xff] }
  0xf1   : > { %7145 = vmatprep.mubr.f32.mxu0 %v9112_v9  ;;  %v12551_v9 = vld [vmem:[#allocation33_spill] sm:$0xff] }
  0xf4   : > { %7146 = vmatmul.mubr.f32.gmra.mrb[30].mxu0 %v9119_v8 }
  0xf5   : > { %7156 = vmatprep.mubr.f32.mxu0 %v12510_v24  ;;  %v12526_v24 = vand.u32 4294901760, %v12498_v20 }
  0xf8   : > { %7157 = vmatmul.mubr.f32.vlgmr.msra.gmra.mrb[0].mxu0 %v12513_v26  ;;  %v12529_v26 = vand.u32 4294901760, %v12501_v39  ;;  %v12536_v39 = vand.u32 4294901760, %v12508_v19  ;;  %v12543_v19 = vand.u32 4294901760, %v9119_v8  ;;  %v12552_v8 = vld [vmem:[#allocation34_spill] sm:$0xff] }
  0xf9   : > { %7351 = vmatpush3.bf16.msra.mxu0 %v7348_v37  ;;  %7159 = vmatprep.mubr.f32.mxu0 %v12514_v41  ;;  %v12525_v41 = vand.u32 4294901760, %v12497_v32  ;;  %v12532_v37 = vand.u32 4294901760, %v12504_v7  ;;  %v12539_v7 = vand.u32 4294901760, %v12509_v46  ;;  %v12548_v46 = vld [vmem:[#allocation28_spill] sm:$0xff] }
  0xfa   : > { %7353 = vmatprep.subr.bf16.mxu0 %v7352_v18 }
  0xfc   : > { %7160 = vmatmul.mubr.f32.gmra.mrb[2].mxu0 %v12515_v43  ;;  %v12527_v43 = vand.u32 4294901760, %v12499_v57  ;;  %v9376_v57 = vld [vmem:[%s12059_s4] ss:$0 sm:$0xff] }
  0xfd   : > { %7162 = vmatprep.mubr.f32.mxu0 %v12516_v0  ;;  %7355 = vmatpush3.bf16.msra.mxu0 %v7352_v18  ;;  %v12528_v0 = vand.u32 4294901760, %v12500_v28  ;;  %v12530_v18 = vand.u32 4294901760, %v12502_v52  ;;  %v12537_v52 = vand.u32 4294901760, %v9067_v6  ;;  %v12547_v6 = vld [vmem:[#allocation23_spill] sm:$0xff] }
  0xfe   : > { %7357 = vmatprep.subr.bf16.mxu0 %v8733_v12 }
 0x100   : > { %7163 = vmatmul.mubr.f32.gmra.mrb[4].mxu0 %v12517_v15 }
 0x101   : > { %7165 = vmatprep.mubr.f32.mxu0 %v12518_v17 }
 0x104   : > { %7166 = vmatmul.mubr.f32.gmra.mrb[6].mxu0 %v12519_v42 }
 0x105   : > { %7168 = vmatprep.mubr.f32.mxu0 %v12520_v44 }
 0x108   : > { %7169 = vmatmul.mubr.f32.gmra.mrb[8].mxu0 %v12521_v47 }
 0x109   : > { %7171 = vmatprep.mubr.f32.mxu0 %v12522_v51 }
 0x10c   : > { %7172 = vmatmul.mubr.f32.gmra.mrb[10].mxu0 %v12523_v53 }
 0x10d   : > { %7174 = vmatprep.mubr.f32.mxu0 %v12524_v56 }
 0x110   : > { %7175 = vmatmul.mubr.f32.gmra.mrb[12].mxu0 %v12525_v41 }
 0x111   : > { %7177 = vmatprep.mubr.f32.mxu0 %v12526_v24 }
 0x114   : > { %7178 = vmatmul.mubr.f32.gmra.mrb[14].mxu0 %v12527_v43 }
 0x115   : > { %7180 = vmatprep.mubr.f32.mxu0 %v12528_v0 }
 0x118   : > { %7181 = vmatmul.mubr.f32.gmra.mrb[16].mxu0 %v12529_v26 }
 0x119   : > { %7183 = vmatprep.mubr.f32.mxu0 %v12530_v18 }
 0x11c   : > { %7184 = vmatmul.mubr.f32.gmra.mrb[18].mxu0 %v12531_v61 }
 0x11d   : > { %7186 = vmatprep.mubr.f32.mxu0 %v12532_v37 }
 0x120   : > { %7187 = vmatmul.mubr.f32.gmra.mrb[20].mxu0 %v12533_v50 }
 0x121   : > { %7189 = vmatprep.mubr.f32.mxu0 %v12534_v35 }
 0x124   : > { %7190 = vmatmul.mubr.f32.gmra.mrb[22].mxu0 %v12535_v31 }
 0x125   : > { %7192 = vmatprep.mubr.f32.mxu0 %v12536_v39 }
 0x128   : > { %7193 = vmatmul.mubr.f32.gmra.mrb[24].mxu0 %v12537_v52 }
 0x129   : > { %7195 = vmatprep.mubr.f32.mxu0 %v12538_v30 }
 0x12c   : > { %7196 = vmatmul.mubr.f32.gmra.mrb[26].mxu0 %v12539_v7 }
 0x12d   : > { %7198 = vmatprep.mubr.f32.mxu0 %v12540_v62 }
 0x130   : > { %7199 = vmatmul.mubr.f32.gmra.mrb[28].mxu0 %v12541_v55 }
 0x131   : > { %7201 = vmatprep.mubr.f32.mxu0 %v12542_v58 }
 0x134   : > { %7202 = vmatmul.mubr.f32.gmra.mrb[30].mxu0 %v12543_v19 }
 0x135   : > { %7212 = vmatprep.mubr.f32.mxu0 %v8777_v33 }
 0x138   : > { %7213 = vmatmul.mubr.f32.vlgmr.msra.gmra.mrb[0].mxu0 %v8779_v36 }
 0x139   : > { %7359 = vmatpush3.bf16.msra.mxu0 %v8733_v12  ;;  %7215 = vmatprep.mubr.f32.mxu0 %v8783_v38  ;;  %v12544_v12 = vld [vmem:[#allocation19_spill] sm:$0xff] }
 0x13a   : > { %7361 = vmatprep.subr.bf16.mxu0 %v8743_v16 }
 0x13c   : > { %7216 = vmatmul.mubr.f32.gmra.mrb[2].mxu0 %v8794_v45 }
 0x13d   : > { %7218 = vmatprep.mubr.f32.mxu0 %v8800_v48  ;;  %7363 = vmatpush3.bf16.msra.mxu0 %v8743_v16  ;;  %v12545_v16 = vld [vmem:[#allocation21_spill] sm:$0xff] }
 0x140   : > { %7219 = vmatmul.mubr.f32.gmra.mrb[4].mxu0 %v8802_v49 }
 0x141   : > { %7221 = vmatprep.mubr.f32.mxu0 %v8810_v54 }
 0x144   : > { %7222 = vmatmul.mubr.f32.gmra.mrb[6].mxu0 %v8835_v2 }
 0x145   : > { %7224 = vmatprep.mubr.f32.mxu0 %v8866_v34 }
 0x148   : > { %7225 = vmatmul.mubr.f32.gmra.mrb[8].mxu0 %v8870_v40 }
 0x149   : > { %7227 = vmatprep.mubr.f32.mxu0 %v8877_v59 }
 0x14c   : > { %7228 = vmatmul.mubr.f32.gmra.mrb[10].mxu0 %v8879_v60 }
 0x14d   : > { %7230 = vmatprep.mubr.f32.mxu0 %v8899_v21 }
 0x150   : > { %7231 = vmatmul.mubr.f32.gmra.mrb[12].mxu0 %v8901_v22 }
 0x151   : > { %7233 = vmatprep.mubr.f32.mxu0 %v8903_v23 }
 0x154   : > { %7234 = vmatmul.mubr.f32.gmra.mrb[14].mxu0 %v8924_v5 }
 0x155   : > { %7236 = vmatprep.mubr.f32.mxu0 %v8943_v27 }
 0x158   : > { %7237 = vmatmul.mubr.f32.gmra.mrb[16].mxu0 %v8966_v11 }
 0x159   : > { %7239 = vmatprep.mubr.f32.mxu0 %v8972_v3 }
 0x15c   : > { %7240 = vmatmul.mubr.f32.gmra.mrb[18].mxu0 %v12544_v12 }
 0x15d   : > { %7242 = vmatprep.mubr.f32.mxu0 %v12545_v16 }
 0x160   : > { %7243 = vmatmul.mubr.f32.gmra.mrb[20].mxu0 %v12546_v29 }
 0x161   : > { %7245 = vmatprep.mubr.f32.mxu0 %v12547_v6 }
 0x164   : > { %7246 = vmatmul.mubr.f32.gmra.mrb[22].mxu0 %v12548_v46 }
 0x165   : > { %7248 = vmatprep.mubr.f32.mxu0 %v12549_v1 }
 0x168   : > { %7249 = vmatmul.mubr.f32.gmra.mrb[24].mxu0 %v12550_v10 }
 0x169   : > { %7251 = vmatprep.mubr.f32.mxu0 %v12551_v9 }
 0x16c   : > { %7252 = vmatmul.mubr.f32.gmra.mrb[26].mxu0 %v12552_v8 }
 0x16d   : > { %7254 = vmatprep.mubr.f32.mxu0 %v12553_v25 }
 0x170   : > { %7255 = vmatmul.mubr.f32.gmra.mrb[28].mxu0 %v12554_v4 }
 0x171   : > { %7257 = vmatprep.mubr.f32.mxu0 %v12555_v13 }
 0x174   : > { %7258 = vmatmul.mubr.f32.gmra.mrb[30].mxu0 %v12556_v14 }
 0x175   : > { %7268 = vmatprep.mubr.f32.mxu0 %v8777_v33  ;;  %v2281_v33 = vld [vmem:[%s271_s16 + $0x8] sm:$0xff] }
 0x178   : > { %7269 = vmatmul.mubr.f32.vlgmr.msra.gmra.mrb[0].mxu0 %v8779_v36  ;;  %v2283_v36 = vld [vmem:[%s271_s16 + $0x18] sm:$0xff] }
 0x179   : > { %7271 = vmatprep.mubr.f32.mxu0 %v8783_v38  ;;  %v2381_v38 = vand.u32 4294901760, %v2281_v33 }
 0x17c   : > { %7272 = vmatmul.mubr.f32.gmra.mrb[2].mxu0 %v8794_v45  ;;  %v2385_v45 = vand.u32 4294901760, %v2283_v36 }
 0x17d   : > { %7274 = vmatprep.mubr.f32.mxu0 %v8800_v48  ;;  %v2280_v48 = vld [vmem:[%s271_s16] sm:$0xff] }
 0x180   : > { %7275 = vmatmul.mubr.f32.gmra.mrb[4].mxu0 %v8802_v49  ;;  %v2282_v49 = vld [vmem:[%s271_s16 + $0x10] sm:$0xff] }
 0x181   : > { %7277 = vmatprep.mubr.f32.mxu0 %v8810_v54  ;;  %v2383_v54 = vand.u32 4294901760, %v2280_v48 }
 0x184   : > { %7278 = vmatmul.mubr.f32.gmra.mrb[6].mxu0 %v8835_v2  ;;  %v2387_v2 = vand.u32 4294901760, %v2282_v49 }
 0x185   : > { %7280 = vmatprep.mubr.f32.mxu0 %v8866_v34  ;;  %v9350_v34 = vpack.c.bf16 %v2385_v45, %v2381_v38 }
 0x187   : > { %7365 = vmatprep.subr.bf16.mxu1 %v9350_v34 }
 0x188   : > { %7281 = vmatmul.mubr.f32.gmra.mrb[8].mxu0 %v8870_v40  ;;  %v9352_v40 = vpack.c.bf16 %v2387_v2, %v2383_v54 }
 0x189   : > { %7283 = vmatprep.mubr.f32.mxu0 %v8877_v59  ;;  %v12175_v59 = vmov 0.0  }
 0x18a   : > { %7367 = vmatpush1.bf16.msra.mxu1 %v9352_v40  ;;  %2449 = vmatprep.mubr.f32.mxu1 %v12175_v59 }
 0x18c   : > { %7284 = vmatmul.mubr.f32.gmra.mrb[10].mxu0 %v8879_v60  ;;  %v9357_v60 = vsub.f32 %v2281_v33, %v2381_v38 }
 0x18d   : > { %7286 = vmatprep.mubr.f32.mxu0 %v8899_v21  ;;  %v9359_v21 = vsub.f32 %v2283_v36, %v2385_v45 }
 0x18f   : > { %v7372_v38 = vpack.c.bf16 %v9359_v21, %v9357_v60 }
 0x190   : > { %7287 = vmatmul.mubr.f32.gmra.mrb[12].mxu0 %v8901_v22  ;;  %v9361_v22 = vsub.f32 %v2280_v48, %v2383_v54 }
 0x191   : > { %7289 = vmatprep.mubr.f32.mxu0 %v8903_v23  ;;  %v9363_v23 = vsub.f32 %v2282_v49, %v2387_v2 }
 0x192   : > { %v12169_v28 = vand.u32 4294901760, %v9361_v22 }
 0x193   : > { %v12167_v17 = vand.u32 4294901760, %v9363_v23 }
 0x194   : > { %7290 = vmatmul.mubr.f32.gmra.mrb[14].mxu0 %v8924_v5  ;;  %v12170_v5 = vand.u32 4294901760, %v9359_v21  ;;  %v2811_v53 = vsub.f32 %v9361_v22, %v12169_v28 }
 0x195   : > { %7292 = vmatprep.mubr.f32.mxu0 %v8943_v27  ;;  %v12171_v27 = vand.u32 4294901760, %v9357_v60  ;;  %v2823_v43 = vsub.f32 %v9363_v23, %v12167_v17 }
 0x196   : > { %v2812_v31 = vand.u32 4294901760, %v2811_v53 }
 0x197   : > { %v2824_v7 = vand.u32 4294901760, %v2823_v43 }
 0x198   : > { %7293 = vmatmul.mubr.f32.gmra.mrb[16].mxu0 %v8966_v11  ;;  %v2805_v11 = vsub.f32 %v9357_v60, %v12171_v27 }
 0x199   : > { %7295 = vmatprep.mubr.f32.mxu0 %v8972_v3  ;;  %v2817_v3 = vsub.f32 %v9359_v21, %v12170_v5 }
 0x19a   : > { %v2806_v63 = vand.u32 4294901760, %v2805_v11 }
 0x19b   : > { %v2818_v32 = vand.u32 4294901760, %v2817_v3 }
 0x19c   : > { %7296 = vmatmul.mubr.f32.gmra.mrb[18].mxu0 %v12544_v12 }
 0x19d   : > { %7298 = vmatprep.mubr.f32.mxu0 %v12545_v16  ;;  %v7368_v20 = vpack.c.bf16 %v2818_v32, %v2806_v63 }
 0x19f   : > { %7369 = vmatprep.subr.bf16.mxu1 %v7368_v20 }
 0x1a0   : > { %7299 = vmatmul.mubr.f32.gmra.mrb[20].mxu0 %v12546_v29 }
 0x1a1   : > { %7301 = vmatprep.mubr.f32.mxu0 %v12547_v6 }
 0x1a4   : > { %7302 = vmatmul.mubr.f32.gmra.mrb[22].mxu0 %v12548_v46 }
 0x1a5   : > { %7304 = vmatprep.mubr.f32.mxu0 %v12549_v1 }
 0x1a8   : > { %7305 = vmatmul.mubr.f32.gmra.mrb[24].mxu0 %v12550_v10 }
 0x1a9   : > { %7307 = vmatprep.mubr.f32.mxu0 %v12551_v9  ;;  %v7370_v9 = vpack.c.bf16 %v2824_v7, %v2812_v31 }
 0x1ac   : > { %7308 = vmatmul.mubr.f32.gmra.mrb[26].mxu0 %v12552_v8 }
 0x1ad   : > { %7310 = vmatprep.mubr.f32.mxu0 %v12553_v25 }
 0x1b0   : > { %7311 = vmatmul.mubr.f32.gmra.mrb[28].mxu0 %v12554_v4 }
 0x1b1   : > { %7313 = vmatprep.mubr.f32.mxu0 %v12555_v13 }
 0x1b4   : > { %7314 = vmatmul.mubr.f32.gmra.mrb[30].mxu0 %v12556_v14 }
 0x24b   : > { %v7270_v15 = vpop.f32.mrb[0].mxu0 }
 0x24c   : > { %v7772_v42 = vadd.f32 %v7270_v15, %v9376_v57  ;;  %v2090_v44 = vpop.f32.mrb[1].mxu0 }
 0x24d   : > { %v7773_v47 = vadd.f32 %v9376_v57, %v2090_v44 }
 0x24e   : > { %v2289_v51 = vsel %vm2284_vm1, %v7772_v42, 0 }
 0x24f   : > { %v9386_v56 = vand.u32 4294901760, %v2289_v51  ;;  %v2286_v41 = vsel %vm2284_vm1, %v7773_v47, 0  ;;  %v7273_v24 = vpop.f32.mrb[2].mxu0 }
 0x250   : > { %v9392_v0 = vand.u32 4294901760, %v2286_v41  ;;  %v7774_v26 = vadd.f32 %v7273_v24, %v9376_v57  ;;  %v2102_v18 = vpop.f32.mrb[3].mxu0 }
 0x251   : > { %v9396_v61 = vsub.f32 %v2289_v51, %v9386_v56  ;;  %v7775_v37 = vadd.f32 %v9376_v57, %v2102_v18 }
 0x252   : > { %v9400_v50 = vsub.f32 %v2286_v41, %v9392_v0  ;;  %v2295_v35 = vsel %vm2284_vm1, %v7774_v26, 0 }
 0x253   : > { %v9403_v39 = vand.u32 4294901760, %v2295_v35  ;;  %v2292_v52 = vsel %vm2284_vm1, %v7775_v37, 0  ;;  %v7276_v30 = vpop.f32.mrb[4].mxu0  ;;  %v12164_v62 = vand.u32 4294901760, %v9396_v61 }
 0x254   : > { %v9407_v55 = vand.u32 4294901760, %v2292_v52  ;;  %v7776_v58 = vadd.f32 %v7276_v30, %v9376_v57  ;;  %v2114_v19 = vpop.f32.mrb[5].mxu0  ;;  %v12166_v12 = vand.u32 4294901760, %v9400_v50 }
 0x255   : > { %v7777_v16 = vadd.f32 %v9376_v57, %v2114_v19  ;;  %v9419_v46 = vsub.f32 %v2295_v35, %v9403_v39  ;;  %v2464_v8 = vsub.f32 %v9396_v61, %v12164_v62 }
 0x256   : > { %v9413_v29 = vsub.f32 %v2292_v52, %v9407_v55  ;;  %v2453_v6 = vsub.f32 %v9400_v50, %v12166_v12  ;;  %v2301_v25 = vsel %vm2284_vm1, %v7776_v58, 0 }
 0x257   : > { %v2298_v1 = vsel %vm2284_vm1, %v7777_v16, 0  ;;  %v7279_v10 = vpop.f32.mrb[6].mxu0  ;;  %v9432_v45 = vand.u32 4294901760, %v2301_v25  ;;  %v12162_v49 = vand.u32 4294901760, %v9419_v46  ;;  %v2465_v3 = vand.u32 4294901760, %v2464_v8 }
 0x258   : > { %v9426_v4 = vand.u32 4294901760, %v2298_v1  ;;  %v2126_v13 = vpop.f32.mrb[7].mxu0  ;;  %v2454_v14 = vand.u32 4294901760, %v2453_v6  ;;  %v12163_v33 = vand.u32 4294901760, %v9413_v29  ;;  %v7778_v2 = vadd.f32 %v7279_v10, %v9376_v57 }
 0x259   : > { %v7779_v36 = vadd.f32 %v9376_v57, %v2126_v13  ;;  %v9445_v20 = vsub.f32 %v2301_v25, %v9432_v45  ;;  %v2486_v42 = vsub.f32 %v9419_v46, %v12162_v49 }
 0x25a   : > { %2455 = vmatmul.mubr.f32.vlgmr.msra.gmra.mrb[0].mxu1 %v2454_v14  ;;  %v9437_v54 = vsub.f32 %v2298_v1, %v9426_v4  ;;  %v2475_v63 = vsub.f32 %v9413_v29, %v12163_v33  ;;  %v2307_v44 = vsel %vm2284_vm1, %v7778_v2, 0 }
 0x25b   : > { %7371 = vmatpush1.bf16.msra.mxu1 %v7370_v9  ;;  %v7282_v48 = vpop.f32.mrb[8].mxu0  ;;  %2460 = vmatprep.mubr.f32.mxu1 %v12175_v59  ;;  %v2304_v32 = vsel %vm2284_vm1, %v7779_v36, 0  ;;  %v9456_v43 = vand.u32 4294901760, %v2307_v44  ;;  %v12159_v18 = vand.u32 4294901760, %v9445_v20  ;;  %v2487_v52 = vand.u32 4294901760, %v2486_v42 }
 0x25c   : > { %v2138_v11 = vpop.f32.mrb[9].mxu0  ;;  %7373 = vmatprep.subr.bf16.mxu1 %v7372_v38  ;;  %v9452_v47 = vand.u32 4294901760, %v2304_v32  ;;  %v2476_v53 = vand.u32 4294901760, %v2475_v63  ;;  %v12161_v41 = vand.u32 4294901760, %v9437_v54  ;;  %v7780_v35 = vadd.f32 %v7282_v48, %v9376_v57 }
 0x25d   : > { %v7781_v24 = vadd.f32 %v9376_v57, %v2138_v11  ;;  %v9469_v58 = vsub.f32 %v2307_v44, %v9456_v43  ;;  %v2508_v16 = vsub.f32 %v9445_v20, %v12159_v18 }
 0x25e   : > { %2466 = vmatmul.mubr.f32.gmra.mrb[2].mxu1 %v2465_v3  ;;  %v9461_v37 = vsub.f32 %v2304_v32, %v9452_v47  ;;  %v2497_v30 = vsub.f32 %v9437_v54, %v12161_v41  ;;  %v2313_v6 = vsel %vm2284_vm1, %v7780_v35, 0 }
 0x25f   : > { %v7285_v15 = vpop.f32.mrb[10].mxu0  ;;  %2471 = vmatprep.mubr.f32.mxu1 %v12175_v59  ;;  %v2310_v7 = vsel %vm2284_vm1, %v7781_v24, 0  ;;  %v9482_v13 = vand.u32 4294901760, %v2313_v6  ;;  %v12156_v38 = vand.u32 4294901760, %v9469_v58  ;;  %v2509_v3 = vand.u32 4294901760, %v2508_v16 }
 0x260   : > { %v2150_v51 = vpop.f32.mrb[11].mxu0  ;;  %v9478_v1 = vand.u32 4294901760, %v2310_v7  ;;  %v2498_v9 = vand.u32 4294901760, %v2497_v30  ;;  %v12158_v8 = vand.u32 4294901760, %v9461_v37  ;;  %v7782_v14 = vadd.f32 %v7285_v15, %v9376_v57 }
 0x261   : > { %v7783_v25 = vadd.f32 %v9376_v57, %v2150_v51  ;;  %v9500_v44 = vsub.f32 %v2313_v6, %v9482_v13  ;;  %v2530_v35 = vsub.f32 %v9469_v58, %v12156_v38 }
 0x262   : > { %2477 = vmatmul.mubr.f32.gmra.mrb[4].mxu1 %v2476_v53  ;;  %v9488_v48 = vsub.f32 %v2310_v7, %v9478_v1  ;;  %v2519_v63 = vsub.f32 %v9461_v37, %v12158_v8  ;;  %v2319_v51 = vsel %vm2284_vm1, %v7782_v14, 0 }
 0x263   : > { %v7288_v26 = vpop.f32.mrb[12].mxu0  ;;  %2482 = vmatprep.mubr.f32.mxu1 %v12175_v59  ;;  %v2316_v32 = vsel %vm2284_vm1, %v7783_v25, 0 }
 0x264   : > { %v2162_v31 = vpop.f32.mrb[13].mxu0  ;;  %v2520_v16 = vand.u32 4294901760, %v2519_v63  ;;  %v12157_v6 = vand.u32 4294901760, %v9488_v48  ;;  %v12160_v63 = vand.u32 4294901760, %v9500_v44 }
 0x266   : > { %2488 = vmatmul.mubr.f32.gmra.mrb[6].mxu1 %v2487_v52  ;;  %v9510_v52 = vand.u32 4294901760, %v2316_v32 }
 0x267   : > { %v9471_v19 = vpop.f32.mrb[14].mxu0  ;;  %2493 = vmatprep.mubr.f32.mxu1 %v12175_v59 }
 0x268   : > { %v2174_v10 = vpop.f32.mrb[15].mxu0 }
 0x26a   : > { %2499 = vmatmul.mubr.f32.gmra.mrb[8].mxu1 %v2498_v9  ;;  %v7785_v9 = vadd.f32 %v9376_v57, %v2162_v31  ;;  %v9528_v31 = vsub.f32 %v2316_v32, %v9510_v52 }
 0x26b   : > { %v7294_v36 = vpop.f32.mrb[16].mxu0  ;;  %2504 = vmatprep.mubr.f32.mxu1 %v12175_v59 }
 0x26c   : > { %v7788_v2 = vadd.f32 %v7294_v36, %v9376_v57  ;;  %v2186_v11 = vpop.f32.mrb[17].mxu0  ;;  %v9519_v36 = vand.u32 4294901760, %v2319_v51 }
 0x26d   : > { %v7789_v15 = vadd.f32 %v9376_v57, %v2186_v11 }
 0x26e   : > { %v9497_v42 = vsel %vm2284_vm1, %v7788_v2, 0  ;;  %2510 = vmatmul.mubr.f32.gmra.mrb[10].mxu1 %v2509_v3  ;;  %v7784_v2 = vadd.f32 %v7288_v26, %v9376_v57  ;;  %v2322_v26 = vsel %vm2284_vm1, %v7785_v9, 0  ;;  %v9540_v38 = vsub.f32 %v2319_v51, %v9519_v36 }
 0x26f   : > { %v9504_v53 = vsel %vm2284_vm1, %v7789_v15, 0  ;;  %v7297_v24 = vpop.f32.mrb[18].mxu0  ;;  %2515 = vmatprep.mubr.f32.mxu1 %v12175_v59  ;;  %v2552_v9 = vsub.f32 %v9500_v44, %v12160_v63  ;;  %v12165_v51 = vand.u32 4294901760, %v9528_v31  ;;  %v7786_v63 = vadd.f32 %v9471_v19, %v9376_v57 }
 0x270   : > { %v7790_v30 = vadd.f32 %v7297_v24, %v9376_v57  ;;  %v2198_v7 = vpop.f32.mrb[19].mxu0  ;;  %v2325_v32 = vsel %vm2284_vm1, %v7784_v2, 0  ;;  %v7787_v2 = vadd.f32 %v9376_v57, %v2174_v10 }
 0x271   : > { %v7791_v25 = vadd.f32 %v9376_v57, %v2198_v7  ;;  %v2541_v7 = vsub.f32 %v9488_v48, %v12157_v6  ;;  %v9559_v18 = vand.u32 4294901760, %v2325_v32  ;;  %v2563_v49 = vsub.f32 %v9528_v31, %v12165_v51 }
 0x272   : > { %v9517_v14 = vsel %vm2284_vm1, %v7790_v30, 0  ;;  %2521 = vmatmul.mubr.f32.gmra.mrb[12].mxu1 %v2520_v16  ;;  %v2531_v30 = vand.u32 4294901760, %v2530_v35  ;;  %v2328_v19 = vsel %vm2284_vm1, %v7787_v2, 0 }
 0x273   : > { %v9523_v11 = vsel %vm2284_vm1, %v7791_v25, 0  ;;  %v7300_v3 = vpop.f32.mrb[20].mxu0  ;;  %2526 = vmatprep.mubr.f32.mxu1 %v12175_v59  ;;  %v2542_v6 = vand.u32 4294901760, %v2541_v7  ;;  %v12168_v7 = vand.u32 4294901760, %v9540_v38  ;;  %v9581_v62 = vsub.f32 %v2325_v32, %v9559_v18 }
 0x274   : > { %v7792_v15 = vadd.f32 %v7300_v3, %v9376_v57  ;;  %v2210_v24 = vpop.f32.mrb[21].mxu0  ;;  %v2564_v51 = vand.u32 4294901760, %v2563_v49 }
 0x275   : > { %v7793_v16 = vadd.f32 %v9376_v57, %v2210_v24  ;;  %v9550_v24 = vand.u32 4294901760, %v2322_v26  ;;  %12558 = vst [vmem:[#allocation7_spill] sm:$0xff] %v9581_v62  ;;  %v2574_v2 = vsub.f32 %v9540_v38, %v12168_v7 }
 0x276   : > { %v9537_v25 = vsel %vm2284_vm1, %v7792_v15, 0  ;;  %2532 = vmatmul.mubr.f32.gmra.mrb[14].mxu1 %v2531_v30 }
 0x277   : > { %v9544_v3 = vsel %vm2284_vm1, %v7793_v16, 0  ;;  %v7303_v35 = vpop.f32.mrb[22].mxu0  ;;  %2537 = vmatprep.mubr.f32.mxu1 %v12175_v59  ;;  %v9569_v10 = vsub.f32 %v2322_v26, %v9550_v24  ;;  %v2331_v26 = vsel %vm2284_vm1, %v7786_v63, 0  ;;  %v2575_v5 = vand.u32 4294901760, %v2574_v2 }
 0x278   : > { %v7794_v15 = vadd.f32 %v7303_v35, %v9376_v57  ;;  %v2222_v30 = vpop.f32.mrb[23].mxu0  ;;  %v9599_v12 = vand.u32 4294901760, %v2331_v26 }
 0x279   : > { %v7795_v16 = vadd.f32 %v9376_v57, %v2222_v30  ;;  %12557 = vst [vmem:[#allocation6_spill] sm:$0xff] %v9569_v10  ;;  %v12172_v32 = vand.u32 4294901760, %v9569_v10 }
 0x27a   : > { %v9557_v8 = vsel %vm2284_vm1, %v7794_v15, 0  ;;  %2543 = vmatmul.mubr.f32.gmra.mrb[16].mxu1 %v2542_v6  ;;  %v2553_v6 = vand.u32 4294901760, %v2552_v9  ;;  %v9618_v27 = vsub.f32 %v2331_v26, %v9599_v12 }
 0x27b   : > { %v9564_v41 = vsel %vm2284_vm1, %v7795_v16, 0  ;;  %v7306_v35 = vpop.f32.mrb[24].mxu0  ;;  %2548 = vmatprep.mubr.f32.mxu1 %v12175_v59 }
 0x27c   : > { %v7796_v15 = vadd.f32 %v7306_v35, %v9376_v57  ;;  %v2234_v30 = vpop.f32.mrb[25].mxu0  ;;  %12560 = vst [vmem:[#allocation9_spill] sm:$0xff] %v9618_v27 }
 0x27d   : > { %v7797_v16 = vadd.f32 %v9376_v57, %v2234_v30  ;;  %v9591_v30 = vand.u32 4294901760, %v2328_v19 }
 0x27e   : > { %v9578_v33 = vsel %vm2284_vm1, %v7796_v15, 0  ;;  %2554 = vmatmul.mubr.f32.gmra.mrb[18].mxu1 %v2553_v6 }
 0x27f   : > { %v9585_v35 = vsel %vm2284_vm1, %v7797_v16, 0  ;;  %v7309_v9 = vpop.f32.mrb[26].mxu0  ;;  %2559 = vmatprep.mubr.f32.mxu1 %v12175_v59  ;;  %v9607_v49 = vsub.f32 %v2328_v19, %v9591_v30 }
 0x280   : > { %v7798_v15 = vadd.f32 %v7309_v9, %v9376_v57  ;;  %v2246_v6 = vpop.f32.mrb[27].mxu0 }
 0x281   : > { %v7799_v63 = vadd.f32 %v9376_v57, %v2246_v6  ;;  %12559 = vst [vmem:[#allocation8_spill] sm:$0xff] %v9607_v49  ;;  %v12179_v26 = vand.u32 4294901760, %v9607_v49 }
 0x282   : > { %v9597_v16 = vsel %vm2284_vm1, %v7798_v15, 0  ;;  %2565 = vmatmul.mubr.f32.gmra.mrb[20].mxu1 %v2564_v51  ;;  %v2585_v51 = vsub.f32 %v9569_v10, %v12172_v32  ;;  %v9628_v32 = vand.u32 4294901760, %v9504_v53 }
 0x283   : > { %v9602_v17 = vsel %vm2284_vm1, %v7799_v63, 0  ;;  %v7312_v7 = vpop.f32.mrb[28].mxu0  ;;  %2570 = vmatprep.mubr.f32.mxu1 %v12175_v59 }
 0x284   : > { %v7800_v28 = vadd.f32 %v7312_v7, %v9376_v57  ;;  %v2258_v6 = vpop.f32.mrb[29].mxu0  ;;  %v12561_v7 = vand.u32 4294901760, %v9581_v62 }
 0x285   : > { %v7801_v15 = vadd.f32 %v9376_v57, %v2258_v6 }
 0x286   : > { %v9615_v63 = vsel %vm2284_vm1, %v7800_v28, 0  ;;  %2576 = vmatmul.mubr.f32.gmra.mrb[22].mxu1 %v2575_v5  ;;  %v2596_v2 = vsub.f32 %v9581_v62, %v12561_v7  ;;  %v2586_v5 = vand.u32 4294901760, %v2585_v51  ;;  %v12562_v62 = vmov 0.0  }
 0x287   : > { %v9621_v19 = vsel %vm2284_vm1, %v7801_v15, 0  ;;  %v7315_v9 = vpop.f32.mrb[30].mxu0  ;;  %2581 = vmatprep.mubr.f32.mxu1 %v12175_v59  ;;  %v9637_v59 = vand.u32 4294901760, %v9497_v42 }
 0x288   : > { %v7802_v28 = vadd.f32 %v7315_v9, %v9376_v57  ;;  %v2270_v6 = vpop.f32.mrb[31].mxu0  ;;  %v9645_v9 = vsub.f32 %v9504_v53, %v9628_v32  ;;  %v2597_v51 = vand.u32 4294901760, %v2596_v2 }
 0x289   : > { %v7803_v10 = vadd.f32 %v9376_v57, %v2270_v6  ;;  %v2607_v57 = vsub.f32 %v9607_v49, %v12179_v26  ;;  %v9653_v6 = vsub.f32 %v9497_v42, %v9637_v59  ;;  %v9664_v26 = vand.u32 4294901760, %v9517_v14 }
 0x28a   : > { %v9634_v15 = vsel %vm2284_vm1, %v7802_v28, 0  ;;  %2587 = vmatmul.mubr.f32.gmra.mrb[24].mxu1 %v2586_v5  ;;  %12563 = vst [vmem:[#allocation10_spill] sm:$0xff] %v9645_v9  ;;  %v12182_v28 = vand.u32 4294901760, %v9618_v27  ;;  %v12185_v2 = vand.u32 4294901760, %v9645_v9 }
 0x28b   : > { %v9640_v7 = vsel %vm2284_vm1, %v7803_v10, 0  ;;  %2592 = vmatprep.mubr.f32.mxu1 %v12562_v62  ;;  %12564 = vst [vmem:[#allocation11_spill] sm:$0xff] %v9653_v6  ;;  %v9657_v10 = vand.u32 4294901760, %v9523_v11  ;;  %v2608_v5 = vand.u32 4294901760, %v2607_v57  ;;  %v12188_v49 = vand.u32 4294901760, %v9653_v6 }
 0x28c   : > { %v2618_v53 = vsub.f32 %v9618_v27, %v12182_v28  ;;  %v2629_v57 = vsub.f32 %v9645_v9, %v12185_v2  ;;  %v9681_v28 = vand.u32 4294901760, %v9544_v3  ;;  %v9688_v2 = vand.u32 4294901760, %v9537_v25 }
 0x28d   : > { %v9669_v42 = vsub.f32 %v9523_v11, %v9657_v10  ;;  %v2640_v11 = vsub.f32 %v9653_v6, %v12188_v49  ;;  %v9705_v49 = vand.u32 4294901760, %v9564_v41 }
 0x28e   : > { %2598 = vmatmul.mubr.f32.gmra.mrb[26].mxu1 %v2597_v51  ;;  %v2619_v51 = vand.u32 4294901760, %v2618_v53  ;;  %v2630_v27 = vand.u32 4294901760, %v2629_v57  ;;  %12567 = vst [vmem:[#allocation14_spill] sm:$0xff] %v9688_v2 }
 0x28f   : > { %2603 = vmatprep.mubr.f32.mxu1 %v12562_v62  ;;  %12565 = vst [vmem:[#allocation12_spill] sm:$0xff] %v9669_v42  ;;  %v12191_v53 = vand.u32 4294901760, %v9669_v42  ;;  %12570 = vst [vmem:[#allocation17_spill] sm:$0xff] %v9705_v49 }
 0x291   : > { %v2651_v57 = vsub.f32 %v9669_v42, %v12191_v53  ;;  %v9712_v53 = vand.u32 4294901760, %v9557_v8 }
 0x292   : > { %2609 = vmatmul.mubr.f32.gmra.mrb[28].mxu1 %v2608_v5  ;;  %v9677_v5 = vsub.f32 %v9517_v14, %v9664_v26  ;;  %v9693_v14 = vsub.f32 %v9544_v3, %v9681_v28 }
 0x293   : > { %2614 = vmatprep.mubr.f32.mxu1 %v12562_v62  ;;  %v2652_v6 = vand.u32 4294901760, %v2651_v57  ;;  %12571 = vst [vmem:[#allocation18_spill] sm:$0xff] %v9712_v53 }
 0x294   : > { %12566 = vst [vmem:[#allocation13_spill] sm:$0xff] %v9677_v5  ;;  %12568 = vst [vmem:[#allocation15_spill] sm:$0xff] %v9693_v14  ;;  %v12194_v9 = vand.u32 4294901760, %v9677_v5 }
 0x296   : > { %2620 = vmatmul.mubr.f32.gmra.mrb[30].mxu1 %v2619_v51  ;;  %v2641_v51 = vand.u32 4294901760, %v2640_v11  ;;  %v2662_v3 = vsub.f32 %v9677_v5, %v12194_v9  ;;  %v12197_v11 = vand.u32 4294901760, %v9693_v14  ;;  %v9729_v9 = vand.u32 4294901760, %v9585_v35 }
 0x297   : > { %2625 = vmatprep.mubr.f32.mxu1 %v12562_v62 }
 0x298   : > { %v2673_v57 = vsub.f32 %v9693_v14, %v12197_v11  ;;  %12574 = vst [vmem:[#allocation25_spill] sm:$0xff] %v9729_v9  ;;  %v9736_v11 = vand.u32 4294901760, %v9578_v33 }
 0x29a   : > { %2631 = vmatmul.mubr.f32.gmra.mrb[32].mxu1 %v2630_v27  ;;  %v9701_v27 = vsub.f32 %v9537_v25, %v9688_v2  ;;  %v9717_v25 = vsub.f32 %v9564_v41, %v9705_v49  ;;  %v2674_v5 = vand.u32 4294901760, %v2673_v57  ;;  %12575 = vst [vmem:[#allocation26_spill] sm:$0xff] %v9736_v11 }
 0x29b   : > { %2636 = vmatprep.mubr.f32.mxu1 %v12562_v62 }
 0x29c   : > { %12569 = vst [vmem:[#allocation16_spill] sm:$0xff] %v9701_v27  ;;  %12572 = vst [vmem:[#allocation20_spill] sm:$0xff] %v9717_v25  ;;  %v12200_v42 = vand.u32 4294901760, %v9701_v27 }
 0x29e   : > { %2642 = vmatmul.mubr.f32.gmra.mrb[34].mxu1 %v2641_v51  ;;  %v2663_v51 = vand.u32 4294901760, %v2662_v3  ;;  %v2684_v41 = vsub.f32 %v9701_v27, %v12200_v42  ;;  %v12203_v3 = vand.u32 4294901760, %v9717_v25  ;;  %v9753_v42 = vand.u32 4294901760, %v9602_v17 }
 0x29f   : > { %2647 = vmatprep.mubr.f32.mxu1 %v12562_v62 }
 0x2a0   : > { %v2695_v57 = vsub.f32 %v9717_v25, %v12203_v3  ;;  %12578 = vst [vmem:[#allocation31_spill] sm:$0xff] %v9753_v42  ;;  %v9760_v3 = vand.u32 4294901760, %v9597_v16 }
 0x2a2   : > { %2653 = vmatmul.mubr.f32.gmra.mrb[36].mxu1 %v2652_v6  ;;  %v9725_v6 = vsub.f32 %v9557_v8, %v9712_v53  ;;  %v9741_v8 = vsub.f32 %v9585_v35, %v9729_v9  ;;  %v2696_v27 = vand.u32 4294901760, %v2695_v57  ;;  %12579 = vst [vmem:[#allocation36_spill] sm:$0xff] %v9760_v3 }
 0x2a3   : > { %2658 = vmatprep.mubr.f32.mxu1 %v12562_v62 }
 0x2a4   : > { %12573 = vst [vmem:[#allocation24_spill] sm:$0xff] %v9725_v6  ;;  %12576 = vst [vmem:[#allocation27_spill] sm:$0xff] %v9741_v8  ;;  %v12206_v14 = vand.u32 4294901760, %v9725_v6 }
 0x2a6   : > { %2664 = vmatmul.mubr.f32.gmra.mrb[38].mxu1 %v2663_v51  ;;  %v2685_v51 = vand.u32 4294901760, %v2684_v41  ;;  %v2706_v35 = vsub.f32 %v9725_v6, %v12206_v14  ;;  %v12209_v41 = vand.u32 4294901760, %v9741_v8  ;;  %v9777_v14 = vand.u32 4294901760, %v9621_v19 }
 0x2a7   : > { %2669 = vmatprep.mubr.f32.mxu1 %v12562_v62 }
 0x2a8   : > { %v2717_v57 = vsub.f32 %v9741_v8, %v12209_v41  ;;  %12581 = vst [vmem:[#allocation21_spill] sm:$0xff] %v9777_v14  ;;  %v9784_v41 = vand.u32 4294901760, %v9615_v63 }
 0x2aa   : > { %2675 = vmatmul.mubr.f32.gmra.mrb[40].mxu1 %v2674_v5  ;;  %v9749_v5 = vsub.f32 %v9578_v33, %v9736_v11  ;;  %v9765_v33 = vsub.f32 %v9602_v17, %v9753_v42  ;;  %v2718_v6 = vand.u32 4294901760, %v2717_v57  ;;  %12582 = vst [vmem:[#allocation22_spill] sm:$0xff] %v9784_v41 }
 0x2ab   : > { %2680 = vmatprep.mubr.f32.mxu1 %v12562_v62 }
 0x2ac   : > { %12577 = vst [vmem:[#allocation30_spill] sm:$0xff] %v9749_v5  ;;  %12580 = vst [vmem:[#allocation19_spill] sm:$0xff] %v9765_v33  ;;  %v12212_v25 = vand.u32 4294901760, %v9749_v5 }
 0x2ae   : > { %2686 = vmatmul.mubr.f32.gmra.mrb[42].mxu1 %v2685_v51  ;;  %v2707_v51 = vand.u32 4294901760, %v2706_v35  ;;  %v2728_v17 = vsub.f32 %v9749_v5, %v12212_v25  ;;  %v12215_v35 = vand.u32 4294901760, %v9765_v33  ;;  %v9801_v25 = vand.u32 4294901760, %v9640_v7 }
 0x2af   : > { %2691 = vmatprep.mubr.f32.mxu1 %v12562_v62 }
 0x2b0   : > { %v2739_v57 = vsub.f32 %v9765_v33, %v12215_v35  ;;  %12584 = vst [vmem:[#allocation28_spill] sm:$0xff] %v9801_v25  ;;  %v9808_v35 = vand.u32 4294901760, %v9634_v15 }
 0x2b2   : > { %2697 = vmatmul.mubr.f32.gmra.mrb[44].mxu1 %v2696_v27  ;;  %v9773_v27 = vsub.f32 %v9597_v16, %v9760_v3  ;;  %v9789_v16 = vsub.f32 %v9621_v19, %v9777_v14  ;;  %v2740_v5 = vand.u32 4294901760, %v2739_v57  ;;  %12585 = vst [vmem:[#allocation29_spill] sm:$0xff] %v9808_v35 }
 0x2b3   : > { %2702 = vmatprep.mubr.f32.mxu1 %v12562_v62 }
 0x2b4   : > { %12583 = vst [vmem:[#allocation23_spill] sm:$0xff] %v9789_v16  ;;  %v12218_v8 = vand.u32 4294901760, %v9773_v27 }
 0x2b6   : > { %2708 = vmatmul.mubr.f32.gmra.mrb[46].mxu1 %v2707_v51  ;;  %v2729_v51 = vand.u32 4294901760, %v2728_v17  ;;  %v2750_v19 = vsub.f32 %v9773_v27, %v12218_v8  ;;  %v12219_v17 = vand.u32 4294901760, %v9789_v16 }
 0x2b7   : > { %2713 = vmatprep.mubr.f32.mxu1 %v12562_v62 }
 0x2b8   : > { %v2761_v57 = vsub.f32 %v9789_v16, %v12219_v17 }
 0x2ba   : > { %2719 = vmatmul.mubr.f32.gmra.mrb[48].mxu1 %v2718_v6  ;;  %v9797_v6 = vsub.f32 %v9615_v63, %v9784_v41  ;;  %v9813_v63 = vsub.f32 %v9640_v7, %v9801_v25  ;;  %v2762_v8 = vand.u32 4294901760, %v2761_v57 }
 0x2bb   : > { %2724 = vmatprep.mubr.f32.mxu1 %v12562_v62 }
 0x2bc   : > { %v12224_v33 = vand.u32 4294901760, %v9797_v6 }
 0x2be   : > { %2730 = vmatmul.mubr.f32.gmra.mrb[50].mxu1 %v2729_v51  ;;  %v2751_v51 = vand.u32 4294901760, %v2750_v19  ;;  %v2772_v7 = vsub.f32 %v9797_v6, %v12224_v33  ;;  %v12223_v19 = vand.u32 4294901760, %v9813_v63  ;;  %v12598_v33 = vld [vmem:[#allocation20_spill] sm:$0xff] }
 0x2bf   : > { %2735 = vmatprep.mubr.f32.mxu1 %v12562_v62 }
 0x2c0   : > { %v2773_v17 = vand.u32 4294901760, %v2772_v7  ;;  %v7374_v7 = vpack.c.bf16 %v9363_v23, %v9361_v22 }
 0x2c2   : > { %2741 = vmatmul.mubr.f32.gmra.mrb[52].mxu1 %v2740_v5  ;;  %v9822_v5 = vsub.f32 %v9634_v15, %v9808_v35 }
 0x2c3   : > { %2746 = vmatprep.mubr.f32.mxu1 %v12562_v62 }
 0x2c4   : > { %v12222_v16 = vand.u32 4294901760, %v9822_v5 }
 0x2c6   : > { %2752 = vmatmul.mubr.f32.gmra.mrb[54].mxu1 %v2751_v51  ;;  %v2783_v51 = vsub.f32 %v9813_v63, %v12223_v19  ;;  %v2794_v57 = vsub.f32 %v9822_v5, %v12222_v16  ;;  %v12596_v16 = vld [vmem:[#allocation15_spill] sm:$0xff]  ;;  %v12597_v19 = vld [vmem:[#allocation16_spill] sm:$0xff] }
 0x2c7   : > { %2757 = vmatprep.mubr.f32.mxu1 %v12562_v62 }
 0x2c8   : > { %v2784_v15 = vand.u32 4294901760, %v2783_v51  ;;  %v12587_v51 = vand.u32 4294901760, %v9359_v21  ;;  %v12589_v21 = vld [vmem:[#allocation7_spill] sm:$0xff] }
 0x2ca   : > { %2763 = vmatmul.mubr.f32.gmra.mrb[56].mxu1 %v2762_v8  ;;  %v2795_v8 = vand.u32 4294901760, %v2794_v57  ;;  %v12590_v57 = vld [vmem:[#allocation8_spill] sm:$0xff] }
 0x2cb   : > { %2768 = vmatprep.mubr.f32.mxu1 %v12562_v62 }
 0x2ce   : > { %2774 = vmatmul.mubr.f32.gmra.mrb[58].mxu1 %v2773_v17  ;;  %v12586_v17 = vand.u32 4294901760, %v9357_v60  ;;  %v12588_v60 = vld [vmem:[#allocation6_spill] sm:$0xff] }
 0x2cf   : > { %2779 = vmatprep.mubr.f32.mxu1 %v12562_v62 }
 0x2d2   : > { %2785 = vmatmul.mubr.f32.gmra.mrb[60].mxu1 %v2784_v15  ;;  %v7380_v15 = vpack.c.bf16 %v12587_v51, %v12586_v17  ;;  %v12593_v17 = vld [vmem:[#allocation11_spill] sm:$0xff]  ;;  %v12594_v51 = vld [vmem:[#allocation12_spill] sm:$0xff] }
 0x2d3   : > { %2790 = vmatprep.mubr.f32.mxu1 %v12562_v62 }
 0x2d6   : > { %2796 = vmatmul.mubr.f32.gmra.mrb[62].mxu1 %v2795_v8  ;;  %v12591_v8 = vld [vmem:[#allocation9_spill] sm:$0xff] }
 0x2d7   : > { %2886 = vmatprep.mubr.f32.mxu1 %v12562_v62 }
 0x2da   : > { %2888 = vmatmul.mubr.f32.vlgmr.msra.gmra.mrb[0].mxu1 %v9392_v0 }
 0x2db   : > { %7375 = vmatpush1.bf16.msra.mxu1 %v7374_v7  ;;  %2893 = vmatprep.mubr.f32.mxu1 %v12562_v62  ;;  %v12592_v7 = vld [vmem:[#allocation10_spill] sm:$0xff] }
 0x2dc   : > { %7377 = vmatprep.subr.bf16.mxu1 %v9350_v34 }
 0x2de   : > { %2895 = vmatmul.mubr.f32.gmra.mrb[2].mxu1 %v9386_v56 }
 0x2df   : > { %2900 = vmatprep.mubr.f32.mxu1 %v12562_v62 }
 0x2e2   : > { %2902 = vmatmul.mubr.f32.gmra.mrb[4].mxu1 %v9407_v55 }
 0x2e3   : > { %2907 = vmatprep.mubr.f32.mxu1 %v12562_v62 }
 0x2e6   : > { %2909 = vmatmul.mubr.f32.gmra.mrb[6].mxu1 %v9403_v39 }
 0x2e7   : > { %2914 = vmatprep.mubr.f32.mxu1 %v12562_v62 }
 0x2ea   : > { %2916 = vmatmul.mubr.f32.gmra.mrb[8].mxu1 %v9426_v4 }
 0x2eb   : > { %2921 = vmatprep.mubr.f32.mxu1 %v12562_v62 }
 0x2ee   : > { %2923 = vmatmul.mubr.f32.gmra.mrb[10].mxu1 %v9432_v45 }
 0x2ef   : > { %2928 = vmatprep.mubr.f32.mxu1 %v12562_v62 }
 0x2f2   : > { %2930 = vmatmul.mubr.f32.gmra.mrb[12].mxu1 %v9452_v47 }
 0x2f3   : > { %2935 = vmatprep.mubr.f32.mxu1 %v12562_v62 }
 0x2f6   : > { %2937 = vmatmul.mubr.f32.gmra.mrb[14].mxu1 %v9456_v43 }
 0x2f7   : > { %2942 = vmatprep.mubr.f32.mxu1 %v12562_v62 }
 0x2fa   : > { %2944 = vmatmul.mubr.f32.gmra.mrb[16].mxu1 %v9478_v1 }
 0x2fb   : > { %2949 = vmatprep.mubr.f32.mxu1 %v12562_v62 }
 0x2fe   : > { %2951 = vmatmul.mubr.f32.gmra.mrb[18].mxu1 %v9482_v13 }
 0x2ff   : > { %2956 = vmatprep.mubr.f32.mxu1 %v12562_v62 }
 0x302   : > { %2958 = vmatmul.mubr.f32.gmra.mrb[20].mxu1 %v9510_v52 }
 0x303   : > { %2963 = vmatprep.mubr.f32.mxu1 %v12562_v62 }
 0x306   : > { %2965 = vmatmul.mubr.f32.gmra.mrb[22].mxu1 %v9519_v36 }
 0x307   : > { %2970 = vmatprep.mubr.f32.mxu1 %v12562_v62 }
 0x30a   : > { %2972 = vmatmul.mubr.f32.gmra.mrb[24].mxu1 %v9550_v24 }
 0x30b   : > { %2977 = vmatprep.mubr.f32.mxu1 %v12562_v62 }
 0x30e   : > { %2979 = vmatmul.mubr.f32.gmra.mrb[26].mxu1 %v9559_v18 }
 0x30f   : > { %2984 = vmatprep.mubr.f32.mxu1 %v12562_v62 }
 0x312   : > { %2986 = vmatmul.mubr.f32.gmra.mrb[28].mxu1 %v9591_v30 }
 0x313   : > { %2991 = vmatprep.mubr.f32.mxu1 %v12562_v62 }
 0x316   : > { %2993 = vmatmul.mubr.f32.gmra.mrb[30].mxu1 %v9599_v12 }
 0x317   : > { %2998 = vmatprep.mubr.f32.mxu1 %v12562_v62 }
 0x31a   : > { %3000 = vmatmul.mubr.f32.gmra.mrb[32].mxu1 %v9628_v32 }
 0x31b   : > { %3005 = vmatprep.mubr.f32.mxu1 %v12562_v62 }
 0x31e   : > { %3007 = vmatmul.mubr.f32.gmra.mrb[34].mxu1 %v9637_v59 }
 0x31f   : > { %3012 = vmatprep.mubr.f32.mxu1 %v12562_v62 }
 0x322   : > { %3014 = vmatmul.mubr.f32.gmra.mrb[36].mxu1 %v9657_v10 }
 0x323   : > { %3019 = vmatprep.mubr.f32.mxu1 %v12562_v62 }
 0x326   : > { %3021 = vmatmul.mubr.f32.gmra.mrb[38].mxu1 %v9664_v26 }
 0x327   : > { %3026 = vmatprep.mubr.f32.mxu1 %v12562_v62 }
 0x32a   : > { %3028 = vmatmul.mubr.f32.gmra.mrb[40].mxu1 %v9681_v28 }
 0x32b   : > { %3033 = vmatprep.mubr.f32.mxu1 %v12562_v62 }
 0x32e   : > { %3035 = vmatmul.mubr.f32.gmra.mrb[42].mxu1 %v9688_v2  ;;  %v12608_v2 = vand.u32 4294901760, %v9413_v29 }
 0x32f   : > { %3040 = vmatprep.mubr.f32.mxu1 %v12562_v62 }
 0x332   : > { %3042 = vmatmul.mubr.f32.gmra.mrb[44].mxu1 %v9705_v49  ;;  %v12607_v49 = vand.u32 4294901760, %v9396_v61 }
 0x333   : > { %3047 = vmatprep.mubr.f32.mxu1 %v12562_v62 }
 0x336   : > { %3049 = vmatmul.mubr.f32.gmra.mrb[46].mxu1 %v9712_v53  ;;  %v12606_v53 = vand.u32 4294901760, %v9400_v50 }
 0x337   : > { %3054 = vmatprep.mubr.f32.mxu1 %v12562_v62 }
 0x33a   : > { %3056 = vmatmul.mubr.f32.gmra.mrb[48].mxu1 %v9729_v9 }
 0x33b   : > { %3061 = vmatprep.mubr.f32.mxu1 %v12562_v62 }
 0x33e   : > { %3063 = vmatmul.mubr.f32.gmra.mrb[50].mxu1 %v9736_v11  ;;  %v12605_v11 = vand.u32 4294901760, %v9363_v23  ;;  %v12610_v23 = vand.u32 4294901760, %v9437_v54 }
 0x33f   : > { %3068 = vmatprep.mubr.f32.mxu1 %v12562_v62 }
 0x342   : > { %3070 = vmatmul.mubr.f32.gmra.mrb[52].mxu1 %v9753_v42  ;;  %v12604_v42 = vand.u32 4294901760, %v9361_v22  ;;  %v12609_v22 = vand.u32 4294901760, %v9419_v46 }
 0x343   : > { %3075 = vmatprep.mubr.f32.mxu1 %v12562_v62 }
 0x344   : > { %v7382_v9 = vpack.c.bf16 %v12605_v11, %v12604_v42  ;;  %v12627_v42 = vand.u32 4294901760, %v12597_v19 }
 0x346   : > { %3077 = vmatmul.mubr.f32.gmra.mrb[54].mxu1 %v9760_v3  ;;  %v12603_v3 = vld [vmem:[#allocation23_spill] sm:$0xff] }
 0x347   : > { %3082 = vmatprep.mubr.f32.mxu1 %v12562_v62 }
 0x34a   : > { %3084 = vmatmul.mubr.f32.gmra.mrb[56].mxu1 %v9777_v14  ;;  %v12602_v14 = vld [vmem:[#allocation19_spill] sm:$0xff] }
 0x34b   : > { %3089 = vmatprep.mubr.f32.mxu1 %v12562_v62 }
 0x34e   : > { %3091 = vmatmul.mubr.f32.gmra.mrb[58].mxu1 %v9784_v41  ;;  %v12601_v41 = vld [vmem:[#allocation30_spill] sm:$0xff] }
 0x34f   : > { %3096 = vmatprep.mubr.f32.mxu1 %v12562_v62 }
 0x352   : > { %3098 = vmatmul.mubr.f32.gmra.mrb[60].mxu1 %v9801_v25  ;;  %v12600_v25 = vld [vmem:[#allocation27_spill] sm:$0xff] }
 0x353   : > { %3103 = vmatprep.mubr.f32.mxu1 %v12562_v62 }
 0x356   : > { %3105 = vmatmul.mubr.f32.gmra.mrb[62].mxu1 %v9808_v35  ;;  %v12599_v35 = vld [vmem:[#allocation24_spill] sm:$0xff] }
 0x357   : > { %3183 = vmatprep.mubr.f32.mxu1 %v12562_v62  ;;  %v12629_v11 = vand.u32 4294901760, %v12599_v35 }
 0x35a   : > { %3186 = vmatmul.mubr.f32.vlgmr.msra.gmra.mrb[0].mxu1 %v9400_v50  ;;  %v12613_v50 = vand.u32 4294901760, %v9469_v58 }
 0x35b   : > { %7379 = vmatpush1.bf16.msra.mxu1 %v9352_v40  ;;  %3191 = vmatprep.mubr.f32.mxu1 %v12562_v62 }
 0x35c   : > { %7381 = vmatprep.subr.bf16.mxu1 %v7380_v15  ;;  %v12595_v15 = vld [vmem:[#allocation13_spill] sm:$0xff] }
 0x35e   : > { %3194 = vmatmul.mubr.f32.gmra.mrb[2].mxu1 %v9396_v61  ;;  %v12612_v61 = vand.u32 4294901760, %v9461_v37 }
 0x35f   : > { %3199 = vmatprep.mubr.f32.mxu1 %v12562_v62 }
 0x362   : > { %3202 = vmatmul.mubr.f32.gmra.mrb[4].mxu1 %v9413_v29  ;;  %v12614_v29 = vand.u32 4294901760, %v9488_v48 }
 0x363   : > { %3207 = vmatprep.mubr.f32.mxu1 %v12562_v62 }
 0x366   : > { %3210 = vmatmul.mubr.f32.gmra.mrb[6].mxu1 %v9419_v46  ;;  %v12615_v46 = vand.u32 4294901760, %v9500_v44 }
 0x367   : > { %3215 = vmatprep.mubr.f32.mxu1 %v12562_v62 }
 0x36a   : > { %3218 = vmatmul.mubr.f32.gmra.mrb[8].mxu1 %v9437_v54  ;;  %v12616_v54 = vand.u32 4294901760, %v9528_v31 }
 0x36b   : > { %3223 = vmatprep.mubr.f32.mxu1 %v12562_v62 }
 0x36e   : > { %3226 = vmatmul.mubr.f32.gmra.mrb[10].mxu1 %v9445_v20 }
 0x36f   : > { %3231 = vmatprep.mubr.f32.mxu1 %v12562_v62 }
 0x372   : > { %3234 = vmatmul.mubr.f32.gmra.mrb[12].mxu1 %v9461_v37  ;;  %v12618_v37 = vand.u32 4294901760, %v12588_v60 }
 0x373   : > { %3239 = vmatprep.mubr.f32.mxu1 %v12562_v62 }
 0x376   : > { %3242 = vmatmul.mubr.f32.gmra.mrb[14].mxu1 %v9469_v58  ;;  %v12619_v58 = vand.u32 4294901760, %v12589_v21 }
 0x377   : > { %3247 = vmatprep.mubr.f32.mxu1 %v12562_v62 }
 0x37a   : > { %3250 = vmatmul.mubr.f32.gmra.mrb[16].mxu1 %v9488_v48  ;;  %v12620_v48 = vand.u32 4294901760, %v12590_v57 }
 0x37b   : > { %3255 = vmatprep.mubr.f32.mxu1 %v12562_v62 }
 0x37e   : > { %3258 = vmatmul.mubr.f32.gmra.mrb[18].mxu1 %v9500_v44  ;;  %v12622_v44 = vand.u32 4294901760, %v12592_v7 }
 0x37f   : > { %3263 = vmatprep.mubr.f32.mxu1 %v12562_v62 }
 0x382   : > { %3266 = vmatmul.mubr.f32.gmra.mrb[20].mxu1 %v9528_v31  ;;  %v12623_v31 = vand.u32 4294901760, %v12593_v17 }
 0x383   : > { %3271 = vmatprep.mubr.f32.mxu1 %v12562_v62 }
 0x386   : > { %3274 = vmatmul.mubr.f32.gmra.mrb[22].mxu1 %v9540_v38 }
 0x387   : > { %3279 = vmatprep.mubr.f32.mxu1 %v12562_v62 }
 0x38a   : > { %3282 = vmatmul.mubr.f32.gmra.mrb[24].mxu1 %v12588_v60  ;;  %v12643_v60 = vld [vmem:[#allocation31_spill] sm:$0xff] }
 0x38b   : > { %3287 = vmatprep.mubr.f32.mxu1 %v12562_v62 }
 0x38e   : > { %3290 = vmatmul.mubr.f32.gmra.mrb[26].mxu1 %v12589_v21  ;;  %v12644_v21 = vld [vmem:[#allocation36_spill] sm:$0xff] }
 0x38f   : > { %3295 = vmatprep.mubr.f32.mxu1 %v12562_v62 }
 0x392   : > { %3298 = vmatmul.mubr.f32.gmra.mrb[28].mxu1 %v12590_v57  ;;  %v12645_v57 = vld [vmem:[#allocation21_spill] sm:$0xff] }
 0x393   : > { %3303 = vmatprep.mubr.f32.mxu1 %v12562_v62 }
 0x396   : > { %3306 = vmatmul.mubr.f32.gmra.mrb[30].mxu1 %v12591_v8 }
 0x397   : > { %3311 = vmatprep.mubr.f32.mxu1 %v12562_v62 }
 0x39a   : > { %3314 = vmatmul.mubr.f32.gmra.mrb[32].mxu1 %v12592_v7  ;;  %v12647_v7 = vld [vmem:[#allocation28_spill] sm:$0xff] }
 0x39b   : > { %3319 = vmatprep.mubr.f32.mxu1 %v12562_v62 }
 0x39e   : > { %3322 = vmatmul.mubr.f32.gmra.mrb[34].mxu1 %v12593_v17  ;;  %v12648_v17 = vld [vmem:[#allocation29_spill] sm:$0xff] }
 0x39f   : > { %3327 = vmatprep.mubr.f32.mxu1 %v12562_v62 }
 0x3a2   : > { %3330 = vmatmul.mubr.f32.gmra.mrb[36].mxu1 %v12594_v51 }
 0x3a3   : > { %3335 = vmatprep.mubr.f32.mxu1 %v12562_v62 }
 0x3a6   : > { %3338 = vmatmul.mubr.f32.gmra.mrb[38].mxu1 %v12595_v15 }
 0x3a7   : > { %3343 = vmatprep.mubr.f32.mxu1 %v12562_v62 }
 0x3aa   : > { %3346 = vmatmul.mubr.f32.gmra.mrb[40].mxu1 %v12596_v16 }
 0x3ab   : > { %3351 = vmatprep.mubr.f32.mxu1 %v12562_v62 }
 0x3ae   : > { %3354 = vmatmul.mubr.f32.gmra.mrb[42].mxu1 %v12597_v19  ;;  %v12631_v19 = vand.u32 4294901760, %v12601_v41 }
 0x3af   : > { %3359 = vmatprep.mubr.f32.mxu1 %v12562_v62 }
 0x3b2   : > { %3362 = vmatmul.mubr.f32.gmra.mrb[44].mxu1 %v12598_v33 }
 0x3b3   : > { %3367 = vmatprep.mubr.f32.mxu1 %v12562_v62 }
 0x3b6   : > { %3370 = vmatmul.mubr.f32.gmra.mrb[46].mxu1 %v12599_v35  ;;  %v12633_v35 = vand.u32 4294901760, %v9773_v27 }
 0x3b7   : > { %3375 = vmatprep.mubr.f32.mxu1 %v12562_v62 }
 0x3ba   : > { %3378 = vmatmul.mubr.f32.gmra.mrb[48].mxu1 %v12600_v25 }
 0x3bb   : > { %3383 = vmatprep.mubr.f32.mxu1 %v12562_v62 }
 0x3be   : > { %3386 = vmatmul.mubr.f32.gmra.mrb[50].mxu1 %v12601_v41  ;;  %v12635_v41 = vand.u32 4294901760, %v9797_v6 }
 0x3bf   : > { %3391 = vmatprep.mubr.f32.mxu1 %v12562_v62 }
 0x3c2   : > { %3394 = vmatmul.mubr.f32.gmra.mrb[52].mxu1 %v12602_v14 }
 0x3c3   : > { %3399 = vmatprep.mubr.f32.mxu1 %v12562_v62 }
 0x3c6   : > { %3402 = vmatmul.mubr.f32.gmra.mrb[54].mxu1 %v9773_v27  ;;  %v12637_v27 = vand.u32 4294901760, %v9822_v5 }
 0x3c7   : > { %3407 = vmatprep.mubr.f32.mxu1 %v12562_v62 }
 0x3ca   : > { %3410 = vmatmul.mubr.f32.gmra.mrb[56].mxu1 %v12603_v3 }
 0x3cb   : > { %3415 = vmatprep.mubr.f32.mxu1 %v12562_v62 }
 0x3ce   : > { %3418 = vmatmul.mubr.f32.gmra.mrb[58].mxu1 %v9797_v6  ;;  %v12640_v6 = vld [vmem:[#allocation18_spill] sm:$0xff] }
 0x3cf   : > { %3423 = vmatprep.mubr.f32.mxu1 %v12562_v62 }
 0x3d2   : > { %3426 = vmatmul.mubr.f32.gmra.mrb[60].mxu1 %v9813_v63 }
 0x3d3   : > { %3431 = vmatprep.mubr.f32.mxu1 %v12562_v62 }
 0x3d6   : > { %3434 = vmatmul.mubr.f32.gmra.mrb[62].mxu1 %v9822_v5  ;;  %v12642_v5 = vld [vmem:[#allocation26_spill] sm:$0xff] }
 0x3d7   : > { %3508 = vmatprep.mubr.f32.mxu1 %v12562_v62 }
 0x3da   : > { %3512 = vmatmul.mubr.f32.vlgmr.msra.gmra.mrb[0].mxu1 %v12606_v53  ;;  %v12628_v53 = vand.u32 4294901760, %v12598_v33  ;;  %v12632_v33 = vand.u32 4294901760, %v12602_v14  ;;  %v12636_v14 = vand.u32 4294901760, %v9813_v63  ;;  %v12641_v63 = vld [vmem:[#allocation25_spill] sm:$0xff] }
 0x3db   : > { %7383 = vmatpush1.bf16.msra.mxu1 %v7382_v9  ;;  %3517 = vmatprep.mubr.f32.mxu1 %v12562_v62  ;;  %v12625_v9 = vand.u32 4294901760, %v12595_v15 }
 0x3dc   : > { %7385 = vmatprep.subr.bf16.mxu1 %v9350_v34  ;;  %v12611_v34 = vand.u32 4294901760, %v9445_v20  ;;  %v12617_v20 = vand.u32 4294901760, %v9540_v38  ;;  %v12621_v38 = vand.u32 4294901760, %v12591_v8  ;;  %v12646_v8 = vld [vmem:[#allocation22_spill] sm:$0xff] }
 0x3de   : > { %3521 = vmatmul.mubr.f32.gmra.mrb[2].mxu1 %v12607_v49  ;;  %v12624_v49 = vand.u32 4294901760, %v12594_v51 }
 0x3df   : > { %3526 = vmatprep.mubr.f32.mxu1 %v12562_v62 }
 0x3e2   : > { %3530 = vmatmul.mubr.f32.gmra.mrb[4].mxu1 %v12608_v2  ;;  %v12626_v2 = vand.u32 4294901760, %v12596_v16  ;;  %v12630_v16 = vand.u32 4294901760, %v12600_v25  ;;  %v12634_v25 = vand.u32 4294901760, %v12603_v3  ;;  %v12639_v3 = vld [vmem:[#allocation17_spill] sm:$0xff] }
 0x3e3   : > { %3535 = vmatprep.mubr.f32.mxu1 %v12562_v62 }
 0x3e6   : > { %3539 = vmatmul.mubr.f32.gmra.mrb[6].mxu1 %v12609_v22 }
 0x3e7   : > { %3544 = vmatprep.mubr.f32.mxu1 %v12562_v62 }
 0x3ea   : > { %3548 = vmatmul.mubr.f32.gmra.mrb[8].mxu1 %v12610_v23 }
 0x3eb   : > { %3553 = vmatprep.mubr.f32.mxu1 %v12562_v62 }
 0x3ee   : > { %3557 = vmatmul.mubr.f32.gmra.mrb[10].mxu1 %v12611_v34  ;;  %v4461_v34 = vld [vmem:[%s12060_s5 + $0x30] sm:$0xff] }
 0x3ef   : > { %3562 = vmatprep.mubr.f32.mxu1 %v12562_v62 }
 0x3f2   : > { %3566 = vmatmul.mubr.f32.gmra.mrb[12].mxu1 %v12612_v61 }
 0x3f3   : > { %3571 = vmatprep.mubr.f32.mxu1 %v12562_v62 }
 0x3f6   : > { %3575 = vmatmul.mubr.f32.gmra.mrb[14].mxu1 %v12613_v50 }
 0x3f7   : > { %3580 = vmatprep.mubr.f32.mxu1 %v12562_v62 }
 0x3fa   : > { %3584 = vmatmul.mubr.f32.gmra.mrb[16].mxu1 %v12614_v29 }
 0x3fb   : > { %3589 = vmatprep.mubr.f32.mxu1 %v12562_v62 }
 0x3fe   : > { %3593 = vmatmul.mubr.f32.gmra.mrb[18].mxu1 %v12615_v46  ;;  %v4462_v46 = vld [vmem:[%s12060_s5 + $0x38] sm:$0xff] }
 0x3ff   : > { %3598 = vmatprep.mubr.f32.mxu1 %v12562_v62 }
 0x402   : > { %3602 = vmatmul.mubr.f32.gmra.mrb[20].mxu1 %v12616_v54 }
 0x403   : > { %3607 = vmatprep.mubr.f32.mxu1 %v12562_v62 }
 0x406   : > { %3611 = vmatmul.mubr.f32.gmra.mrb[22].mxu1 %v12617_v20 }
 0x407   : > { %3616 = vmatprep.mubr.f32.mxu1 %v12562_v62 }
 0x40a   : > { %3620 = vmatmul.mubr.f32.gmra.mrb[24].mxu1 %v12618_v37 }
 0x40b   : > { %3625 = vmatprep.mubr.f32.mxu1 %v12562_v62 }
 0x40e   : > { %3629 = vmatmul.mubr.f32.gmra.mrb[26].mxu1 %v12619_v58 }
 0x40f   : > { %3634 = vmatprep.mubr.f32.mxu1 %v12562_v62 }
 0x412   : > { %3638 = vmatmul.mubr.f32.gmra.mrb[28].mxu1 %v12620_v48 }
 0x413   : > { %3643 = vmatprep.mubr.f32.mxu1 %v12562_v62 }
 0x416   : > { %3647 = vmatmul.mubr.f32.gmra.mrb[30].mxu1 %v12621_v38  ;;  %v4463_v38 = vld [vmem:[%s12060_s5 + $0x40] sm:$0xff] }
 0x417   : > { %3652 = vmatprep.mubr.f32.mxu1 %v12562_v62 }
 0x41a   : > { %3656 = vmatmul.mubr.f32.gmra.mrb[32].mxu1 %v12622_v44 }
 0x41b   : > { %3661 = vmatprep.mubr.f32.mxu1 %v12562_v62 }
 0x41e   : > { %3665 = vmatmul.mubr.f32.gmra.mrb[34].mxu1 %v12623_v31 }
 0x41f   : > { %3670 = vmatprep.mubr.f32.mxu1 %v12562_v62 }
 0x422   : > { %3674 = vmatmul.mubr.f32.gmra.mrb[36].mxu1 %v12624_v49  ;;  %v4464_v49 = vld [vmem:[%s12060_s5 + $0x48] sm:$0xff] }
 0x423   : > { %3679 = vmatprep.mubr.f32.mxu1 %v12562_v62 }
 0x426   : > { %3683 = vmatmul.mubr.f32.gmra.mrb[38].mxu1 %v12625_v9 }
 0x427   : > { %3688 = vmatprep.mubr.f32.mxu1 %v12562_v62 }
 0x42a   : > { %3692 = vmatmul.mubr.f32.gmra.mrb[40].mxu1 %v12626_v2 }
 0x42b   : > { %3697 = vmatprep.mubr.f32.mxu1 %v12562_v62 }
 0x42e   : > { %3701 = vmatmul.mubr.f32.gmra.mrb[42].mxu1 %v12627_v42 }
 0x42f   : > { %3706 = vmatprep.mubr.f32.mxu1 %v12562_v62 }
 0x432   : > { %3710 = vmatmul.mubr.f32.gmra.mrb[44].mxu1 %v12628_v53 }
 0x433   : > { %3715 = vmatprep.mubr.f32.mxu1 %v12562_v62 }
 0x436   : > { %3719 = vmatmul.mubr.f32.gmra.mrb[46].mxu1 %v12629_v11 }
 0x437   : > { %3724 = vmatprep.mubr.f32.mxu1 %v12562_v62 }
 0x43a   : > { %3728 = vmatmul.mubr.f32.gmra.mrb[48].mxu1 %v12630_v16  ;;  %v4465_v16 = vld [vmem:[%s12060_s5 + $0x50] sm:$0xff] }
 0x43b   : > { %3733 = vmatprep.mubr.f32.mxu1 %v12562_v62 }
 0x43e   : > { %3737 = vmatmul.mubr.f32.gmra.mrb[50].mxu1 %v12631_v19 }
 0x43f   : > { %3742 = vmatprep.mubr.f32.mxu1 %v12562_v62 }
 0x442   : > { %3746 = vmatmul.mubr.f32.gmra.mrb[52].mxu1 %v12632_v33 }
 0x443   : > { %3751 = vmatprep.mubr.f32.mxu1 %v12562_v62 }
 0x446   : > { %3755 = vmatmul.mubr.f32.gmra.mrb[54].mxu1 %v12633_v35  ;;  %v4466_v35 = vld [vmem:[%s12060_s5 + $0x58] sm:$0xff] }
 0x447   : > { %3760 = vmatprep.mubr.f32.mxu1 %v12562_v62 }
 0x44a   : > { %3764 = vmatmul.mubr.f32.gmra.mrb[56].mxu1 %v12634_v25 }
 0x44b   : > { %3769 = vmatprep.mubr.f32.mxu1 %v12562_v62 }
 0x44e   : > { %3773 = vmatmul.mubr.f32.gmra.mrb[58].mxu1 %v12635_v41 }
 0x44f   : > { %3778 = vmatprep.mubr.f32.mxu1 %v12562_v62 }
 0x452   : > { %3782 = vmatmul.mubr.f32.gmra.mrb[60].mxu1 %v12636_v14 }
 0x453   : > { %3787 = vmatprep.mubr.f32.mxu1 %v12562_v62 }
 0x456   : > { %3791 = vmatmul.mubr.f32.gmra.mrb[62].mxu1 %v12637_v27 }
 0x457   : > { %3873 = vmatprep.mubr.f32.mxu1 %v12562_v62 }
 0x45a   : > { %3875 = vmatmul.mubr.f32.vlgmr.msra.gmra.mrb[0].mxu1 %v9392_v0 }
 0x45b   : > { %7387 = vmatpush1.bf16.msra.mxu1 %v9352_v40  ;;  %3880 = vmatprep.mubr.f32.mxu1 %v12562_v62  ;;  %v12638_v40 = vld [vmem:[#allocation14_spill] sm:$0xff] }
 0x45e   : > { %3882 = vmatmul.mubr.f32.gmra.mrb[2].mxu1 %v9386_v56 }
 0x45f   : > { %3887 = vmatprep.mubr.f32.mxu1 %v12562_v62 }
 0x462   : > { %3889 = vmatmul.mubr.f32.gmra.mrb[4].mxu1 %v9407_v55 }
 0x463   : > { %3894 = vmatprep.mubr.f32.mxu1 %v12562_v62 }
 0x466   : > { %3896 = vmatmul.mubr.f32.gmra.mrb[6].mxu1 %v9403_v39 }
 0x467   : > { %3901 = vmatprep.mubr.f32.mxu1 %v12562_v62 }
 0x46a   : > { %3903 = vmatmul.mubr.f32.gmra.mrb[8].mxu1 %v9426_v4 }
 0x46b   : > { %3908 = vmatprep.mubr.f32.mxu1 %v12562_v62 }
 0x46e   : > { %3910 = vmatmul.mubr.f32.gmra.mrb[10].mxu1 %v9432_v45 }
 0x46f   : > { %3915 = vmatprep.mubr.f32.mxu1 %v12562_v62 }
 0x472   : > { %3917 = vmatmul.mubr.f32.gmra.mrb[12].mxu1 %v9452_v47 }
 0x473   : > { %3922 = vmatprep.mubr.f32.mxu1 %v12562_v62 }
 0x476   : > { %3924 = vmatmul.mubr.f32.gmra.mrb[14].mxu1 %v9456_v43 }
 0x477   : > { %3929 = vmatprep.mubr.f32.mxu1 %v12562_v62 }
 0x47a   : > { %3931 = vmatmul.mubr.f32.gmra.mrb[16].mxu1 %v9478_v1 }
 0x47b   : > { %3936 = vmatprep.mubr.f32.mxu1 %v12562_v62 }
 0x47e   : > { %3938 = vmatmul.mubr.f32.gmra.mrb[18].mxu1 %v9482_v13 }
 0x47f   : > { %3943 = vmatprep.mubr.f32.mxu1 %v12562_v62 }
 0x482   : > { %3945 = vmatmul.mubr.f32.gmra.mrb[20].mxu1 %v9510_v52 }
 0x483   : > { %3950 = vmatprep.mubr.f32.mxu1 %v12562_v62 }
 0x486   : > { %3952 = vmatmul.mubr.f32.gmra.mrb[22].mxu1 %v9519_v36 }
 0x487   : > { %3957 = vmatprep.mubr.f32.mxu1 %v12562_v62 }
 0x48a   : > { %3959 = vmatmul.mubr.f32.gmra.mrb[24].mxu1 %v9550_v24 }
 0x48b   : > { %3964 = vmatprep.mubr.f32.mxu1 %v12562_v62 }
 0x48e   : > { %3966 = vmatmul.mubr.f32.gmra.mrb[26].mxu1 %v9559_v18 }
 0x48f   : > { %3971 = vmatprep.mubr.f32.mxu1 %v12562_v62 }
 0x492   : > { %3973 = vmatmul.mubr.f32.gmra.mrb[28].mxu1 %v9591_v30 }
 0x493   : > { %3978 = vmatprep.mubr.f32.mxu1 %v12562_v62 }
 0x496   : > { %3980 = vmatmul.mubr.f32.gmra.mrb[30].mxu1 %v9599_v12 }
 0x497   : > { %3985 = vmatprep.mubr.f32.mxu1 %v12562_v62 }
 0x49a   : > { %3987 = vmatmul.mubr.f32.gmra.mrb[32].mxu1 %v9628_v32 }
 0x49b   : > { %3992 = vmatprep.mubr.f32.mxu1 %v12562_v62 }
 0x49e   : > { %3994 = vmatmul.mubr.f32.gmra.mrb[34].mxu1 %v9637_v59 }
 0x49f   : > { %3999 = vmatprep.mubr.f32.mxu1 %v12562_v62 }
 0x4a2   : > { %4001 = vmatmul.mubr.f32.gmra.mrb[36].mxu1 %v9657_v10 }
 0x4a3   : > { %4006 = vmatprep.mubr.f32.mxu1 %v12562_v62 }
 0x4a6   : > { %4008 = vmatmul.mubr.f32.gmra.mrb[38].mxu1 %v9664_v26 }
 0x4a7   : > { %4013 = vmatprep.mubr.f32.mxu1 %v12562_v62 }
 0x4aa   : > { %4015 = vmatmul.mubr.f32.gmra.mrb[40].mxu1 %v9681_v28 }
 0x4ab   : > { %4020 = vmatprep.mubr.f32.mxu1 %v12562_v62 }
 0x4ae   : > { %4022 = vmatmul.mubr.f32.gmra.mrb[42].mxu1 %v12638_v40 }
 0x4af   : > { %4027 = vmatprep.mubr.f32.mxu1 %v12562_v62 }
 0x4b2   : > { %4029 = vmatmul.mubr.f32.gmra.mrb[44].mxu1 %v12639_v3 }
 0x4b3   : > { %4034 = vmatprep.mubr.f32.mxu1 %v12562_v62 }
 0x4b6   : > { %4036 = vmatmul.mubr.f32.gmra.mrb[46].mxu1 %v12640_v6 }
 0x4b7   : > { %4041 = vmatprep.mubr.f32.mxu1 %v12562_v62 }
 0x4ba   : > { %4043 = vmatmul.mubr.f32.gmra.mrb[48].mxu1 %v12641_v63 }
 0x4bb   : > { %4048 = vmatprep.mubr.f32.mxu1 %v12562_v62 }
 0x4be   : > { %4050 = vmatmul.mubr.f32.gmra.mrb[50].mxu1 %v12642_v5 }
 0x4bf   : > { %4055 = vmatprep.mubr.f32.mxu1 %v12562_v62 }
 0x4c2   : > { %4057 = vmatmul.mubr.f32.gmra.mrb[52].mxu1 %v12643_v60 }
 0x4c3   : > { %4062 = vmatprep.mubr.f32.mxu1 %v12562_v62 }
 0x4c6   : > { %4064 = vmatmul.mubr.f32.gmra.mrb[54].mxu1 %v12644_v21 }
 0x4c7   : > { %4069 = vmatprep.mubr.f32.mxu1 %v12562_v62 }
 0x4ca   : > { %4071 = vmatmul.mubr.f32.gmra.mrb[56].mxu1 %v12645_v57 }
 0x4cb   : > { %4076 = vmatprep.mubr.f32.mxu1 %v12562_v62 }
 0x4ce   : > { %4078 = vmatmul.mubr.f32.gmra.mrb[58].mxu1 %v12646_v8 }
 0x4cf   : > { %4083 = vmatprep.mubr.f32.mxu1 %v12562_v62 }
 0x4d2   : > { %4085 = vmatmul.mubr.f32.gmra.mrb[60].mxu1 %v12647_v7 }
 0x4d3   : > { %4090 = vmatprep.mubr.f32.mxu1 %v12562_v62 }
 0x4d6   : > { %4092 = vmatmul.mubr.f32.gmra.mrb[62].mxu1 %v12648_v17 }
 0x4d7   : > { %4166 = vmatprep.mubr.f32.mxu1 %v12562_v62 }
 0x4da   : > { %4168 = vmatmul.mubr.f32.vlgmr.msra.gmra.mrb[0].mxu1 %v9392_v0 }
 0x4db   : > { %4173 = vmatprep.mubr.f32.mxu1 %v12562_v62 }
 0x4de   : > { %4175 = vmatmul.mubr.f32.gmra.mrb[2].mxu1 %v9386_v56  ;;  %v4455_v56 = vld [vmem:[%s12060_s5] sm:$0xff] }
 0x4df   : > { %4180 = vmatprep.mubr.f32.mxu1 %v12562_v62 }
 0x4e2   : > { %4182 = vmatmul.mubr.f32.gmra.mrb[4].mxu1 %v9407_v55  ;;  %v4456_v55 = vld [vmem:[%s12060_s5 + $0x8] sm:$0xff] }
 0x4e3   : > { %4187 = vmatprep.mubr.f32.mxu1 %v12562_v62 }
 0x4e6   : > { %4189 = vmatmul.mubr.f32.gmra.mrb[6].mxu1 %v9403_v39 }
 0x4e7   : > { %4194 = vmatprep.mubr.f32.mxu1 %v12562_v62 }
 0x4ea   : > { %4196 = vmatmul.mubr.f32.gmra.mrb[8].mxu1 %v9426_v4 }
 0x4eb   : > { %4201 = vmatprep.mubr.f32.mxu1 %v12562_v62 }
 0x4ee   : > { %4203 = vmatmul.mubr.f32.gmra.mrb[10].mxu1 %v9432_v45 }
 0x4ef   : > { %4208 = vmatprep.mubr.f32.mxu1 %v12562_v62 }
 0x4f2   : > { %4210 = vmatmul.mubr.f32.gmra.mrb[12].mxu1 %v9452_v47 }
 0x4f3   : > { %4215 = vmatprep.mubr.f32.mxu1 %v12562_v62 }
 0x4f6   : > { %4217 = vmatmul.mubr.f32.gmra.mrb[14].mxu1 %v9456_v43 }
 0x4f7   : > { %4222 = vmatprep.mubr.f32.mxu1 %v12562_v62 }
 0x4fa   : > { %4224 = vmatmul.mubr.f32.gmra.mrb[16].mxu1 %v9478_v1  ;;  %v4458_v1 = vld [vmem:[%s12060_s5 + $0x18] sm:$0xff] }
 0x4fb   : > { %4229 = vmatprep.mubr.f32.mxu1 %v12562_v62 }
 0x4fe   : > { %4231 = vmatmul.mubr.f32.gmra.mrb[18].mxu1 %v9482_v13 }
 0x4ff   : > { %4236 = vmatprep.mubr.f32.mxu1 %v12562_v62 }
 0x502   : > { %4238 = vmatmul.mubr.f32.gmra.mrb[20].mxu1 %v9510_v52 }
 0x503   : > { %4243 = vmatprep.mubr.f32.mxu1 %v12562_v62 }
 0x506   : > { %4245 = vmatmul.mubr.f32.gmra.mrb[22].mxu1 %v9519_v36 }
 0x507   : > { %4250 = vmatprep.mubr.f32.mxu1 %v12562_v62 }
 0x50a   : > { %4252 = vmatmul.mubr.f32.gmra.mrb[24].mxu1 %v9550_v24 }
 0x50b   : > { %4257 = vmatprep.mubr.f32.mxu1 %v12562_v62 }
 0x50e   : > { %4259 = vmatmul.mubr.f32.gmra.mrb[26].mxu1 %v9559_v18 }
 0x50f   : > { %4264 = vmatprep.mubr.f32.mxu1 %v12562_v62 }
 0x512   : > { %4266 = vmatmul.mubr.f32.gmra.mrb[28].mxu1 %v9591_v30 }
 0x513   : > { %4271 = vmatprep.mubr.f32.mxu1 %v12562_v62 }
 0x516   : > { %4273 = vmatmul.mubr.f32.gmra.mrb[30].mxu1 %v9599_v12 }
 0x517   : > { %4278 = vmatprep.mubr.f32.mxu1 %v12562_v62 }
 0x51a   : > { %4280 = vmatmul.mubr.f32.gmra.mrb[32].mxu1 %v9628_v32  ;;  %v4459_v32 = vld [vmem:[%s12060_s5 + $0x20] sm:$0xff] }
 0x51b   : > { %4285 = vmatprep.mubr.f32.mxu1 %v12562_v62 }
 0x51e   : > { %4287 = vmatmul.mubr.f32.gmra.mrb[34].mxu1 %v9637_v59 }
 0x51f   : > { %4292 = vmatprep.mubr.f32.mxu1 %v12562_v62 }
 0x522   : > { %4294 = vmatmul.mubr.f32.gmra.mrb[36].mxu1 %v9657_v10  ;;  %v4460_v10 = vld [vmem:[%s12060_s5 + $0x28] sm:$0xff] }
 0x523   : > { %4299 = vmatprep.mubr.f32.mxu1 %v12562_v62 }
 0x526   : > { %4301 = vmatmul.mubr.f32.gmra.mrb[38].mxu1 %v9664_v26 }
 0x527   : > { %4306 = vmatprep.mubr.f32.mxu1 %v12562_v62 }
 0x52a   : > { %4308 = vmatmul.mubr.f32.gmra.mrb[40].mxu1 %v9681_v28 }
 0x52b   : > { %4313 = vmatprep.mubr.f32.mxu1 %v12562_v62 }
 0x52e   : > { %4315 = vmatmul.mubr.f32.gmra.mrb[42].mxu1 %v12638_v40 }
 0x52f   : > { %4320 = vmatprep.mubr.f32.mxu1 %v12562_v62 }
 0x532   : > { %4322 = vmatmul.mubr.f32.gmra.mrb[44].mxu1 %v12639_v3  ;;  %v4467_v3 = vld [vmem:[%s12060_s5 + $0x60] sm:$0xff] }
 0x533   : > { %4327 = vmatprep.mubr.f32.mxu1 %v12562_v62 }
 0x536   : > { %4329 = vmatmul.mubr.f32.gmra.mrb[46].mxu1 %v12640_v6 }
 0x537   : > { %4334 = vmatprep.mubr.f32.mxu1 %v12562_v62 }
 0x53a   : > { %4336 = vmatmul.mubr.f32.gmra.mrb[48].mxu1 %v12641_v63 }
 0x53b   : > { %4341 = vmatprep.mubr.f32.mxu1 %v12562_v62 }
 0x53e   : > { %4343 = vmatmul.mubr.f32.gmra.mrb[50].mxu1 %v12642_v5  ;;  %v4468_v5 = vld [vmem:[%s12060_s5 + $0x68] sm:$0xff] }
 0x53f   : > { %4348 = vmatprep.mubr.f32.mxu1 %v12562_v62 }
 0x542   : > { %4350 = vmatmul.mubr.f32.gmra.mrb[52].mxu1 %v12643_v60 }
 0x543   : > { %4355 = vmatprep.mubr.f32.mxu1 %v12562_v62 }
 0x546   : > { %4357 = vmatmul.mubr.f32.gmra.mrb[54].mxu1 %v12644_v21 }
 0x547   : > { %4362 = vmatprep.mubr.f32.mxu1 %v12562_v62 }
 0x54a   : > { %4364 = vmatmul.mubr.f32.gmra.mrb[56].mxu1 %v12645_v57 }
 0x54b   : > { %4369 = vmatprep.mubr.f32.mxu1 %v12562_v62 }
 0x54e   : > { %4371 = vmatmul.mubr.f32.gmra.mrb[58].mxu1 %v12646_v8 }
 0x54f   : > { %4376 = vmatprep.mubr.f32.mxu1 %v12562_v62 }
 0x552   : > { %4378 = vmatmul.mubr.f32.gmra.mrb[60].mxu1 %v12647_v7 }
 0x553   : > { %4383 = vmatprep.mubr.f32.mxu1 %v12562_v62  ;;  %v4457_v62 = vld [vmem:[%s12060_s5 + $0x10] sm:$0xff] }
 0x556   : > { %4385 = vmatmul.mubr.f32.gmra.mrb[62].mxu1 %v12648_v17  ;;  %v4469_v17 = vld [vmem:[%s12060_s5 + $0x70] sm:$0xff] }
 0x5ad   : > { %v4169_v59 = vpop.f32.mrb[0].mxu1 }
 0x5ae   : > { %v4391_v0 = vmul.f32 64.0, %v4169_v59  ;;  %v4171_v39 = vpop.f32.mrb[1].mxu1 }
 0x5af   : > { %v4392_v12 = vmul.f32 64.0, %v4171_v39 }
 0x5b0   : > { %v10210_v4 = vadd.f32 %v4455_v56, %v4391_v0  ;;  %v4470_v0 = vld [vmem:[%s12060_s5 + $0x78] sm:$0xff] }
 0x5b1   : > { %v4176_v45 = vpop.f32.mrb[2].mxu1  ;;  %v10215_v47 = vadd.f32 %v4456_v55, %v4392_v12 }
 0x5b2   : > { %v4393_v43 = vmul.f32 64.0, %v4176_v45  ;;  %v4178_v18 = vpop.f32.mrb[3].mxu1 }
 0x5b3   : > { %v4394_v13 = vmul.f32 64.0, %v4178_v18  ;;  %v4583_v52 = vmax.f32 %v10210_v4, %v10215_v47 }
 0x5b4   : > { %v10222_v36 = vadd.f32 %v4457_v62, %v4393_v43  ;;  %v4471_v43 = vld [vmem:[%s12060_s5 + $0x80] sm:$0xff] }
 0x5b5   : > { %v10224_v24 = vadd.f32 %v4458_v1, %v4394_v13  ;;  %4584 = vmax.xlane.f32.xlu0 %v4583_v52  ;;  %v4183_v30 = vpop.f32.mrb[4].mxu1  ;;  %v4472_v13 = vld [vmem:[%s12060_s5 + $0x88] sm:$0xff] }
 0x5b6   : > { %v4395_v26 = vmul.f32 64.0, %v4183_v30  ;;  %v4185_v28 = vpop.f32.mrb[5].mxu1 }
 0x5b7   : > { %v4396_v51 = vmul.f32 64.0, %v4185_v28  ;;  %v4586_v15 = vmax.f32 %v10222_v36, %v10224_v24 }
 0x5b8   : > { %v10234_v22 = vadd.f32 %v4459_v32, %v4395_v26 }
 0x5b9   : > { %4587 = vmax.xlane.f32.xlu0 %v4586_v15  ;;  %v4190_v23 = vpop.f32.mrb[6].mxu1  ;;  %v10239_v61 = vadd.f32 %v4460_v10, %v4396_v51  ;;  %v4473_v10 = vld [vmem:[%s12060_s5 + $0x90] sm:$0xff] }
 0x5ba   : > { %v4397_v50 = vmul.f32 64.0, %v4190_v23  ;;  %v4192_v29 = vpop.f32.mrb[7].mxu1  ;;  %v4474_v23 = vld [vmem:[%s12060_s5 + $0x98] sm:$0xff] }
 0x5bb   : > { %v4398_v54 = vmul.f32 64.0, %v4192_v29  ;;  %v4589_v20 = vmax.f32 %v10234_v22, %v10239_v61 }
 0x5bc   : > { %v10246_v37 = vadd.f32 %v4461_v34, %v4397_v50 }
 0x5bd   : > { %v10248_v58 = vadd.f32 %v4462_v46, %v4398_v54  ;;  %4590 = vmax.xlane.f32.xlu1 %v4589_v20  ;;  %v4197_v48 = vpop.f32.mrb[8].mxu1  ;;  %v4475_v20 = vld [vmem:[%s12060_s5 + $0xa0] sm:$0xff] }
 0x5be   : > { %v4399_v44 = vmul.f32 64.0, %v4197_v48  ;;  %v4199_v31 = vpop.f32.mrb[9].mxu1 }
 0x5bf   : > { %v4400_v9 = vmul.f32 64.0, %v4199_v31  ;;  %v4592_v2 = vmax.f32 %v10246_v37, %v10248_v58 }
 0x5c0   : > { %v10258_v42 = vadd.f32 %v4463_v38, %v4399_v44  ;;  %v4476_v44 = vld [vmem:[%s12060_s5 + $0xa8] sm:$0xff] }
 0x5c1   : > { %v10260_v53 = vadd.f32 %v4464_v49, %v4400_v9  ;;  %4593 = vmax.xlane.f32.xlu1 %v4592_v2  ;;  %v4204_v11 = vpop.f32.mrb[10].mxu1 }
 0x5c2   : > { %v4401_v19 = vmul.f32 64.0, %v4204_v11  ;;  %v4206_v33 = vpop.f32.mrb[11].mxu1 }
 0x5c3   : > { %v4402_v25 = vmul.f32 64.0, %v4206_v33  ;;  %v4595_v41 = vmax.f32 %v10258_v42, %v10260_v53 }
 0x5c4   : > { %v10270_v14 = vadd.f32 %v4465_v16, %v4401_v19  ;;  %v4477_v16 = vld [vmem:[%s12060_s5 + $0xb0] sm:$0xff] }
 0x5c5   : > { %v10272_v27 = vadd.f32 %v4466_v35, %v4402_v25  ;;  %4596 = vmax.xlane.f32.xlu0 %v4595_v41  ;;  %v4211_v40 = vpop.f32.mrb[12].mxu1  ;;  %v4478_v35 = vld [vmem:[%s12060_s5 + $0xb8] sm:$0xff] }
 0x5c6   : > { %v4403_v6 = vmul.f32 64.0, %v4211_v40  ;;  %v4213_v63 = vpop.f32.mrb[13].mxu1 }
 0x5c7   : > { %v4404_v60 = vmul.f32 64.0, %v4213_v63  ;;  %v4598_v21 = vmax.f32 %v10270_v14, %v10272_v27  ;;  %v4479_v63 = vld [vmem:[%s12060_s5 + $0xc0] sm:$0xff] }
 0x5c8   : > { %v10282_v57 = vadd.f32 %v4467_v3, %v4403_v6 }
 0x5c9   : > { %v10284_v8 = vadd.f32 %v4468_v5, %v4404_v60  ;;  %4599 = vmax.xlane.f32.xlu1 %v4598_v21  ;;  %v4218_v7 = vpop.f32.mrb[14].mxu1  ;;  %v4480_v21 = vld [vmem:[%s12060_s5 + $0xc8] sm:$0xff] }
 0x5ca   : > { %v4405_v59 = vmul.f32 64.0, %v4218_v7  ;;  %v4220_v56 = vpop.f32.mrb[15].mxu1 }
 0x5cb   : > { %v4406_v39 = vmul.f32 64.0, %v4220_v56  ;;  %v4601_v55 = vmax.f32 %v10282_v57, %v10284_v8 }
 0x5cc   : > { %v10294_v12 = vadd.f32 %v4469_v17, %v4405_v59 }
 0x5cd   : > { %v10296_v45 = vadd.f32 %v4470_v0, %v4406_v39  ;;  %4602 = vmax.xlane.f32.xlu0 %v4601_v55  ;;  %v4225_v62 = vpop.f32.mrb[16].mxu1  ;;  %v4481_v39 = vld [vmem:[%s12060_s5 + $0xd0] sm:$0xff] }
 0x5ce   : > { %v4407_v18 = vmul.f32 64.0, %v4225_v62  ;;  %v4227_v1 = vpop.f32.mrb[17].mxu1 }
 0x5cf   : > { %v4408_v52 = vmul.f32 64.0, %v4227_v1  ;;  %v4604_v30 = vmax.f32 %v10294_v12, %v10296_v45 }
 0x5d0   : > { %v10306_v32 = vadd.f32 %v4471_v43, %v4407_v18  ;;  %v4482_v43 = vld [vmem:[%s12060_s5 + $0xd8] sm:$0xff] }
 0x5d1   : > { %v10308_v26 = vadd.f32 %v4472_v13, %v4408_v52  ;;  %4605 = vmax.xlane.f32.xlu1 %v4604_v30  ;;  %v4232_v28 = vpop.f32.mrb[18].mxu1 }
 0x5d2   : > { %v4409_v51 = vmul.f32 64.0, %v4232_v28  ;;  %v4234_v15 = vpop.f32.mrb[19].mxu1  ;;  %v4483_v28 = vld [vmem:[%s12060_s5 + $0xe0] sm:$0xff] }
 0x5d3   : > { %v4410_v34 = vmul.f32 64.0, %v4234_v15  ;;  %v4607_v50 = vmax.f32 %v10306_v32, %v10308_v26  ;;  %v4484_v15 = vld [vmem:[%s12060_s5 + $0xe8] sm:$0xff] }
 0x5d4   : > { %v10318_v29 = vadd.f32 %v4473_v10, %v4409_v51 }
 0x5d5   : > { %v10320_v46 = vadd.f32 %v4474_v23, %v4410_v34  ;;  %4608 = vmax.xlane.f32.xlu0 %v4607_v50  ;;  %v4239_v54 = vpop.f32.mrb[20].mxu1 }
 0x5d6   : > { %v4411_v48 = vmul.f32 64.0, %v4239_v54  ;;  %v4241_v38 = vpop.f32.mrb[21].mxu1 }
 0x5d7   : > { %v4412_v31 = vmul.f32 64.0, %v4241_v38  ;;  %v4610_v49 = vmax.f32 %v10318_v29, %v10320_v46 }
 0x5d8   : > { %v10330_v9 = vadd.f32 %v4475_v20, %v4411_v48  ;;  %v4485_v48 = vld [vmem:[%s12060_s5 + $0xf0] sm:$0xff] }
 0x5d9   : > { %v10332_v2 = vadd.f32 %v4476_v44, %v4412_v31  ;;  %4611 = vmax.xlane.f32.xlu1 %v4610_v49  ;;  %v4246_v11 = vpop.f32.mrb[22].mxu1  ;;  %v4486_v31 = vld [vmem:[%s12060_s5 + $0xf8] sm:$0xff] }
 0x5da   : > { %v4413_v19 = vmul.f32 64.0, %v4246_v11  ;;  %v4248_v33 = vpop.f32.mrb[23].mxu1 }
 0x5db   : > { %v4414_v25 = vmul.f32 64.0, %v4248_v33  ;;  %v4613_v41 = vmax.f32 %v10330_v9, %v10332_v2 }
 0x5dc   : > { %v10342_v40 = vadd.f32 %v4477_v16, %v4413_v19 }
 0x5dd   : > { %v10344_v3 = vadd.f32 %v4478_v35, %v4414_v25  ;;  %4614 = vmax.xlane.f32.xlu0 %v4613_v41  ;;  %v4253_v6 = vpop.f32.mrb[24].mxu1  ;;  %v4487_v35 = vld [vmem:[%s12060_s5 + $0x100] sm:$0xff] }
 0x5de   : > { %v4415_v5 = vmul.f32 64.0, %v4253_v6  ;;  %v4255_v60 = vpop.f32.mrb[25].mxu1  ;;  %v4488_v6 = vld [vmem:[%s12060_s5 + $0x108] sm:$0xff] }
 0x5df   : > { %v4416_v7 = vmul.f32 64.0, %v4255_v60  ;;  %v4616_v17 = vmax.f32 %v10342_v40, %v10344_v3 }
 0x5e0   : > { %v10354_v59 = vadd.f32 %v4479_v63, %v4415_v5 }
 0x5e1   : > { %v10356_v56 = vadd.f32 %v4480_v21, %v4416_v7  ;;  %4617 = vmax.xlane.f32.xlu1 %v4616_v17  ;;  %v4260_v0 = vpop.f32.mrb[26].mxu1  ;;  %v4489_v17 = vld [vmem:[%s12060_s5 + $0x110] sm:$0xff] }
 0x5e2   : > { %v4417_v55 = vmul.f32 64.0, %v4260_v0  ;;  %v4262_v62 = vpop.f32.mrb[27].mxu1 }
 0x5e3   : > { %v4418_v18 = vmul.f32 64.0, %v4262_v62  ;;  %v4619_v1 = vmax.f32 %v10354_v59, %v10356_v56 }
 0x5e4   : > { %v10366_v13 = vadd.f32 %v4481_v39, %v4417_v55  ;;  %v4490_v55 = vld [vmem:[%s12060_s5 + $0x118] sm:$0xff] }
 0x5e5   : > { %v10368_v52 = vadd.f32 %v4482_v43, %v4418_v18  ;;  %4620 = vmax.xlane.f32.xlu0 %v4619_v1  ;;  %v4267_v30 = vpop.f32.mrb[28].mxu1 }
 0x5e6   : > { %v4419_v10 = vmul.f32 64.0, %v4267_v30  ;;  %v4269_v51 = vpop.f32.mrb[29].mxu1 }
 0x5e7   : > { %v4420_v23 = vmul.f32 64.0, %v4269_v51  ;;  %v4622_v34 = vmax.f32 %v10366_v13, %v10368_v52 }
 0x5e8   : > { %v10378_v50 = vadd.f32 %v4483_v28, %v4419_v10  ;;  %v4491_v28 = vld [vmem:[%s12060_s5 + $0x120] sm:$0xff] }
 0x5e9   : > { %v10380_v54 = vadd.f32 %v4484_v15, %v4420_v23  ;;  %4623 = vmax.xlane.f32.xlu1 %v4622_v34  ;;  %v4274_v20 = vpop.f32.mrb[30].mxu1  ;;  %v4492_v15 = vld [vmem:[%s12060_s5 + $0x128] sm:$0xff] }
 0x5ea   : > { %v4421_v38 = vmul.f32 64.0, %v4274_v20  ;;  %v4276_v44 = vpop.f32.mrb[31].mxu1 }
 0x5eb   : > { %v4422_v49 = vmul.f32 64.0, %v4276_v44  ;;  %v4625_v11 = vmax.f32 %v10378_v50, %v10380_v54  ;;  %v4493_v44 = vld [vmem:[%s12060_s5 + $0x130] sm:$0xff] }
 0x5ec   : > { %v10390_v16 = vadd.f32 %v4485_v48, %v4421_v38 }
 0x5ed   : > { %v10392_v19 = vadd.f32 %v4486_v31, %v4422_v49  ;;  %4626 = vmax.xlane.f32.xlu0 %v4625_v11  ;;  %v4281_v33 = vpop.f32.mrb[32].mxu1  ;;  %v4494_v11 = vld [vmem:[%s12060_s5 + $0x138] sm:$0xff] }
 0x5ee   : > { %v4423_v25 = vmul.f32 64.0, %v4281_v33  ;;  %v4283_v41 = vpop.f32.mrb[33].mxu1 }
 0x5ef   : > { %v4424_v63 = vmul.f32 64.0, %v4283_v41  ;;  %v4628_v5 = vmax.f32 %v10390_v16, %v10392_v19 }
 0x5f0   : > { %v10402_v60 = vadd.f32 %v4487_v35, %v4423_v25 }
 0x5f1   : > { %v10404_v21 = vadd.f32 %v4488_v6, %v4424_v63  ;;  %4629 = vmax.xlane.f32.xlu1 %v4628_v5  ;;  %v4288_v7 = vpop.f32.mrb[34].mxu1  ;;  %v4495_v63 = vld [vmem:[%s12060_s5 + $0x140] sm:$0xff] }
 0x5f2   : > { %v4425_v0 = vmul.f32 64.0, %v4288_v7  ;;  %v4290_v39 = vpop.f32.mrb[35].mxu1 }
 0x5f3   : > { %v4426_v62 = vmul.f32 64.0, %v4290_v39  ;;  %v4631_v43 = vmax.f32 %v10402_v60, %v10404_v21 }
 0x5f4   : > { %v10414_v18 = vadd.f32 %v4489_v17, %v4425_v0  ;;  %v4496_v17 = vld [vmem:[%s12060_s5 + $0x148] sm:$0xff] }
 0x5f5   : > { %v10416_v1 = vadd.f32 %v4490_v55, %v4426_v62  ;;  %4632 = vmax.xlane.f32.xlu0 %v4631_v43  ;;  %v4295_v30 = vpop.f32.mrb[36].mxu1 }
 0x5f6   : > { %v4427_v10 = vmul.f32 64.0, %v4295_v30  ;;  %v4297_v51 = vpop.f32.mrb[37].mxu1  ;;  %v4497_v30 = vld [vmem:[%s12060_s5 + $0x150] sm:$0xff] }
 0x5f7   : > { %v4428_v23 = vmul.f32 64.0, %v4297_v51  ;;  %v4634_v34 = vmax.f32 %v10414_v18, %v10416_v1  ;;  %v4498_v51 = vld [vmem:[%s12060_s5 + $0x158] sm:$0xff] }
 0x5f8   : > { %v10426_v20 = vadd.f32 %v4491_v28, %v4427_v10 }
 0x5f9   : > { %v10428_v48 = vadd.f32 %v4492_v15, %v4428_v23  ;;  %4635 = vmax.xlane.f32.xlu1 %v4634_v34  ;;  %v4302_v38 = vpop.f32.mrb[38].mxu1 }
 0x5fa   : > { %v4429_v31 = vmul.f32 64.0, %v4302_v38  ;;  %v4304_v49 = vpop.f32.mrb[39].mxu1 }
 0x5fb   : > { %v4430_v33 = vmul.f32 64.0, %v4304_v49  ;;  %v4637_v35 = vmax.f32 %v10426_v20, %v10428_v48 }
 0x5fc   : > { %v10438_v25 = vadd.f32 %v4493_v44, %v4429_v31  ;;  %v4499_v31 = vld [vmem:[%s12060_s5 + $0x160] sm:$0xff] }
 0x5fd   : > { %v10440_v41 = vadd.f32 %v4494_v11, %v4430_v33  ;;  %4638 = vmax.xlane.f32.xlu0 %v4637_v35  ;;  %v4309_v6 = vpop.f32.mrb[40].mxu1  ;;  %v4500_v33 = vld [vmem:[%s12060_s5 + $0x168] sm:$0xff] }
 0x5fe   : > { %v4431_v5 = vmul.f32 64.0, %v4309_v6  ;;  %v4311_v7 = vpop.f32.mrb[41].mxu1 }
 0x5ff   : > { %v4432_v0 = vmul.f32 64.0, %v4311_v7  ;;  %v4640_v39 = vmax.f32 %v10438_v25, %v10440_v41 }
 0x600   : > { %v10450_v55 = vadd.f32 %v4495_v63, %v4431_v5 }
 0x601   : > { %v10452_v62 = vadd.f32 %v4496_v17, %v4432_v0  ;;  %4641 = vmax.xlane.f32.xlu1 %v4640_v39  ;;  %v4316_v43 = vpop.f32.mrb[42].mxu1  ;;  %v4501_v17 = vld [vmem:[%s12060_s5 + $0x170] sm:$0xff] }
 0x602   : > { %v4433_v28 = vmul.f32 64.0, %v4316_v43  ;;  %v4318_v10 = vpop.f32.mrb[43].mxu1  ;;  %v4502_v43 = vld [vmem:[%s12060_s5 + $0x178] sm:$0xff] }
 0x603   : > { %v4434_v15 = vmul.f32 64.0, %v4318_v10  ;;  %v4643_v23 = vmax.f32 %v10450_v55, %v10452_v62 }
 0x604   : > { %v10462_v34 = vadd.f32 %v4497_v30, %v4433_v28 }
 0x605   : > { %v10464_v38 = vadd.f32 %v4498_v51, %v4434_v15  ;;  %4644 = vmax.xlane.f32.xlu0 %v4643_v23  ;;  %v4323_v44 = vpop.f32.mrb[44].mxu1  ;;  %v4503_v23 = vld [vmem:[%s12060_s5 + $0x180] sm:$0xff] }
 0x606   : > { %v4435_v49 = vmul.f32 64.0, %v4323_v44  ;;  %v4325_v11 = vpop.f32.mrb[45].mxu1 }
 0x607   : > { %v4436_v35 = vmul.f32 64.0, %v4325_v11  ;;  %v4646_v6 = vmax.f32 %v10462_v34, %v10464_v38 }
 0x608   : > { %v10474_v63 = vadd.f32 %v4499_v31, %v4435_v49  ;;  %v4504_v49 = vld [vmem:[%s12060_s5 + $0x188] sm:$0xff] }
 0x609   : > { %v10476_v5 = vadd.f32 %v4500_v33, %v4436_v35  ;;  %4647 = vmax.xlane.f32.xlu1 %v4646_v6  ;;  %v4330_v7 = vpop.f32.mrb[46].mxu1 }
 0x60a   : > { %v4437_v0 = vmul.f32 64.0, %v4330_v7  ;;  %v4332_v39 = vpop.f32.mrb[47].mxu1 }
 0x60b   : > { %v4438_v30 = vmul.f32 64.0, %v4332_v39  ;;  %v4649_v28 = vmax.f32 %v10474_v63, %v10476_v5 }
 0x60c   : > { %v10486_v10 = vadd.f32 %v4501_v17, %v4437_v0  ;;  %v4505_v17 = vld [vmem:[%s12060_s5 + $0x190] sm:$0xff] }
 0x60d   : > { %v10488_v51 = vadd.f32 %v4502_v43, %v4438_v30  ;;  %4650 = vmax.xlane.f32.xlu0 %v4649_v28  ;;  %v4337_v15 = vpop.f32.mrb[48].mxu1  ;;  %v4506_v43 = vld [vmem:[%s12060_s5 + $0x198] sm:$0xff] }
 0x60e   : > { %v4439_v44 = vmul.f32 64.0, %v4337_v15  ;;  %v4339_v31 = vpop.f32.mrb[49].mxu1 }
 0x60f   : > { %v4440_v11 = vmul.f32 64.0, %v4339_v31  ;;  %v4652_v33 = vmax.f32 %v10486_v10, %v10488_v51  ;;  %v4507_v31 = vld [vmem:[%s12060_s5 + $0x1a0] sm:$0xff] }
 0x610   : > { %v10498_v35 = vadd.f32 %v4503_v23, %v4439_v44 }
 0x611   : > { %v10500_v6 = vadd.f32 %v4504_v49, %v4440_v11  ;;  %4653 = vmax.xlane.f32.xlu1 %v4652_v33  ;;  %v4344_v7 = vpop.f32.mrb[50].mxu1  ;;  %v4508_v33 = vld [vmem:[%s12060_s5 + $0x1a8] sm:$0xff] }
 0x612   : > { %12649 = vst [vmem:[#allocation32_spill] sm:$0xff] %v10498_v35  ;;  %v4441_v0 = vmul.f32 64.0, %v4344_v7  ;;  %v4346_v39 = vpop.f32.mrb[51].mxu1 }
 0x613   : > { %12650 = vst [vmem:[#allocation33_spill] sm:$0xff] %v10500_v6  ;;  %v4442_v30 = vmul.f32 64.0, %v4346_v39  ;;  %v4655_v28 = vmax.f32 %v10498_v35, %v10500_v6  ;;  %v4510_v6 = vld [vmem:[%s12060_s5 + $0x1b8] sm:$0xff] }
 0x614   : > { %v10510_v15 = vadd.f32 %v4505_v17, %v4441_v0 }
 0x615   : > { %v10512_v23 = vadd.f32 %v4506_v43, %v4442_v30  ;;  %4656 = vmax.xlane.f32.xlu0 %v4655_v28  ;;  %v4351_v44 = vpop.f32.mrb[52].mxu1  ;;  %v4509_v30 = vld [vmem:[%s12060_s5 + $0x1b0] sm:$0xff] }
 0x616   : > { %12651 = vst [vmem:[#allocation34_spill] sm:$0xff] %v10510_v15  ;;  %v4443_v49 = vmul.f32 64.0, %v4351_v44  ;;  %v4353_v11 = vpop.f32.mrb[53].mxu1 }
 0x617   : > { %12652 = vst [vmem:[#allocation35_spill] sm:$0xff] %v10512_v23  ;;  %v4444_v7 = vmul.f32 64.0, %v4353_v11  ;;  %v4658_v39 = vmax.f32 %v10510_v15, %v10512_v23  ;;  %v4512_v15 = vld [vmem:[%s12060_s5 + $0x1c8] sm:$0xff] }
 0x618   : > { %v10522_v17 = vadd.f32 %v4507_v31, %v4443_v49 }
 0x619   : > { %v10524_v0 = vadd.f32 %v4508_v33, %v4444_v7  ;;  %4659 = vmax.xlane.f32.xlu1 %v4658_v39  ;;  %v4358_v43 = vpop.f32.mrb[54].mxu1  ;;  %v4511_v7 = vld [vmem:[%s12060_s5 + $0x1c0] sm:$0xff] }
 0x61a   : > { %12653 = vst [vmem:[#allocation37_spill] sm:$0xff] %v10522_v17  ;;  %v4445_v28 = vmul.f32 64.0, %v4358_v43  ;;  %v4360_v44 = vpop.f32.mrb[55].mxu1 }
 0x61b   : > { %12654 = vst [vmem:[#allocation38_spill] sm:$0xff] %v10524_v0  ;;  %v4446_v11 = vmul.f32 64.0, %v4360_v44  ;;  %v4661_v23 = vmax.f32 %v10522_v17, %v10524_v0  ;;  %v4514_v17 = vld [vmem:[%s12060_s5 + $0x1d8] sm:$0xff] }
 0x61c   : > { %v10534_v31 = vadd.f32 %v4509_v30, %v4445_v28  ;;  %v4513_v28 = vld [vmem:[%s12060_s5 + $0x1d0] sm:$0xff] }
 0x61d   : > { %v10536_v49 = vadd.f32 %v4510_v6, %v4446_v11  ;;  %4662 = vmax.xlane.f32.xlu0 %v4661_v23  ;;  %v4365_v33 = vpop.f32.mrb[56].mxu1 }
 0x61e   : > { %12655 = vst [vmem:[#allocation39_spill] sm:$0xff] %v10534_v31  ;;  %v4447_v39 = vmul.f32 64.0, %v4365_v33  ;;  %v4367_v43 = vpop.f32.mrb[57].mxu1 }
 0x61f   : > { %12656 = vst [vmem:[#allocation6_spill] sm:$0xff] %v10536_v49  ;;  %v4448_v44 = vmul.f32 64.0, %v4367_v43  ;;  %v4664_v0 = vmax.f32 %v10534_v31, %v10536_v49  ;;  %v4516_v31 = vld [vmem:[%s12060_s5 + $0x1e8] sm:$0xff] }
 0x620   : > { %v10546_v30 = vadd.f32 %v4511_v7, %v4447_v39  ;;  %v4515_v39 = vld [vmem:[%s12060_s5 + $0x1e0] sm:$0xff] }
 0x621   : > { %v10548_v6 = vadd.f32 %v4512_v15, %v4448_v44  ;;  %4665 = vmax.xlane.f32.xlu1 %v4664_v0  ;;  %v4372_v23 = vpop.f32.mrb[58].mxu1 }
 0x622   : > { %12657 = vst [vmem:[#allocation7_spill] sm:$0xff] %v10546_v30  ;;  %v4449_v11 = vmul.f32 64.0, %v4372_v23  ;;  %v4374_v33 = vpop.f32.mrb[59].mxu1 }
 0x623   : > { %12658 = vst [vmem:[#allocation8_spill] sm:$0xff] %v10548_v6  ;;  %v4450_v43 = vmul.f32 64.0, %v4374_v33  ;;  %v4667_v49 = vmax.f32 %v10546_v30, %v10548_v6  ;;  %v4518_v30 = vld [vmem:[%s12060_s5 + $0x1f8] sm:$0xff] }
 0x624   : > { %v10558_v7 = vadd.f32 %v4513_v28, %v4449_v11  ;;  %v4517_v11 = vld [vmem:[%s12060_s5 + $0x1f0] sm:$0xff] }
 0x625   : > { %v10560_v15 = vadd.f32 %v4514_v17, %v4450_v43  ;;  %4668 = vmax.xlane.f32.xlu0 %v4667_v49  ;;  %v4379_v0 = vpop.f32.mrb[60].mxu1 }
 0x626   : > { %12659 = vst [vmem:[#allocation9_spill] sm:$0xff] %v10558_v7  ;;  %v4451_v44 = vmul.f32 64.0, %v4379_v0  ;;  %v4381_v23 = vpop.f32.mrb[61].mxu1 }
 0x627   : > { %12660 = vst [vmem:[#allocation10_spill] sm:$0xff] %v10560_v15  ;;  %v4452_v33 = vmul.f32 64.0, %v4381_v23  ;;  %v4670_v6 = vmax.f32 %v10558_v7, %v10560_v15 }
 0x628   : > { %v10570_v28 = vadd.f32 %v4515_v39, %v4451_v44 }
 0x629   : > { %v10572_v17 = vadd.f32 %v4516_v31, %v4452_v33  ;;  %4671 = vmax.xlane.f32.xlu1 %v4670_v6  ;;  %v4386_v49 = vpop.f32.mrb[62].mxu1 }
 0x62a   : > { %v4453_v43 = vmul.f32 64.0, %v4386_v49  ;;  %v4388_v0 = vpop.f32.mrb[63].mxu1 }
 0x62b   : > { %12661 = vst [vmem:[#allocation11_spill] sm:$0xff] %v10572_v17  ;;  %v4454_v23 = vmul.f32 64.0, %v4388_v0  ;;  %v4673_v15 = vmax.f32 %v10570_v28, %v10572_v17 }
 0x62c   : > { %v10582_v39 = vadd.f32 %v4517_v11, %v4453_v43 }
 0x62d   : > { %v10584_v31 = vadd.f32 %v4518_v30, %v4454_v23  ;;  %4674 = vmax.xlane.f32.xlu0 %v4673_v15 }
 0x62f   : > { %v4676_v6 = vmax.f32 %v10582_v39, %v10584_v31 }
 0x631   : > { %4677 = vmax.xlane.f32.xlu1 %v4676_v6 }
 0x642   : > { %v4585_v44 = vpop.xlane.xlu0 %4584 }
 0x643   : > { %v4679_v33 = vsub.f32 %v10210_v4, %v4585_v44  ;;  %v4680_v49 = vsub.f32 %v10215_v47, %v4585_v44 }
 0x645   : > { %v4743_v7 = vmul.f32 1.442695, %v4679_v33  ;;  %v4745_v35 = vmul.f32 1.442695, %v4680_v49 }
 0x646   : > { %v4588_v0 = vpop.xlane.xlu0 %4587 }
 0x647   : > { %8367 = vpow2.f32 %v4743_v7  ;;  %v4681_v17 = vsub.f32 %v10222_v36, %v4588_v0  ;;  %v4682_v11 = vsub.f32 %v10224_v24, %v4588_v0 }
 0x648   : > { %8369 = vpow2.f32 %v4745_v35 }
 0x649   : > { %v4747_v30 = vmul.f32 1.442695, %v4681_v17  ;;  %v4749_v15 = vmul.f32 1.442695, %v4682_v11 }
 0x64a   : > { %v4591_v43 = vpop.xlane.xlu1 %4590 }
 0x64b   : > { %8371 = vpow2.f32 %v4747_v30  ;;  %v4683_v23 = vsub.f32 %v10234_v22, %v4591_v43  ;;  %v4684_v6 = vsub.f32 %v10239_v61, %v4591_v43 }
 0x64c   : > { %8373 = vpow2.f32 %v4749_v15 }
 0x64d   : > { %v4751_v4 = vmul.f32 1.442695, %v4683_v23  ;;  %v4753_v47 = vmul.f32 1.442695, %v4684_v6 }
 0x64e   : > { %v4594_v44 = vpop.xlane.xlu1 %4593 }
 0x64f   : > { %8375 = vpow2.f32 %v4751_v4  ;;  %v4685_v7 = vsub.f32 %v10246_v37, %v4594_v44  ;;  %v4686_v36 = vsub.f32 %v10248_v58, %v4594_v44 }
 0x650   : > { %8377 = vpow2.f32 %v4753_v47 }
 0x651   : > { %v10596_v24 = vpop.eup %8367  ;;  %v4755_v35 = vmul.f32 1.442695, %v4685_v7  ;;  %v4757_v17 = vmul.f32 1.442695, %v4686_v36 }
 0x652   : > { %v10598_v33 = vpop.eup %8369  ;;  %v4597_v49 = vpop.xlane.xlu0 %4596 }
 0x653   : > { %8379 = vpow2.f32 %v4755_v35  ;;  %v4687_v22 = vsub.f32 %v10258_v42, %v4597_v49  ;;  %v4688_v61 = vsub.f32 %v10260_v53, %v4597_v49  ;;  %v4871_v0 = vadd.f32 %v10598_v33, %v10596_v24 }
 0x654   : > { %8381 = vpow2.f32 %v4757_v17 }
 0x655   : > { %v10604_v37 = vpop.eup %8371  ;;  %v4759_v58 = vmul.f32 1.442695, %v4687_v22  ;;  %v4761_v11 = vmul.f32 1.442695, %v4688_v61  ;;  %4872 = vadd.xlane.f32.xlu0 %v4871_v0 }
 0x656   : > { %v10606_v30 = vpop.eup %8373  ;;  %v4600_v15 = vpop.xlane.xlu1 %4599 }
 0x657   : > { %8383 = vpow2.f32 %v4759_v58  ;;  %v4689_v43 = vsub.f32 %v10270_v14, %v4600_v15  ;;  %v4690_v23 = vsub.f32 %v10272_v27, %v4600_v15  ;;  %v4874_v42 = vadd.f32 %v10606_v30, %v10604_v37 }
 0x658   : > { %8385 = vpow2.f32 %v4761_v11 }
 0x659   : > { %v10612_v53 = vpop.eup %8375  ;;  %v4763_v6 = vmul.f32 1.442695, %v4689_v43  ;;  %v4765_v4 = vmul.f32 1.442695, %v4690_v23  ;;  %4875 = vadd.xlane.f32.xlu1 %v4874_v42 }
 0x65a   : > { %v10614_v47 = vpop.eup %8377  ;;  %v4603_v44 = vpop.xlane.xlu0 %4602 }
 0x65b   : > { %8387 = vpow2.f32 %v4763_v6  ;;  %v4691_v7 = vsub.f32 %v10282_v57, %v4603_v44  ;;  %v4692_v36 = vsub.f32 %v10284_v8, %v4603_v44  ;;  %v4877_v14 = vadd.f32 %v10614_v47, %v10612_v53 }
 0x65c   : > { %8389 = vpow2.f32 %v4765_v4 }
 0x65d   : > { %v10620_v27 = vpop.eup %8379  ;;  %v4767_v35 = vmul.f32 1.442695, %v4691_v7  ;;  %v4769_v17 = vmul.f32 1.442695, %v4692_v36  ;;  %4878 = vadd.xlane.f32.xlu0 %v4877_v14 }
 0x65e   : > { %v10622_v49 = vpop.eup %8381  ;;  %v4606_v22 = vpop.xlane.xlu1 %4605 }
 0x65f   : > { %8391 = vpow2.f32 %v4767_v35  ;;  %v4693_v61 = vsub.f32 %v10294_v12, %v4606_v22  ;;  %v4694_v0 = vsub.f32 %v10296_v45, %v4606_v22  ;;  %v4880_v57 = vadd.f32 %v10622_v49, %v10620_v27 }
 0x660   : > { %8393 = vpow2.f32 %v4769_v17 }
 0x661   : > { %v10628_v8 = vpop.eup %8383  ;;  %v4771_v58 = vmul.f32 1.442695, %v4693_v61  ;;  %v4773_v11 = vmul.f32 1.442695, %v4694_v0  ;;  %4881 = vadd.xlane.f32.xlu1 %v4880_v57 }
 0x662   : > { %v10630_v15 = vpop.eup %8385  ;;  %v4609_v43 = vpop.xlane.xlu0 %4608 }
 0x663   : > { %8395 = vpow2.f32 %v4771_v58  ;;  %v4695_v23 = vsub.f32 %v10306_v32, %v4609_v43  ;;  %v4696_v42 = vsub.f32 %v10308_v26, %v4609_v43  ;;  %v4883_v12 = vadd.f32 %v10630_v15, %v10628_v8 }
 0x664   : > { %8397 = vpow2.f32 %v4773_v11 }
 0x665   : > { %v10636_v45 = vpop.eup %8387  ;;  %v4775_v6 = vmul.f32 1.442695, %v4695_v23  ;;  %v4777_v4 = vmul.f32 1.442695, %v4696_v42  ;;  %4884 = vadd.xlane.f32.xlu0 %v4883_v12 }
 0x666   : > { %v10638_v44 = vpop.eup %8389  ;;  %v4612_v7 = vpop.xlane.xlu1 %4611 }
 0x667   : > { %8399 = vpow2.f32 %v4775_v6  ;;  %v4697_v36 = vsub.f32 %v10318_v29, %v4612_v7  ;;  %v4698_v14 = vsub.f32 %v10320_v46, %v4612_v7  ;;  %v4886_v32 = vadd.f32 %v10638_v44, %v10636_v45 }
 0x668   : > { %8401 = vpow2.f32 %v4777_v4 }
 0x669   : > { %v10644_v26 = vpop.eup %8391  ;;  %v4779_v35 = vmul.f32 1.442695, %v4697_v36  ;;  %v4781_v17 = vmul.f32 1.442695, %v4698_v14  ;;  %4887 = vadd.xlane.f32.xlu1 %v4886_v32 }
 0x66a   : > { %v10646_v22 = vpop.eup %8393  ;;  %v4615_v61 = vpop.xlane.xlu0 %4614 }
 0x66b   : > { %8403 = vpow2.f32 %v4779_v35  ;;  %v4699_v0 = vsub.f32 %v10330_v9, %v4615_v61  ;;  %v4700_v57 = vsub.f32 %v10332_v2, %v4615_v61  ;;  %v4889_v29 = vadd.f32 %v10646_v22, %v10644_v26 }
 0x66c   : > { %8405 = vpow2.f32 %v4781_v17 }
 0x66d   : > { %v10652_v46 = vpop.eup %8395  ;;  %v4783_v58 = vmul.f32 1.442695, %v4699_v0  ;;  %v4785_v11 = vmul.f32 1.442695, %v4700_v57  ;;  %4890 = vadd.xlane.f32.xlu0 %v4889_v29 }
 0x66e   : > { %v10654_v43 = vpop.eup %8397  ;;  %v4618_v23 = vpop.xlane.xlu1 %4617 }
 0x66f   : > { %8407 = vpow2.f32 %v4783_v58  ;;  %v4701_v42 = vsub.f32 %v10342_v40, %v4618_v23  ;;  %v4702_v12 = vsub.f32 %v10344_v3, %v4618_v23  ;;  %v4892_v9 = vadd.f32 %v10654_v43, %v10652_v46 }
 0x670   : > { %8409 = vpow2.f32 %v4785_v11 }
 0x671   : > { %v10660_v2 = vpop.eup %8399  ;;  %v4787_v6 = vmul.f32 1.442695, %v4701_v42  ;;  %v4789_v4 = vmul.f32 1.442695, %v4702_v12  ;;  %4893 = vadd.xlane.f32.xlu1 %v4892_v9 }
 0x672   : > { %v10662_v7 = vpop.eup %8401  ;;  %v4621_v36 = vpop.xlane.xlu0 %4620 }
 0x673   : > { %8411 = vpow2.f32 %v4787_v6  ;;  %v4703_v14 = vsub.f32 %v10354_v59, %v4621_v36  ;;  %v4704_v32 = vsub.f32 %v10356_v56, %v4621_v36  ;;  %v4895_v40 = vadd.f32 %v10662_v7, %v10660_v2 }
 0x674   : > { %8413 = vpow2.f32 %v4789_v4 }
 0x675   : > { %v10668_v3 = vpop.eup %8403  ;;  %v4791_v35 = vmul.f32 1.442695, %v4703_v14  ;;  %v4793_v17 = vmul.f32 1.442695, %v4704_v32  ;;  %4896 = vadd.xlane.f32.xlu0 %v4895_v40 }
 0x676   : > { %v10670_v61 = vpop.eup %8405  ;;  %v4624_v0 = vpop.xlane.xlu1 %4623 }
 0x677   : > { %8415 = vpow2.f32 %v4791_v35  ;;  %v4705_v57 = vsub.f32 %v10366_v13, %v4624_v0  ;;  %v4706_v29 = vsub.f32 %v10368_v52, %v4624_v0  ;;  %v4898_v59 = vadd.f32 %v10670_v61, %v10668_v3 }
 0x678   : > { %8417 = vpow2.f32 %v4793_v17 }
 0x679   : > { %v10676_v56 = vpop.eup %8407  ;;  %v4795_v58 = vmul.f32 1.442695, %v4705_v57  ;;  %v4797_v11 = vmul.f32 1.442695, %v4706_v29  ;;  %4899 = vadd.xlane.f32.xlu1 %v4898_v59 }
 0x67a   : > { %v10678_v23 = vpop.eup %8409  ;;  %v4627_v42 = vpop.xlane.xlu0 %4626 }
 0x67b   : > { %8419 = vpow2.f32 %v4795_v58  ;;  %v4707_v12 = vsub.f32 %v10378_v50, %v4627_v42  ;;  %v4708_v9 = vsub.f32 %v10380_v54, %v4627_v42  ;;  %v4901_v13 = vadd.f32 %v10678_v23, %v10676_v56 }
 0x67c   : > { %8421 = vpow2.f32 %v4797_v11 }
 0x67d   : > { %v10684_v52 = vpop.eup %8411  ;;  %v4799_v6 = vmul.f32 1.442695, %v4707_v12  ;;  %v4801_v4 = vmul.f32 1.442695, %v4708_v9  ;;  %4902 = vadd.xlane.f32.xlu0 %v4901_v13 }
 0x67e   : > { %v10686_v36 = vpop.eup %8413  ;;  %v4630_v14 = vpop.xlane.xlu1 %4629 }
 0x67f   : > { %8423 = vpow2.f32 %v4799_v6  ;;  %v4709_v32 = vsub.f32 %v10390_v16, %v4630_v14  ;;  %v4710_v40 = vsub.f32 %v10392_v19, %v4630_v14  ;;  %v4904_v50 = vadd.f32 %v10686_v36, %v10684_v52 }
 0x680   : > { %8425 = vpow2.f32 %v4801_v4 }
 0x681   : > { %v10692_v54 = vpop.eup %8415  ;;  %v4803_v35 = vmul.f32 1.442695, %v4709_v32  ;;  %v4805_v17 = vmul.f32 1.442695, %v4710_v40  ;;  %4905 = vadd.xlane.f32.xlu1 %v4904_v50 }
 0x682   : > { %v10694_v0 = vpop.eup %8417  ;;  %v4633_v57 = vpop.xlane.xlu0 %4632 }
 0x683   : > { %8427 = vpow2.f32 %v4803_v35  ;;  %v4711_v29 = vsub.f32 %v10402_v60, %v4633_v57  ;;  %v4712_v59 = vsub.f32 %v10404_v21, %v4633_v57  ;;  %v4907_v16 = vadd.f32 %v10694_v0, %v10692_v54 }
 0x684   : > { %8429 = vpow2.f32 %v4805_v17 }
 0x685   : > { %v10700_v19 = vpop.eup %8419  ;;  %v4807_v58 = vmul.f32 1.442695, %v4711_v29  ;;  %v4809_v11 = vmul.f32 1.442695, %v4712_v59  ;;  %4908 = vadd.xlane.f32.xlu0 %v4907_v16 }
 0x686   : > { %v10702_v42 = vpop.eup %8421  ;;  %v4636_v12 = vpop.xlane.xlu1 %4635 }
 0x687   : > { %8431 = vpow2.f32 %v4807_v58  ;;  %v4713_v9 = vsub.f32 %v10414_v18, %v4636_v12  ;;  %v4714_v13 = vsub.f32 %v10416_v1, %v4636_v12  ;;  %v4910_v60 = vadd.f32 %v10702_v42, %v10700_v19 }
 0x688   : > { %8433 = vpow2.f32 %v4809_v11 }
 0x689   : > { %v10708_v21 = vpop.eup %8423  ;;  %v4811_v6 = vmul.f32 1.442695, %v4713_v9  ;;  %v4813_v4 = vmul.f32 1.442695, %v4714_v13  ;;  %4911 = vadd.xlane.f32.xlu1 %v4910_v60 }
 0x68a   : > { %v10710_v14 = vpop.eup %8425  ;;  %v4639_v32 = vpop.xlane.xlu0 %4638 }
 0x68b   : > { %8435 = vpow2.f32 %v4811_v6  ;;  %v4715_v40 = vsub.f32 %v10426_v20, %v4639_v32  ;;  %v4716_v50 = vsub.f32 %v10428_v48, %v4639_v32  ;;  %v4913_v18 = vadd.f32 %v10710_v14, %v10708_v21 }
 0x68c   : > { %8437 = vpow2.f32 %v4813_v4 }
 0x68d   : > { %v10716_v1 = vpop.eup %8427  ;;  %v4815_v35 = vmul.f32 1.442695, %v4715_v40  ;;  %v4817_v17 = vmul.f32 1.442695, %v4716_v50  ;;  %4914 = vadd.xlane.f32.xlu0 %v4913_v18 }
 0x68e   : > { %v10718_v57 = vpop.eup %8429  ;;  %v4642_v29 = vpop.xlane.xlu1 %4641 }
 0x68f   : > { %8439 = vpow2.f32 %v4815_v35  ;;  %v4717_v59 = vsub.f32 %v10438_v25, %v4642_v29  ;;  %v4718_v16 = vsub.f32 %v10440_v41, %v4642_v29  ;;  %v4916_v20 = vadd.f32 %v10718_v57, %v10716_v1 }
 0x690   : > { %8441 = vpow2.f32 %v4817_v17 }
 0x691   : > { %v10724_v48 = vpop.eup %8431  ;;  %v4819_v58 = vmul.f32 1.442695, %v4717_v59  ;;  %v4821_v11 = vmul.f32 1.442695, %v4718_v16  ;;  %4917 = vadd.xlane.f32.xlu1 %v4916_v20 }
 0x692   : > { %v10726_v12 = vpop.eup %8433  ;;  %v4645_v9 = vpop.xlane.xlu0 %4644 }
 0x693   : > { %8443 = vpow2.f32 %v4819_v58  ;;  %v4719_v13 = vsub.f32 %v10450_v55, %v4645_v9  ;;  %v4720_v60 = vsub.f32 %v10452_v62, %v4645_v9  ;;  %v4919_v25 = vadd.f32 %v10726_v12, %v10724_v48 }
 0x694   : > { %8445 = vpow2.f32 %v4821_v11 }
 0x695   : > { %v10732_v41 = vpop.eup %8435  ;;  %v4823_v6 = vmul.f32 1.442695, %v4719_v13  ;;  %v4825_v4 = vmul.f32 1.442695, %v4720_v60  ;;  %4920 = vadd.xlane.f32.xlu0 %v4919_v25 }
 0x696   : > { %v10734_v32 = vpop.eup %8437  ;;  %v4648_v40 = vpop.xlane.xlu1 %4647 }
 0x697   : > { %8447 = vpow2.f32 %v4823_v6  ;;  %v4721_v50 = vsub.f32 %v10462_v34, %v4648_v40  ;;  %v4722_v18 = vsub.f32 %v10464_v38, %v4648_v40  ;;  %v4922_v55 = vadd.f32 %v10734_v32, %v10732_v41 }
 0x698   : > { %8449 = vpow2.f32 %v4825_v4 }
 0x699   : > { %v10740_v62 = vpop.eup %8439  ;;  %v4827_v35 = vmul.f32 1.442695, %v4721_v50  ;;  %v4829_v17 = vmul.f32 1.442695, %v4722_v18  ;;  %4923 = vadd.xlane.f32.xlu1 %v4922_v55  ;;  %v12662_v18 = vld [vmem:[#allocation32_spill] sm:$0xff] }
 0x69a   : > { %v10742_v29 = vpop.eup %8441  ;;  %v4651_v59 = vpop.xlane.xlu0 %4650 }
 0x69b   : > { %8451 = vpow2.f32 %v4827_v35  ;;  %v4723_v16 = vsub.f32 %v10474_v63, %v4651_v59  ;;  %v4724_v20 = vsub.f32 %v10476_v5, %v4651_v59  ;;  %v4925_v34 = vadd.f32 %v10742_v29, %v10740_v62  ;;  %v12663_v35 = vld [vmem:[#allocation33_spill] sm:$0xff] }
 0x69c   : > { %8453 = vpow2.f32 %v4829_v17 }
 0x69d   : > { %v10748_v38 = vpop.eup %8443  ;;  %v4831_v58 = vmul.f32 1.442695, %v4723_v16  ;;  %v4833_v11 = vmul.f32 1.442695, %v4724_v20  ;;  %4926 = vadd.xlane.f32.xlu0 %v4925_v34 }
 0x69e   : > { %v10750_v9 = vpop.eup %8445  ;;  %v4654_v13 = vpop.xlane.xlu1 %4653 }
 0x69f   : > { %8455 = vpow2.f32 %v4831_v58  ;;  %v4725_v60 = vsub.f32 %v10486_v10, %v4654_v13  ;;  %v4726_v25 = vsub.f32 %v10488_v51, %v4654_v13  ;;  %v4928_v63 = vadd.f32 %v10750_v9, %v10748_v38  ;;  %v12665_v58 = vld [vmem:[#allocation34_spill] sm:$0xff]  ;;  %v12666_v13 = vld [vmem:[#allocation35_spill] sm:$0xff] }
 0x6a0   : > { %8457 = vpow2.f32 %v4833_v11 }
 0x6a1   : > { %v10756_v5 = vpop.eup %8447  ;;  %v4835_v6 = vmul.f32 1.442695, %v4725_v60  ;;  %v4837_v4 = vmul.f32 1.442695, %v4726_v25  ;;  %4929 = vadd.xlane.f32.xlu1 %v4928_v63 }
 0x6a2   : > { %v10758_v40 = vpop.eup %8449  ;;  %v4657_v50 = vpop.xlane.xlu0 %4656 }
 0x6a3   : > { %8459 = vpow2.f32 %v4835_v6  ;;  %v4727_v55 = vsub.f32 %v12662_v18, %v4657_v50  ;;  %v4728_v17 = vsub.f32 %v12663_v35, %v4657_v50  ;;  %v4931_v10 = vadd.f32 %v10758_v40, %v10756_v5 }
 0x6a4   : > { %8461 = vpow2.f32 %v4837_v4 }
 0x6a5   : > { %v10764_v51 = vpop.eup %8451  ;;  %v4839_v59 = vmul.f32 1.442695, %v4727_v55  ;;  %v4841_v16 = vmul.f32 1.442695, %v4728_v17  ;;  %4932 = vadd.xlane.f32.xlu0 %v4931_v10  ;;  %v12669_v55 = vld [vmem:[#allocation37_spill] sm:$0xff]  ;;  %v12670_v17 = vld [vmem:[#allocation38_spill] sm:$0xff] }
 0x6a6   : > { %12664 = vst [vmem:[#allocation12_spill] sm:$0xff] %v10764_v51  ;;  %v10766_v20 = vpop.eup %8453  ;;  %v4660_v34 = vpop.xlane.xlu1 %4659 }
 0x6a7   : > { %8463 = vpow2.f32 %v4839_v59  ;;  %v4729_v11 = vsub.f32 %v12665_v58, %v4660_v34  ;;  %v4730_v60 = vsub.f32 %v12666_v13, %v4660_v34  ;;  %v4934_v25 = vadd.f32 %v10766_v20, %v10764_v51 }
 0x6a8   : > { %8465 = vpow2.f32 %v4841_v16 }
 0x6a9   : > { %v10772_v63 = vpop.eup %8455  ;;  %v4843_v6 = vmul.f32 1.442695, %v4729_v11  ;;  %v4845_v4 = vmul.f32 1.442695, %v4730_v60  ;;  %4935 = vadd.xlane.f32.xlu1 %v4934_v25  ;;  %v12673_v60 = vld [vmem:[#allocation39_spill] sm:$0xff] }
 0x6aa   : > { %12667 = vst [vmem:[#allocation13_spill] sm:$0xff] %v10772_v63  ;;  %v10774_v50 = vpop.eup %8457  ;;  %v4663_v18 = vpop.xlane.xlu0 %4662 }
 0x6ab   : > { %12668 = vst [vmem:[#allocation15_spill] sm:$0xff] %v10774_v50  ;;  %8467 = vpow2.f32 %v4843_v6  ;;  %v4731_v35 = vsub.f32 %v12669_v55, %v4663_v18  ;;  %v4732_v10 = vsub.f32 %v12670_v17, %v4663_v18  ;;  %v4937_v59 = vadd.f32 %v10774_v50, %v10772_v63  ;;  %v12674_v6 = vld [vmem:[#allocation6_spill] sm:$0xff] }
 0x6ac   : > { %8469 = vpow2.f32 %v4845_v4 }
 0x6ad   : > { %v10780_v34 = vpop.eup %8459  ;;  %v4847_v16 = vmul.f32 1.442695, %v4731_v35  ;;  %v4849_v58 = vmul.f32 1.442695, %v4732_v10  ;;  %4938 = vadd.xlane.f32.xlu0 %v4937_v59  ;;  %v12677_v59 = vld [vmem:[#allocation7_spill] sm:$0xff] }
 0x6ae   : > { %12671 = vst [vmem:[#allocation16_spill] sm:$0xff] %v10780_v34  ;;  %v10782_v11 = vpop.eup %8461  ;;  %v4666_v13 = vpop.xlane.xlu1 %4665 }
 0x6af   : > { %12672 = vst [vmem:[#allocation20_spill] sm:$0xff] %v10782_v11  ;;  %8471 = vpow2.f32 %v4847_v16  ;;  %v4733_v25 = vsub.f32 %v12673_v60, %v4666_v13  ;;  %v4734_v51 = vsub.f32 %v12674_v6, %v4666_v13  ;;  %v4940_v18 = vadd.f32 %v10782_v11, %v10780_v34  ;;  %v12678_v16 = vld [vmem:[#allocation8_spill] sm:$0xff] }
 0x6b0   : > { %8473 = vpow2.f32 %v4849_v58 }
 0x6b1   : > { %v10788_v55 = vpop.eup %8463  ;;  %v4851_v4 = vmul.f32 1.442695, %v4733_v25  ;;  %v4853_v17 = vmul.f32 1.442695, %v4734_v51  ;;  %4941 = vadd.xlane.f32.xlu1 %v4940_v18  ;;  %v12681_v18 = vld [vmem:[#allocation9_spill] sm:$0xff] }
 0x6b2   : > { %12675 = vst [vmem:[#allocation24_spill] sm:$0xff] %v10788_v55  ;;  %v10790_v35 = vpop.eup %8465  ;;  %v4669_v10 = vpop.xlane.xlu0 %4668 }
 0x6b3   : > { %12676 = vst [vmem:[#allocation27_spill] sm:$0xff] %v10790_v35  ;;  %8475 = vpow2.f32 %v4851_v4  ;;  %v4735_v63 = vsub.f32 %v12677_v59, %v4669_v10  ;;  %v4736_v50 = vsub.f32 %v12678_v16, %v4669_v10  ;;  %v4943_v13 = vadd.f32 %v10790_v35, %v10788_v55  ;;  %v12682_v4 = vld [vmem:[#allocation10_spill] sm:$0xff] }
 0x6b4   : > { %8477 = vpow2.f32 %v4853_v17 }
 0x6b5   : > { %v10796_v60 = vpop.eup %8467  ;;  %v4855_v58 = vmul.f32 1.442695, %v4735_v63  ;;  %v4857_v6 = vmul.f32 1.442695, %v4736_v50  ;;  %4944 = vadd.xlane.f32.xlu0 %v4943_v13 }
 0x6b6   : > { %12679 = vst [vmem:[#allocation30_spill] sm:$0xff] %v10796_v60  ;;  %v10798_v25 = vpop.eup %8469  ;;  %v4672_v51 = vpop.xlane.xlu1 %4671 }
 0x6b7   : > { %12680 = vst [vmem:[#allocation19_spill] sm:$0xff] %v10798_v25  ;;  %8479 = vpow2.f32 %v4855_v58  ;;  %v4737_v34 = vsub.f32 %v12681_v18, %v4672_v51  ;;  %v4738_v11 = vsub.f32 %v12682_v4, %v4672_v51  ;;  %v4946_v10 = vadd.f32 %v10798_v25, %v10796_v60  ;;  %v12685_v58 = vld [vmem:[#allocation11_spill] sm:$0xff] }
 0x6b8   : > { %8481 = vpow2.f32 %v4857_v6 }
 0x6b9   : > { %v10804_v59 = vpop.eup %8471  ;;  %v4859_v17 = vmul.f32 1.442695, %v4737_v34  ;;  %v4861_v16 = vmul.f32 1.442695, %v4738_v11  ;;  %4947 = vadd.xlane.f32.xlu1 %v4946_v10 }
 0x6ba   : > { %12683 = vst [vmem:[#allocation23_spill] sm:$0xff] %v10804_v59  ;;  %v10806_v63 = vpop.eup %8473  ;;  %v4675_v50 = vpop.xlane.xlu0 %4674 }
 0x6bb   : > { %12684 = vst [vmem:[#allocation14_spill] sm:$0xff] %v10806_v63  ;;  %8483 = vpow2.f32 %v4859_v17  ;;  %v4739_v13 = vsub.f32 %v10570_v28, %v4675_v50  ;;  %v4740_v55 = vsub.f32 %v12685_v58, %v4675_v50  ;;  %v4949_v51 = vadd.f32 %v10806_v63, %v10804_v59 }
 0x6bc   : > { %8485 = vpow2.f32 %v4861_v16 }
 0x6bd   : > { %v10812_v18 = vpop.eup %8475  ;;  %v4863_v6 = vmul.f32 1.442695, %v4739_v13  ;;  %v4865_v4 = vmul.f32 1.442695, %v4740_v55  ;;  %4950 = vadd.xlane.f32.xlu0 %v4949_v51 }
 0x6be   : > { %12686 = vst [vmem:[#allocation17_spill] sm:$0xff] %v10812_v18  ;;  %v10814_v34 = vpop.eup %8477  ;;  %v4678_v11 = vpop.xlane.xlu1 %4677 }
 0x6bf   : > { %12687 = vst [vmem:[#allocation18_spill] sm:$0xff] %v10814_v34  ;;  %8487 = vpow2.f32 %v4863_v6  ;;  %v4741_v10 = vsub.f32 %v10582_v39, %v4678_v11  ;;  %v4742_v17 = vsub.f32 %v10584_v31, %v4678_v11  ;;  %v4952_v28 = vadd.f32 %v10814_v34, %v10812_v18 }
 0x6c0   : > { %8489 = vpow2.f32 %v4865_v4 }
 0x6c1   : > { %v10820_v50 = vpop.eup %8479  ;;  %v4867_v16 = vmul.f32 1.442695, %v4741_v10  ;;  %v4869_v58 = vmul.f32 1.442695, %v4742_v17  ;;  %4953 = vadd.xlane.f32.xlu1 %v4952_v28 }
 0x6c2   : > { %12688 = vst [vmem:[#allocation25_spill] sm:$0xff] %v10820_v50  ;;  %v10822_v13 = vpop.eup %8481 }
 0x6c3   : > { %12689 = vst [vmem:[#allocation26_spill] sm:$0xff] %v10822_v13  ;;  %8491 = vpow2.f32 %v4867_v16  ;;  %v4955_v55 = vadd.f32 %v10822_v13, %v10820_v50 }
 0x6c4   : > { %8493 = vpow2.f32 %v4869_v58 }
 0x6c5   : > { %v10826_v51 = vpop.eup %8483  ;;  %4956 = vadd.xlane.f32.xlu0 %v4955_v55 }
 0x6c6   : > { %12690 = vst [vmem:[#allocation31_spill] sm:$0xff] %v10826_v51  ;;  %v10828_v39 = vpop.eup %8485 }
 0x6c7   : > { %12691 = vst [vmem:[#allocation36_spill] sm:$0xff] %v10828_v39  ;;  %v4958_v31 = vadd.f32 %v10828_v39, %v10826_v51 }
 0x6c9   : > { %v10832_v6 = vpop.eup %8487  ;;  %4959 = vadd.xlane.f32.xlu1 %v4958_v31 }
 0x6ca   : > { %12692 = vst [vmem:[#allocation21_spill] sm:$0xff] %v10832_v6  ;;  %v10834_v4 = vpop.eup %8489 }
 0x6cb   : > { %12693 = vst [vmem:[#allocation22_spill] sm:$0xff] %v10834_v4  ;;  %v4961_v11 = vadd.f32 %v10834_v4, %v10832_v6 }
 0x6cd   : > { %v10838_v10 = vpop.eup %8491  ;;  %4962 = vadd.xlane.f32.xlu0 %v4961_v11 }
 0x6ce   : > { %12694 = vst [vmem:[#allocation28_spill] sm:$0xff] %v10838_v10  ;;  %v10840_v17 = vpop.eup %8493 }
 0x6cf   : > { %12695 = vst [vmem:[#allocation29_spill] sm:$0xff] %v10840_v17  ;;  %v4964_v28 = vadd.f32 %v10840_v17, %v10838_v10 }
 0x6d1   : > { %4965 = vadd.xlane.f32.xlu1 %v4964_v28 }
 0x6e2   : > { %v4873_v16 = vpop.xlane.xlu0 %4872 }
 0x6e3   : > { %8495 = vrcp.f32 %v4873_v16 }
 0x6e6   : > { %v4876_v58 = vpop.xlane.xlu1 %4875 }
 0x6e7   : > { %8497 = vrcp.f32 %v4876_v58 }
 0x6ea   : > { %v4879_v55 = vpop.xlane.xlu0 %4878 }
 0x6eb   : > { %8499 = vrcp.f32 %v4879_v55 }
 0x6ed   : > { %v8496_v31 = vpop.eup %8495 }
 0x6ee   : > { %v4882_v51 = vpop.xlane.xlu1 %4881  ;;  %v4969_v6 = vmul.f32 %v8496_v31, %v10598_v33  ;;  %v4968_v4 = vmul.f32 %v8496_v31, %v10596_v24 }
 0x6ef   : > { %8501 = vrcp.f32 %v4882_v51 }
 0x6f0   : > { %v5159_v11 = vand.u32 4294901760, %v4969_v6  ;;  %v5161_v39 = vand.u32 4294901760, %v4968_v4 }
 0x6f1   : > { %v8498_v50 = vpop.eup %8497 }
 0x6f2   : > { %v4885_v13 = vpop.xlane.xlu0 %4884  ;;  %v4972_v28 = vmul.f32 %v8498_v50, %v10606_v30  ;;  %v10847_v10 = vsub.f32 %v4969_v6, %v5159_v11  ;;  %v4971_v16 = vmul.f32 %v8498_v50, %v10604_v37  ;;  %v10850_v58 = vsub.f32 %v4968_v4, %v5161_v39  ;;  %v5079_v4 = vld [vmem:[%s10857_s17 + $0x80] sm:$0xff] }
 0x6f3   : > { %8503 = vrcp.f32 %v4885_v13 }
 0x6f4   : > { %12696 = vst [vmem:[#allocation32_spill] sm:$0xff] %v10847_v10  ;;  %12697 = vst [vmem:[#allocation33_spill] sm:$0xff] %v10850_v58  ;;  %v5163_v55 = vand.u32 4294901760, %v4972_v28  ;;  %v5165_v17 = vand.u32 4294901760, %v4971_v16  ;;  %v5354_v24 = vand.u32 4294901760, %v10847_v10  ;;  %v5360_v33 = vand.u32 4294901760, %v10850_v58 }
 0x6f5   : > { %v8500_v30 = vpop.eup %8499 }
 0x6f6   : > { %v4888_v51 = vpop.xlane.xlu1 %4887  ;;  %v10861_v6 = vpack.c.bf16 %v5163_v55, %v5159_v11  ;;  %v10863_v37 = vsub.f32 %v4972_v28, %v5163_v55  ;;  %v10865_v50 = vpack.c.bf16 %v5165_v17, %v5161_v39  ;;  %v10867_v13 = vsub.f32 %v4971_v16, %v5165_v17 }
 0x6f7   : > { %8505 = vrcp.f32 %v4888_v51  ;;  %v4975_v31 = vmul.f32 %v8500_v30, %v10614_v47  ;;  %v4974_v18 = vmul.f32 %v8500_v30, %v10612_v53  ;;  %v5355_v34 = vsub.f32 %v10847_v10, %v5354_v24 }
 0x6f8   : > { %12698 = vst [vmem:[#allocation34_spill] sm:$0xff] %v10861_v6  ;;  %12699 = vst [vmem:[#allocation35_spill] sm:$0xff] %v10863_v37  ;;  %7389 = vmatprep.subr.bf16.mxu0 %v10861_v6  ;;  %v5366_v59 = vand.u32 4294901760, %v10863_v37  ;;  %v5361_v11 = vsub.f32 %v10850_v58, %v5360_v33  ;;  %v5372_v28 = vand.u32 4294901760, %v10867_v13 }
 0x6f9   : > { %12700 = vst [vmem:[#allocation37_spill] sm:$0xff] %v10865_v50  ;;  %12701 = vst [vmem:[#allocation38_spill] sm:$0xff] %v10867_v13  ;;  %v8502_v17 = vpop.eup %8501  ;;  %7391 = vmatpush1.bf16.msra.mxu0 %v10865_v50  ;;  %v5167_v47 = vand.u32 4294901760, %v4975_v31  ;;  %v5169_v16 = vand.u32 4294901760, %v4974_v18  ;;  %v5356_v53 = vand.u32 4294901760, %v5355_v34  ;;  %v5080_v50 = vld [vmem:[%s10857_s17 + $0x88] sm:$0xff] }
 0x6fa   : > { %v4891_v30 = vpop.xlane.xlu0 %4890  ;;  %5127 = vxpose.xlu0.b32.start [1/16] (narrow) %v5079_v4, 32  ;;  %v4978_v51 = vmul.f32 %v8502_v17, %v10622_v49  ;;  %v4977_v6 = vmul.f32 %v8502_v17, %v10620_v27  ;;  %v5367_v63 = vsub.f32 %v10863_v37, %v5366_v59  ;;  %v5362_v60 = vand.u32 4294901760, %v5361_v11 }
 0x6fb   : > { %8507 = vrcp.f32 %v4891_v30  ;;  %v10885_v39 = vsub.f32 %v4975_v31, %v5167_v47  ;;  %v10887_v10 = vsub.f32 %v4974_v18, %v5169_v16  ;;  %v5373_v34 = vsub.f32 %v10867_v13, %v5372_v28 }
 0x6fc   : > { %v5171_v25 = vand.u32 4294901760, %v4978_v51  ;;  %v5173_v55 = vand.u32 4294901760, %v4977_v6  ;;  %v5368_v58 = vand.u32 4294901760, %v5367_v63  ;;  %v10891_v4 = vpack.c.bf16 %v5366_v59, %v5354_v24  ;;  %v5081_v59 = vld [vmem:[%s10857_s17 + $0x90] sm:$0xff] }
 0x6fd   : > { %12702 = vst [vmem:[#allocation39_spill] sm:$0xff] %v10885_v39  ;;  %12703 = vst [vmem:[#allocation6_spill] sm:$0xff] %v10887_v10  ;;  %v8504_v49 = vpop.eup %8503  ;;  %v5374_v35 = vand.u32 4294901760, %v5373_v34  ;;  %v5378_v27 = vand.u32 4294901760, %v10885_v39  ;;  %v12289_v11 = vand.u32 4294901760, %v10887_v10  ;;  %v10895_v17 = vpack.c.bf16 %v5372_v28, %v5360_v33 }
 0x6fe   : > { %12704 = vst [vmem:[#allocation7_spill] sm:$0xff] %v10891_v4  ;;  %v4894_v31 = vpop.xlane.xlu1 %4893  ;;  %v10897_v18 = vpack.c.bf16 %v5171_v25, %v5167_v47  ;;  %v10899_v30 = vsub.f32 %v4978_v51, %v5171_v25  ;;  %v10901_v13 = vpack.c.bf16 %v5173_v55, %v5169_v16  ;;  %v10903_v37 = vsub.f32 %v4977_v6, %v5173_v55 }
 0x6ff   : > { %12705 = vst [vmem:[#allocation8_spill] sm:$0xff] %v10895_v17  ;;  %5128 = vxpose.xlu0.b32.cont [2/16] (narrow) %v5080_v50, 32  ;;  %8509 = vrcp.f32 %v4894_v31  ;;  %v4981_v63 = vmul.f32 %v8504_v49, %v10630_v15  ;;  %v4980_v24 = vmul.f32 %v8504_v49, %v10628_v8  ;;  %v10908_v34 = vpack.c.bf16 %v5368_v58, %v5356_v53  ;;  %v5063_v15 = vld [vmem:[%s10857_s17] sm:$0xff] }
 0x700   : > { %12706 = vst [vmem:[#allocation9_spill] sm:$0xff] %v10897_v18  ;;  %12707 = vst [vmem:[#allocation10_spill] sm:$0xff] %v10899_v30  ;;  %7393 = vmatprep.subr.bf16.mxu0 %v10897_v18  ;;  %v10911_v33 = vpack.c.bf16 %v5374_v35, %v5362_v60  ;;  %v5379_v25 = vsub.f32 %v10885_v39, %v5378_v27  ;;  %v5390_v28 = vand.u32 4294901760, %v10899_v30  ;;  %v12712_v4 = vand.u32 4294901760, %v10903_v37 }
 0x701   : > { %12708 = vst [vmem:[#allocation11_spill] sm:$0xff] %v10901_v13  ;;  %12709 = vst [vmem:[#allocation40_spill] sm:$0xff] %v10903_v37  ;;  %v5385_v6 = vsub.f32 %v10887_v10, %v12289_v11  ;;  %v8506_v50 = vpop.eup %8505  ;;  %7395 = vmatpush1.bf16.msra.mxu0 %v10901_v13  ;;  %v5175_v8 = vand.u32 4294901760, %v4981_v63  ;;  %v5177_v58 = vand.u32 4294901760, %v4980_v24  ;;  %v5082_v11 = vld [vmem:[%s10857_s17 + $0x98] sm:$0xff] }
 0x702   : > { %v4897_v60 = vpop.xlane.xlu0 %4896  ;;  %v4984_v16 = vmul.f32 %v8506_v50, %v10638_v44  ;;  %v4983_v53 = vmul.f32 %v8506_v50, %v10636_v45  ;;  %v5380_v55 = vand.u32 4294901760, %v5379_v25  ;;  %v5391_v51 = vsub.f32 %v10899_v30, %v5390_v28  ;;  %v5064_v25 = vld [vmem:[%s10857_s17 + $0x8] sm:$0xff]  ;;  %v5083_v50 = vld [vmem:[%s10857_s17 + $0xa0] sm:$0xff] }
 0x703   : > { %5129 = vxpose.xlu0.b32.cont [3/16] (narrow) %v5081_v59, 32  ;;  %8511 = vrcp.f32 %v4897_v60  ;;  %v10926_v49 = vsub.f32 %v4981_v63, %v5175_v8  ;;  %v10928_v31 = vsub.f32 %v4980_v24, %v5177_v58  ;;  %v5386_v47 = vand.u32 4294901760, %v5385_v6 }
 0x704   : > { %5095 = vxpose.xlu1.b32.start [1/16] (narrow) %v5063_v15, 32  ;;  %v5179_v17 = vand.u32 4294901760, %v4984_v16  ;;  %v5181_v35 = vand.u32 4294901760, %v4983_v53  ;;  %v5392_v59 = vand.u32 4294901760, %v5391_v51  ;;  %v5397_v44 = vsub.f32 %v10903_v37, %v12712_v4 }
 0x705   : > { %12710 = vst [vmem:[#allocation41_spill] sm:$0xff] %v10926_v49  ;;  %12711 = vst [vmem:[#allocation42_spill] sm:$0xff] %v10928_v31  ;;  %v8508_v45 = vpop.eup %8507  ;;  %v10939_v60 = vpack.c.bf16 %v5390_v28, %v5378_v27 }
 0x706   : > { %v4900_v6 = vpop.xlane.xlu1 %4899  ;;  %v10941_v15 = vpack.c.bf16 %v5179_v17, %v5175_v8  ;;  %v10943_v13 = vsub.f32 %v4984_v16, %v5179_v17  ;;  %v10945_v51 = vpack.c.bf16 %v5181_v35, %v5177_v58  ;;  %v10947_v4 = vsub.f32 %v4983_v53, %v5181_v35  ;;  %v5084_v8 = vld [vmem:[%s10857_s17 + $0xa8] sm:$0xff] }
 0x707   : > { %12713 = vst [vmem:[#allocation43_spill] sm:$0xff] %v10939_v60  ;;  %5130 = vxpose.xlu0.b32.cont [4/16] (narrow) %v5082_v11, 32  ;;  %8513 = vrcp.f32 %v4900_v6  ;;  %v4987_v63 = vmul.f32 %v8508_v45, %v10646_v22  ;;  %v4986_v18 = vmul.f32 %v8508_v45, %v10644_v26  ;;  %v10952_v24 = vpack.c.bf16 %v5392_v59, %v5380_v55  ;;  %v5065_v26 = vld [vmem:[%s10857_s17 + $0x10] sm:$0xff] }
 0x708   : > { %12714 = vst [vmem:[#allocation44_spill] sm:$0xff] %v10941_v15  ;;  %12715 = vst [vmem:[#allocation45_spill] sm:$0xff] %v10943_v13  ;;  %5096 = vxpose.xlu1.b32.cont [2/16] (narrow) %v5064_v25, 32  ;;  %7397 = vmatprep.subr.bf16.mxu0 %v10941_v15  ;;  %v5398_v27 = vand.u32 4294901760, %v5397_v44  ;;  %v12718_v17 = vand.u32 4294901760, %v10926_v49  ;;  %v12719_v11 = vand.u32 4294901760, %v10928_v31 }
 0x709   : > { %12716 = vst [vmem:[#allocation46_spill] sm:$0xff] %v10945_v51  ;;  %12717 = vst [vmem:[#allocation47_spill] sm:$0xff] %v10947_v4  ;;  %v8510_v35 = vpop.eup %8509  ;;  %7399 = vmatpush1.bf16.msra.mxu0 %v10945_v51  ;;  %v5183_v22 = vand.u32 4294901760, %v4987_v63  ;;  %v5185_v16 = vand.u32 4294901760, %v4986_v18  ;;  %v12722_v53 = vand.u32 4294901760, %v10943_v13 }
 0x70a   : > { %v5403_v28 = vsub.f32 %v10926_v49, %v12718_v17  ;;  %v5409_v58 = vsub.f32 %v10928_v31, %v12719_v11  ;;  %v4903_v59 = vpop.xlane.xlu0 %4902  ;;  %v4990_v44 = vmul.f32 %v8510_v35, %v10654_v43  ;;  %v4989_v45 = vmul.f32 %v8510_v35, %v10652_v46 }
 0x70b   : > { %5131 = vxpose.xlu0.b32.cont [5/16] (narrow) %v5083_v50, 32  ;;  %v10969_v25 = vpack.c.bf16 %v5398_v27, %v5386_v47  ;;  %8515 = vrcp.f32 %v4903_v59  ;;  %v10971_v17 = vsub.f32 %v4987_v63, %v5183_v22  ;;  %v10973_v11 = vsub.f32 %v4986_v18, %v5185_v16 }
 0x70c   : > { %v5404_v6 = vand.u32 4294901760, %v5403_v28  ;;  %v5415_v55 = vsub.f32 %v10943_v13, %v12722_v53  ;;  %5097 = vxpose.xlu1.b32.cont [3/16] (narrow) %v5065_v26, 32  ;;  %v5187_v50 = vand.u32 4294901760, %v4990_v44  ;;  %v5189_v60 = vand.u32 4294901760, %v4989_v45  ;;  %v5066_v28 = vld [vmem:[%s10857_s17 + $0x18] sm:$0xff] }
 0x70d   : > { %12720 = vst [vmem:[#allocation48_spill] sm:$0xff] %v10971_v17  ;;  %12721 = vst [vmem:[#allocation49_spill] sm:$0xff] %v10973_v11  ;;  %v5410_v43 = vand.u32 4294901760, %v5409_v58  ;;  %v12723_v46 = vand.u32 4294901760, %v10947_v4  ;;  %v8512_v27 = vpop.eup %8511 }
 0x70e   : > { %v5416_v63 = vand.u32 4294901760, %v5415_v55  ;;  %v4906_v53 = vpop.xlane.xlu1 %4905  ;;  %v10987_v26 = vpack.c.bf16 %v5187_v50, %v5183_v22  ;;  %v10989_v51 = vsub.f32 %v4990_v44, %v5187_v50  ;;  %v10991_v58 = vpack.c.bf16 %v5189_v60, %v5185_v16  ;;  %v5085_v55 = vld [vmem:[%s10857_s17 + $0xb0] sm:$0xff] }
 0x70f   : > { %v5421_v47 = vsub.f32 %v10947_v4, %v12723_v46  ;;  %v10993_v15 = vsub.f32 %v4989_v45, %v5189_v60  ;;  %5132 = vxpose.xlu0.b32.cont [6/16] (narrow) %v5084_v8, 32  ;;  %8517 = vrcp.f32 %v4906_v53  ;;  %v4993_v46 = vmul.f32 %v8512_v27, %v10662_v7 }
 0x710   : > { %12724 = vst [vmem:[#allocation50_spill] sm:$0xff] %v10987_v26  ;;  %12725 = vst [vmem:[#allocation51_spill] sm:$0xff] %v10989_v51  ;;  %v4992_v35 = vmul.f32 %v8512_v27, %v10660_v2  ;;  %v10998_v18 = vpack.c.bf16 %v5416_v63, %v5404_v6  ;;  %5098 = vxpose.xlu1.b32.cont [4/16] (narrow) %v5066_v28, 32  ;;  %7401 = vmatprep.subr.bf16.mxu0 %v10987_v26  ;;  %v12728_v44 = vand.u32 4294901760, %v10971_v17  ;;  %v5067_v2 = vld [vmem:[%s10857_s17 + $0x20] sm:$0xff] }
 0x711   : > { %12726 = vst [vmem:[#allocation52_spill] sm:$0xff] %v10991_v58  ;;  %12727 = vst [vmem:[#allocation53_spill] sm:$0xff] %v10993_v15  ;;  %v5422_v22 = vand.u32 4294901760, %v5421_v47  ;;  %v12729_v8 = vand.u32 4294901760, %v10973_v11  ;;  %v8514_v50 = vpop.eup %8513  ;;  %7403 = vmatpush1.bf16.msra.mxu0 %v10991_v58  ;;  %v5191_v7 = vand.u32 4294901760, %v4993_v46  ;;  %v5086_v58 = vld [vmem:[%s10857_s17 + $0xb8] sm:$0xff] }
 0x712   : > { %v5427_v16 = vsub.f32 %v10971_v17, %v12728_v44  ;;  %v5193_v6 = vand.u32 4294901760, %v4992_v35  ;;  %v4909_v28 = vpop.xlane.xlu0 %4908  ;;  %v4996_v63 = vmul.f32 %v8514_v50, %v10670_v61  ;;  %v4995_v53 = vmul.f32 %v8514_v50, %v10668_v3 }
 0x713   : > { %v5433_v45 = vsub.f32 %v10973_v11, %v12729_v8  ;;  %5133 = vxpose.xlu0.b32.cont [7/16] (narrow) %v5085_v55, 32  ;;  %v11015_v44 = vpack.c.bf16 %v5422_v22, %v5410_v43  ;;  %8519 = vrcp.f32 %v4909_v28  ;;  %v11017_v59 = vsub.f32 %v4993_v46, %v5191_v7 }
 0x714   : > { %v5428_v8 = vand.u32 4294901760, %v5427_v16  ;;  %v11019_v60 = vsub.f32 %v4992_v35, %v5193_v6  ;;  %v12732_v27 = vand.u32 4294901760, %v10989_v51  ;;  %5099 = vxpose.xlu1.b32.cont [5/16] (narrow) %v5067_v2, 32  ;;  %v5195_v55 = vand.u32 4294901760, %v4996_v63  ;;  %v5068_v16 = vld [vmem:[%s10857_s17 + $0x28] sm:$0xff] }
 0x715   : > { %12730 = vst [vmem:[#allocation54_spill] sm:$0xff] %v11017_v59  ;;  %v5197_v26 = vand.u32 4294901760, %v4995_v53  ;;  %v5434_v61 = vand.u32 4294901760, %v5433_v45  ;;  %v12733_v3 = vand.u32 4294901760, %v10993_v15  ;;  %v8516_v22 = vpop.eup %8515 }
 0x716   : > { %12731 = vst [vmem:[#allocation55_spill] sm:$0xff] %v11019_v60  ;;  %v5439_v47 = vsub.f32 %v10989_v51, %v12732_v27  ;;  %v4912_v27 = vpop.xlane.xlu1 %4911  ;;  %v11033_v2 = vpack.c.bf16 %v5195_v55, %v5191_v7  ;;  %v11035_v17 = vsub.f32 %v4996_v63, %v5195_v55  ;;  %v4998_v50 = vmul.f32 %v8516_v22, %v10676_v56  ;;  %v5069_v56 = vld [vmem:[%s10857_s17 + $0x30] sm:$0xff] }
 0x717   : > { %v5445_v43 = vsub.f32 %v10993_v15, %v12733_v3  ;;  %v11037_v45 = vpack.c.bf16 %v5197_v26, %v5193_v6  ;;  %v11039_v51 = vsub.f32 %v4995_v53, %v5197_v26  ;;  %5134 = vxpose.xlu0.b32.cont [8/16] (narrow) %v5086_v58, 32  ;;  %8521 = vrcp.f32 %v4912_v27 }
 0x718   : > { %v5440_v46 = vand.u32 4294901760, %v5439_v47  ;;  %12734 = vst [vmem:[#allocation56_spill] sm:$0xff] %v11033_v2  ;;  %12735 = vst [vmem:[#allocation57_spill] sm:$0xff] %v11035_v17  ;;  %v5087_v47 = vld [vmem:[%s10857_s17 + $0xc0] sm:$0xff]  ;;  %v4999_v3 = vmul.f32 %v8516_v22, %v10678_v23  ;;  %5100 = vxpose.xlu1.b32.cont [6/16] (narrow) %v5068_v16, 32  ;;  %7405 = vmatprep.subr.bf16.mxu0 %v11033_v2  ;;  %v12738_v63 = vand.u32 4294901760, %v11017_v59 }
 0x719   : > { %12736 = vst [vmem:[#allocation58_spill] sm:$0xff] %v11037_v45  ;;  %12737 = vst [vmem:[#allocation59_spill] sm:$0xff] %v11039_v51  ;;  %v5446_v7 = vand.u32 4294901760, %v5445_v43  ;;  %v12739_v58 = vand.u32 4294901760, %v11019_v60  ;;  %v8518_v55 = vpop.eup %8517  ;;  %7407 = vmatpush1.bf16.msra.mxu0 %v11037_v45  ;;  %v5088_v45 = vld [vmem:[%s10857_s17 + $0xc8] sm:$0xff]  ;;  %v12742_v22 = vand.u32 4294901760, %v11035_v17 }
 0x71a   : > { %v11044_v35 = vpack.c.bf16 %v5440_v46, %v5428_v8  ;;  %v5451_v6 = vsub.f32 %v11017_v59, %v12738_v63  ;;  %v5199_v23 = vand.u32 4294901760, %v4999_v3  ;;  %v5201_v8 = vand.u32 4294901760, %v4998_v50  ;;  %v4915_v16 = vpop.xlane.xlu0 %4914 }
 0x71b   : > { %v5457_v53 = vsub.f32 %v11019_v60, %v12739_v58  ;;  %5135 = vxpose.xlu0.b32.cont [9/16] (narrow) %v5087_v47, 32  ;;  %v5002_v46 = vmul.f32 %v8518_v55, %v10686_v36  ;;  %v5001_v27 = vmul.f32 %v8518_v55, %v10684_v52  ;;  %v11061_v63 = vpack.c.bf16 %v5446_v7, %v5434_v61 }
 0x71c   : > { %v5452_v58 = vand.u32 4294901760, %v5451_v6  ;;  %8523 = vrcp.f32 %v4915_v16  ;;  %v11063_v28 = vsub.f32 %v4999_v3, %v5199_v23  ;;  %v11065_v26 = vsub.f32 %v4998_v50, %v5201_v8  ;;  %5101 = vxpose.xlu1.b32.cont [7/16] (narrow) %v5069_v56, 32  ;;  %v5070_v6 = vld [vmem:[%s10857_s17 + $0x38] sm:$0xff] }
 0x71d   : > { %v5463_v43 = vsub.f32 %v11035_v17, %v12742_v22  ;;  %v5203_v47 = vand.u32 4294901760, %v5002_v46  ;;  %v5205_v2 = vand.u32 4294901760, %v5001_v27  ;;  %v5458_v36 = vand.u32 4294901760, %v5457_v53  ;;  %v8520_v7 = vpop.eup %8519 }
 0x71e   : > { %12740 = vst [vmem:[#allocation60_spill] sm:$0xff] %v11063_v28  ;;  %12741 = vst [vmem:[#allocation61_spill] sm:$0xff] %v11065_v26  ;;  %v12743_v52 = vand.u32 4294901760, %v11039_v51  ;;  %v4918_v22 = vpop.xlane.xlu1 %4917  ;;  %v5004_v55 = vmul.f32 %v8520_v7, %v10692_v54  ;;  %v5071_v54 = vld [vmem:[%s10857_s17 + $0x40] sm:$0xff] }
 0x71f   : > { %v5464_v3 = vand.u32 4294901760, %v5463_v43  ;;  %v11079_v56 = vpack.c.bf16 %v5203_v47, %v5199_v23  ;;  %v11081_v59 = vsub.f32 %v5002_v46, %v5203_v47  ;;  %v11083_v53 = vpack.c.bf16 %v5205_v2, %v5201_v8  ;;  %5136 = vxpose.xlu0.b32.cont [10/16] (narrow) %v5088_v45, 32  ;;  %v5089_v43 = vld [vmem:[%s10857_s17 + $0xd0] sm:$0xff] }
 0x720   : > { %v5469_v61 = vsub.f32 %v11039_v51, %v12743_v52  ;;  %v11085_v17 = vsub.f32 %v5001_v27, %v5205_v2  ;;  %8525 = vrcp.f32 %v4918_v22  ;;  %v5005_v52 = vmul.f32 %v8520_v7, %v10694_v0  ;;  %5102 = vxpose.xlu1.b32.cont [8/16] (narrow) %v5070_v6, 32 }
 0x721   : > { %12744 = vst [vmem:[#allocation62_spill] sm:$0xff] %v11079_v56  ;;  %12745 = vst [vmem:[#allocation63_spill] sm:$0xff] %v11081_v59  ;;  %v11090_v50 = vpack.c.bf16 %v5464_v3, %v5452_v58  ;;  %7409 = vmatprep.subr.bf16.mxu0 %v11079_v56  ;;  %v12748_v46 = vand.u32 4294901760, %v11063_v28  ;;  %v12749_v45 = vand.u32 4294901760, %v11065_v26  ;;  %v8522_v47 = vpop.eup %8521  ;;  %v5209_v58 = vand.u32 4294901760, %v5004_v55 }
 0x722   : > { %12746 = vst [vmem:[#allocation64_spill] sm:$0xff] %v11083_v53  ;;  %12747 = vst [vmem:[#allocation65_spill] sm:$0xff] %v11085_v17  ;;  %v5470_v23 = vand.u32 4294901760, %v5469_v61  ;;  %7411 = vmatpush1.bf16.msra.mxu0 %v11083_v53  ;;  %v5207_v0 = vand.u32 4294901760, %v5005_v52  ;;  %v4921_v6 = vpop.xlane.xlu0 %4920  ;;  %v5008_v3 = vmul.f32 %v8522_v47, %v10702_v42  ;;  %v5007_v22 = vmul.f32 %v8522_v47, %v10700_v19  ;;  %v5090_v53 = vld [vmem:[%s10857_s17 + $0xd8] sm:$0xff] }
 0x723   : > { %v5475_v8 = vsub.f32 %v11063_v28, %v12748_v46  ;;  %v5481_v27 = vsub.f32 %v11065_v26, %v12749_v45  ;;  %5137 = vxpose.xlu0.b32.cont [11/16] (narrow) %v5089_v43, 32  ;;  %8527 = vrcp.f32 %v4921_v6  ;;  %v11111_v2 = vsub.f32 %v5004_v55, %v5209_v58 }
 0x724   : > { %v11107_v46 = vpack.c.bf16 %v5470_v23, %v5458_v36  ;;  %v11109_v16 = vsub.f32 %v5005_v52, %v5207_v0  ;;  %v12752_v7 = vand.u32 4294901760, %v11081_v59  ;;  %5103 = vxpose.xlu1.b32.cont [9/16] (narrow) %v5071_v54, 32  ;;  %v5211_v43 = vand.u32 4294901760, %v5008_v3 }
 0x725   : > { %v5476_v45 = vand.u32 4294901760, %v5475_v8  ;;  %12751 = vst [vmem:[#allocation67_spill] sm:$0xff] %v11111_v2  ;;  %v5213_v56 = vand.u32 4294901760, %v5007_v22  ;;  %v5482_v42 = vand.u32 4294901760, %v5481_v27  ;;  %v12753_v19 = vand.u32 4294901760, %v11085_v17  ;;  %v5072_v8 = vld [vmem:[%s10857_s17 + $0x48] sm:$0xff] }
 0x726   : > { %12750 = vst [vmem:[#allocation66_spill] sm:$0xff] %v11109_v16  ;;  %v5487_v61 = vsub.f32 %v11081_v59, %v12752_v7  ;;  %v8524_v23 = vpop.eup %8523  ;;  %v4924_v7 = vpop.xlane.xlu1 %4923  ;;  %v11125_v54 = vpack.c.bf16 %v5211_v43, %v5207_v0  ;;  %v11127_v28 = vsub.f32 %v5008_v3, %v5211_v43  ;;  %v12758_v3 = vand.u32 4294901760, %v11109_v16 }
 0x727   : > { %v5493_v36 = vsub.f32 %v11085_v17, %v12753_v19  ;;  %v11129_v27 = vpack.c.bf16 %v5213_v56, %v5209_v58  ;;  %v11131_v59 = vsub.f32 %v5007_v22, %v5213_v56  ;;  %5138 = vxpose.xlu0.b32.cont [12/16] (narrow) %v5090_v53, 32  ;;  %8529 = vrcp.f32 %v4924_v7 }
 0x728   : > { %v5488_v52 = vand.u32 4294901760, %v5487_v61  ;;  %12754 = vst [vmem:[#allocation68_spill] sm:$0xff] %v11125_v54  ;;  %12755 = vst [vmem:[#allocation69_spill] sm:$0xff] %v11127_v28  ;;  %v5091_v61 = vld [vmem:[%s10857_s17 + $0xe0] sm:$0xff]  ;;  %v5011_v19 = vmul.f32 %v8524_v23, %v10710_v14  ;;  %v5010_v47 = vmul.f32 %v8524_v23, %v10708_v21  ;;  %5104 = vxpose.xlu1.b32.cont [10/16] (narrow) %v5072_v8, 32  ;;  %7413 = vmatprep.subr.bf16.mxu0 %v11125_v54  ;;  %v5073_v21 = vld [vmem:[%s10857_s17 + $0x50] sm:$0xff] }
 0x729   : > { %12756 = vst [vmem:[#allocation70_spill] sm:$0xff] %v11129_v27  ;;  %12757 = vst [vmem:[#allocation71_spill] sm:$0xff] %v11131_v59  ;;  %v5494_v0 = vand.u32 4294901760, %v5493_v36  ;;  %v5499_v58 = vsub.f32 %v11109_v16, %v12758_v3  ;;  %v12759_v53 = vand.u32 4294901760, %v11111_v2  ;;  %7415 = vmatpush1.bf16.msra.mxu0 %v11129_v27  ;;  %v5092_v27 = vld [vmem:[%s10857_s17 + $0xe8] sm:$0xff]  ;;  %v12762_v23 = vand.u32 4294901760, %v11127_v28 }
 0x72a   : > { %v11136_v55 = vpack.c.bf16 %v5488_v52, %v5476_v45  ;;  %v8526_v43 = vpop.eup %8525  ;;  %v5215_v14 = vand.u32 4294901760, %v5011_v19  ;;  %v5217_v45 = vand.u32 4294901760, %v5010_v47  ;;  %v4927_v8 = vpop.xlane.xlu0 %4926 }
 0x72b   : > { %v5505_v22 = vsub.f32 %v11111_v2, %v12759_v53  ;;  %5139 = vxpose.xlu0.b32.cont [13/16] (narrow) %v5091_v61, 32  ;;  %v5014_v52 = vmul.f32 %v8526_v43, %v10718_v57  ;;  %v5013_v7 = vmul.f32 %v8526_v43, %v10716_v1  ;;  %v11153_v3 = vpack.c.bf16 %v5494_v0, %v5482_v42 }
 0x72c   : > { %v5500_v53 = vand.u32 4294901760, %v5499_v58  ;;  %8531 = vrcp.f32 %v4927_v8  ;;  %v11155_v6 = vsub.f32 %v5011_v19, %v5215_v14  ;;  %v11157_v56 = vsub.f32 %v5010_v47, %v5217_v45  ;;  %5105 = vxpose.xlu1.b32.cont [11/16] (narrow) %v5073_v21, 32  ;;  %v5074_v58 = vld [vmem:[%s10857_s17 + $0x58] sm:$0xff] }
 0x72d   : > { %v5511_v36 = vsub.f32 %v11127_v28, %v12762_v23  ;;  %v5219_v61 = vand.u32 4294901760, %v5014_v52  ;;  %v5221_v54 = vand.u32 4294901760, %v5013_v7  ;;  %v5506_v57 = vand.u32 4294901760, %v5505_v22  ;;  %v8528_v0 = vpop.eup %8527 }
 0x72e   : > { %12760 = vst [vmem:[#allocation72_spill] sm:$0xff] %v11155_v6  ;;  %12761 = vst [vmem:[#allocation73_spill] sm:$0xff] %v11157_v56  ;;  %v12763_v1 = vand.u32 4294901760, %v11131_v59  ;;  %v4930_v23 = vpop.xlane.xlu1 %4929  ;;  %v5016_v43 = vmul.f32 %v8528_v0, %v10724_v48  ;;  %v5075_v48 = vld [vmem:[%s10857_s17 + $0x60] sm:$0xff] }
 0x72f   : > { %v5512_v19 = vand.u32 4294901760, %v5511_v36  ;;  %v11171_v21 = vpack.c.bf16 %v5219_v61, %v5215_v14  ;;  %v11173_v16 = vsub.f32 %v5014_v52, %v5219_v61  ;;  %v11175_v22 = vpack.c.bf16 %v5221_v54, %v5217_v45  ;;  %5140 = vxpose.xlu0.b32.cont [14/16] (narrow) %v5092_v27, 32  ;;  %v5093_v36 = vld [vmem:[%s10857_s17 + $0xf0] sm:$0xff] }
 0x730   : > { %v5517_v42 = vsub.f32 %v11131_v59, %v12763_v1  ;;  %v11177_v28 = vsub.f32 %v5013_v7, %v5221_v54  ;;  %8533 = vrcp.f32 %v4930_v23  ;;  %v5017_v1 = vmul.f32 %v8528_v0, %v10726_v12  ;;  %5106 = vxpose.xlu1.b32.cont [12/16] (narrow) %v5074_v58, 32 }
 0x731   : > { %12764 = vst [vmem:[#allocation74_spill] sm:$0xff] %v11171_v21  ;;  %12765 = vst [vmem:[#allocation75_spill] sm:$0xff] %v11173_v16  ;;  %v11182_v47 = vpack.c.bf16 %v5512_v19, %v5500_v53  ;;  %7417 = vmatprep.subr.bf16.mxu0 %v11171_v21  ;;  %v12769_v52 = vand.u32 4294901760, %v11155_v6  ;;  %v12770_v27 = vand.u32 4294901760, %v11157_v56  ;;  %v8530_v61 = vpop.eup %8529  ;;  %v5225_v53 = vand.u32 4294901760, %v5016_v43 }
 0x732   : > { %12766 = vst [vmem:[#allocation76_spill] sm:$0xff] %v11175_v22  ;;  %12767 = vst [vmem:[#allocation77_spill] sm:$0xff] %v11177_v28  ;;  %v5518_v14 = vand.u32 4294901760, %v5517_v42  ;;  %7419 = vmatpush1.bf16.msra.mxu0 %v11175_v22  ;;  %v5223_v12 = vand.u32 4294901760, %v5017_v1  ;;  %v4933_v58 = vpop.xlane.xlu0 %4932  ;;  %v5020_v19 = vmul.f32 %v8530_v61, %v10734_v32  ;;  %v5019_v23 = vmul.f32 %v8530_v61, %v10732_v41  ;;  %v5094_v22 = vld [vmem:[%s10857_s17 + $0xf8] sm:$0xff] }
 0x733   : > { %12768 = vst [vmem:[#allocation78_spill] sm:$0xff] %v11182_v47  ;;  %v5523_v45 = vsub.f32 %v11155_v6, %v12769_v52  ;;  %v5529_v7 = vsub.f32 %v11157_v56, %v12770_v27  ;;  %5141 = vxpose.xlu0.b32.cont [15/16] (narrow) %v5093_v36, 32  ;;  %8535 = vrcp.f32 %v4933_v58  ;;  %v11203_v54 = vsub.f32 %v5016_v43, %v5225_v53 }
 0x734   : > { %v11199_v52 = vpack.c.bf16 %v5518_v14, %v5506_v57  ;;  %v11201_v8 = vsub.f32 %v5017_v1, %v5223_v12  ;;  %v12772_v0 = vand.u32 4294901760, %v11173_v16  ;;  %5107 = vxpose.xlu1.b32.cont [13/16] (narrow) %v5075_v48, 32  ;;  %v5227_v36 = vand.u32 4294901760, %v5020_v19  ;;  %v5076_v14 = vld [vmem:[%s10857_s17 + $0x68] sm:$0xff] }
 0x735   : > { %v5524_v27 = vand.u32 4294901760, %v5523_v45  ;;  %v5229_v21 = vand.u32 4294901760, %v5019_v23  ;;  %v5530_v6 = vand.u32 4294901760, %v5529_v7  ;;  %v12773_v32 = vand.u32 4294901760, %v11177_v28 }
 0x736   : > { %12771 = vst [vmem:[#allocation79_spill] sm:$0xff] %v11199_v52  ;;  %v5535_v42 = vsub.f32 %v11173_v16, %v12772_v0  ;;  %v8532_v57 = vpop.eup %8531  ;;  %v12338_v1 = vand.u32 4294901760, %v11201_v8  ;;  %v4936_v58 = vpop.xlane.xlu1 %4935  ;;  %v11217_v0 = vpack.c.bf16 %v5227_v36, %v5223_v12  ;;  %v11219_v48 = vsub.f32 %v5020_v19, %v5227_v36 }
 0x737   : > { %v5541_v41 = vsub.f32 %v11177_v28, %v12773_v32  ;;  %v11221_v7 = vpack.c.bf16 %v5229_v21, %v5225_v53  ;;  %v11223_v16 = vsub.f32 %v5019_v23, %v5229_v21  ;;  %5142 = vxpose.xlu0.b32.end [16/16] (narrow) %v5094_v22, 32  ;;  %8537 = vrcp.f32 %v4936_v58 }
 0x738   : > { %v5536_v45 = vand.u32 4294901760, %v5535_v42  ;;  %12774 = vst [vmem:[#allocation80_spill] sm:$0xff] %v11217_v0  ;;  %v5023_v42 = vmul.f32 %v8532_v57, %v10742_v29  ;;  %v5022_v32 = vmul.f32 %v8532_v57, %v10740_v62  ;;  %5108 = vxpose.xlu1.b32.cont [14/16] (narrow) %v5076_v14, 32  ;;  %7421 = vmatprep.subr.bf16.mxu0 %v11217_v0  ;;  %v12343_v53 = vand.u32 4294901760, %v11219_v48  ;;  %v5077_v62 = vld [vmem:[%s10857_s17 + $0x70] sm:$0xff] }
 0x739   : > { %12775 = vst [vmem:[#allocation81_spill] sm:$0xff] %v11221_v7  ;;  %v5542_v12 = vand.u32 4294901760, %v5541_v41  ;;  %v5547_v19 = vsub.f32 %v11201_v8, %v12338_v1  ;;  %v12777_v21 = vand.u32 4294901760, %v11203_v54  ;;  %7423 = vmatpush1.bf16.msra.mxu0 %v11221_v7 }
 0x73a   : > { %v11227_v43 = vpack.c.bf16 %v5536_v45, %v5524_v27  ;;  %v8534_v23 = vpop.eup %8533  ;;  %v5231_v29 = vand.u32 4294901760, %v5023_v42  ;;  %v5233_v27 = vand.u32 4294901760, %v5022_v32  ;;  %v4939_v57 = vpop.xlane.xlu0 %4938  ;;  %v5559_v36 = vsub.f32 %v11219_v48, %v12343_v53 }
 0x73b   : > { %v5553_v22 = vsub.f32 %v11203_v54, %v12777_v21  ;;  %v5026_v14 = vmul.f32 %v8534_v23, %v10750_v9  ;;  %v5025_v45 = vmul.f32 %v8534_v23, %v10748_v38  ;;  %v11244_v58 = vpack.c.bf16 %v5542_v12, %v5530_v6  ;;  %v5078_v12 = vld [vmem:[%s10857_s17 + $0x78] sm:$0xff] }
 0x73c   : > { %12776 = vst [vmem:[#allocation82_spill] sm:$0xff] %v11227_v43  ;;  %v5548_v21 = vand.u32 4294901760, %v5547_v19  ;;  %8539 = vrcp.f32 %v4939_v57  ;;  %v11246_v61 = vsub.f32 %v5023_v42, %v5231_v29  ;;  %v11248_v1 = vsub.f32 %v5022_v32, %v5233_v27  ;;  %5109 = vxpose.xlu1.b32.cont [15/16] (narrow) %v5077_v62, 32 }
 0x73d   : > { %12778 = vst [vmem:[#allocation83_spill] sm:$0xff] %v11244_v58  ;;  %v5235_v41 = vand.u32 4294901760, %v5026_v14  ;;  %v5237_v7 = vand.u32 4294901760, %v5025_v45  ;;  %v5554_v0 = vand.u32 4294901760, %v5553_v22  ;;  %v12779_v9 = vand.u32 4294901760, %v11223_v16  ;;  %v8536_v6 = vpop.eup %8535  ;;  %v12842_v58 = vld [vmem:[#allocation21_spill] sm:$0xff] }
 0x73e   : > { %v5560_v19 = vand.u32 4294901760, %v5559_v36  ;;  %v12346_v32 = vand.u32 4294901760, %v11248_v1  ;;  %v4942_v57 = vpop.xlane.xlu1 %4941  ;;  %v5028_v36 = vmul.f32 %v8536_v6, %v10756_v5 }
 0x73f   : > { %v5565_v38 = vsub.f32 %v11223_v16, %v12779_v9  ;;  %v11261_v53 = vpack.c.bf16 %v5235_v41, %v5231_v29  ;;  %v11263_v62 = vsub.f32 %v5026_v14, %v5235_v41  ;;  %v11265_v22 = vpack.c.bf16 %v5237_v7, %v5233_v27 }
 0x740   : > { %v11267_v56 = vsub.f32 %v5025_v45, %v5237_v7  ;;  %8541 = vrcp.f32 %v4942_v57  ;;  %v5029_v9 = vmul.f32 %v8536_v6, %v10758_v40  ;;  %v11271_v42 = vpack.c.bf16 %v5560_v19, %v5548_v21  ;;  %5110 = vxpose.xlu1.b32.end [16/16] (narrow) %v5078_v12, 32  ;;  %v12784_v12 = vld [vmem:[#allocation12_spill] sm:$0xff] }
 0x741   : > { %12780 = vst [vmem:[#allocation84_spill] sm:$0xff] %v11261_v53  ;;  %12781 = vst [vmem:[#allocation85_spill] sm:$0xff] %v11265_v22  ;;  %7425 = vmatprep.subr.bf16.mxu0 %v11261_v53  ;;  %v5566_v23 = vand.u32 4294901760, %v5565_v38  ;;  %v12783_v29 = vand.u32 4294901760, %v11246_v61  ;;  %v5577_v7 = vsub.f32 %v11248_v1, %v12346_v32  ;;  %v8538_v14 = vpop.eup %8537  ;;  %v5241_v40 = vand.u32 4294901760, %v5028_v36 }
 0x742   : > { %12782 = vst [vmem:[#allocation86_spill] sm:$0xff] %v11271_v42  ;;  %7427 = vmatpush1.bf16.msra.mxu0 %v11265_v22  ;;  %v5239_v5 = vand.u32 4294901760, %v5029_v9  ;;  %v4945_v38 = vpop.xlane.xlu0 %4944  ;;  %v5032_v6 = vmul.f32 %v8538_v14, %v10766_v20  ;;  %v5031_v19 = vmul.f32 %v8538_v14, %v12784_v12  ;;  %v12786_v22 = vand.u32 4294901760, %v11263_v62  ;;  %v12841_v42 = vld [vmem:[#allocation22_spill] sm:$0xff] }
 0x743   : > { %v5571_v41 = vsub.f32 %v11246_v61, %v12783_v29  ;;  %v11287_v57 = vpack.c.bf16 %v5566_v23, %v5554_v0  ;;  %8543 = vrcp.f32 %v4945_v38  ;;  %v11291_v27 = vsub.f32 %v5028_v36, %v5241_v40 }
 0x744   : > { %v11289_v32 = vsub.f32 %v5029_v9, %v5239_v5  ;;  %v5583_v45 = vsub.f32 %v11263_v62, %v12786_v22  ;;  %v5243_v53 = vand.u32 4294901760, %v5032_v6  ;;  %v5245_v28 = vand.u32 4294901760, %v5031_v19 }
 0x745   : > { %12785 = vst [vmem:[#allocation12_spill] sm:$0xff] %v11287_v57  ;;  %v5572_v29 = vand.u32 4294901760, %v5571_v41  ;;  %v5578_v21 = vand.u32 4294901760, %v5577_v7  ;;  %v12787_v2 = vand.u32 4294901760, %v11267_v56 }
 0x746   : > { %v8540_v14 = vpop.eup %8539  ;;  %v5584_v0 = vand.u32 4294901760, %v5583_v45  ;;  %v4948_v41 = vpop.xlane.xlu1 %4947  ;;  %v11303_v38 = vpack.c.bf16 %v5243_v53, %v5239_v5  ;;  %v11305_v22 = vsub.f32 %v5032_v6, %v5243_v53  ;;  %v11307_v12 = vpack.c.bf16 %v5245_v28, %v5241_v40  ;;  %v12791_v45 = vld [vmem:[#allocation13_spill] sm:$0xff] }
 0x747   : > { %v5589_v20 = vsub.f32 %v11267_v56, %v12787_v2  ;;  %v11309_v7 = vsub.f32 %v5031_v19, %v5245_v28  ;;  %8545 = vrcp.f32 %v4948_v41  ;;  %v12790_v2 = vld [vmem:[#allocation15_spill] sm:$0xff]  ;;  %v5034_v26 = vmul.f32 %v8540_v14, %v12791_v45  ;;  %v12795_v41 = vld [vmem:[#allocation20_spill] sm:$0xff] }
 0x748   : > { %12788 = vst [vmem:[#allocation87_spill] sm:$0xff] %v11303_v38  ;;  %12789 = vst [vmem:[#allocation88_spill] sm:$0xff] %v11307_v12  ;;  %v5035_v59 = vmul.f32 %v8540_v14, %v12790_v2  ;;  %v11313_v23 = vpack.c.bf16 %v5584_v0, %v5572_v29  ;;  %7429 = vmatprep.subr.bf16.mxu0 %v11303_v38  ;;  %v12793_v36 = vand.u32 4294901760, %v11289_v32  ;;  %v12794_v40 = vand.u32 4294901760, %v11291_v27 }
 0x749   : > { %v5590_v9 = vand.u32 4294901760, %v5589_v20  ;;  %7431 = vmatpush1.bf16.msra.mxu0 %v11307_v12  ;;  %v5249_v14 = vand.u32 4294901760, %v5034_v26  ;;  %v12798_v12 = vand.u32 4294901760, %v11305_v22  ;;  %v12799_v11 = vand.u32 4294901760, %v11309_v7 }
 0x74a   : > { %12792 = vst [vmem:[#allocation15_spill] sm:$0xff] %v11313_v23  ;;  %v5595_v5 = vsub.f32 %v11289_v32, %v12793_v36  ;;  %v5601_v28 = vsub.f32 %v11291_v27, %v12794_v40  ;;  %v8542_v6 = vpop.eup %8541  ;;  %v5247_v19 = vand.u32 4294901760, %v5035_v59  ;;  %v4951_v0 = vpop.xlane.xlu0 %4950  ;;  %v12796_v36 = vld [vmem:[#allocation16_spill] sm:$0xff] }
 0x74b   : > { %v5038_v2 = vmul.f32 %v8542_v6, %v12795_v41  ;;  %v5037_v45 = vmul.f32 %v8542_v6, %v12796_v36  ;;  %v11329_v53 = vpack.c.bf16 %v5590_v9, %v5578_v21  ;;  %8547 = vrcp.f32 %v4951_v0 }
 0x74c   : > { %v5596_v38 = vand.u32 4294901760, %v5595_v5  ;;  %v11331_v40 = vsub.f32 %v5035_v59, %v5247_v19  ;;  %v11333_v17 = vsub.f32 %v5034_v26, %v5249_v14  ;;  %v5607_v29 = vsub.f32 %v11305_v22, %v12798_v12 }
 0x74d   : > { %12797 = vst [vmem:[#allocation13_spill] sm:$0xff] %v11329_v53  ;;  %v5251_v60 = vand.u32 4294901760, %v5038_v2  ;;  %v5253_v51 = vand.u32 4294901760, %v5037_v45  ;;  %v5602_v20 = vand.u32 4294901760, %v5601_v28  ;;  %v5613_v41 = vsub.f32 %v11309_v7, %v12799_v11  ;;  %v8544_v6 = vpop.eup %8543  ;;  %v12802_v11 = vld [vmem:[#allocation27_spill] sm:$0xff] }
 0x74e   : > { %v5608_v21 = vand.u32 4294901760, %v5607_v29  ;;  %v4954_v5 = vpop.xlane.xlu1 %4953  ;;  %v5041_v15 = vmul.f32 %v8544_v6, %v12802_v11  ;;  %v12803_v29 = vld [vmem:[#allocation24_spill] sm:$0xff]  ;;  %v12805_v26 = vand.u32 4294901760, %v11331_v40 }
 0x74f   : > { %v11345_v0 = vpack.c.bf16 %v5251_v60, %v5247_v19  ;;  %v11347_v12 = vsub.f32 %v5038_v2, %v5251_v60  ;;  %v11349_v36 = vpack.c.bf16 %v5253_v51, %v5249_v14  ;;  %v11351_v28 = vsub.f32 %v5037_v45, %v5253_v51 }
 0x750   : > { %8549 = vrcp.f32 %v4954_v5  ;;  %v5040_v31 = vmul.f32 %v8544_v6, %v12803_v29  ;;  %v11355_v9 = vpack.c.bf16 %v5608_v21, %v5596_v38  ;;  %v5614_v59 = vand.u32 4294901760, %v5613_v41  ;;  %v12807_v5 = vld [vmem:[#allocation19_spill] sm:$0xff] }
 0x751   : > { %12800 = vst [vmem:[#allocation20_spill] sm:$0xff] %v11345_v0  ;;  %12801 = vst [vmem:[#allocation16_spill] sm:$0xff] %v11349_v36  ;;  %7433 = vmatprep.subr.bf16.mxu0 %v11345_v0  ;;  %v5619_v19 = vsub.f32 %v11331_v40, %v12805_v26  ;;  %v12806_v14 = vand.u32 4294901760, %v11333_v17  ;;  %v8546_v2 = vpop.eup %8545  ;;  %v5255_v45 = vand.u32 4294901760, %v5041_v15  ;;  %v12808_v26 = vld [vmem:[#allocation30_spill] sm:$0xff]  ;;  %v12811_v10 = vand.u32 4294901760, %v11351_v28 }
 0x752   : > { %12804 = vst [vmem:[#allocation27_spill] sm:$0xff] %v11355_v9  ;;  %7435 = vmatpush1.bf16.msra.mxu0 %v11349_v36  ;;  %v5257_v6 = vand.u32 4294901760, %v5040_v31  ;;  %v4957_v21 = vpop.xlane.xlu0 %4956  ;;  %v5044_v11 = vmul.f32 %v8546_v2, %v12807_v5  ;;  %v5043_v29 = vmul.f32 %v8546_v2, %v12808_v26  ;;  %v11371_v60 = vpack.c.bf16 %v5614_v59, %v5602_v20 }
 0x753   : > { %v5625_v51 = vsub.f32 %v11333_v17, %v12806_v14  ;;  %v5620_v0 = vand.u32 4294901760, %v5619_v19  ;;  %8551 = vrcp.f32 %v4957_v21  ;;  %v11373_v14 = vsub.f32 %v5041_v15, %v5255_v45 }
 0x754   : > { %12809 = vst [vmem:[#allocation24_spill] sm:$0xff] %v11371_v60  ;;  %v11375_v4 = vsub.f32 %v5040_v31, %v5257_v6  ;;  %v12810_v36 = vand.u32 4294901760, %v11347_v12  ;;  %v5259_v49 = vand.u32 4294901760, %v5044_v11  ;;  %v5261_v13 = vand.u32 4294901760, %v5043_v29 }
 0x755   : > { %v5626_v41 = vand.u32 4294901760, %v5625_v51  ;;  %v5637_v5 = vsub.f32 %v11351_v28, %v12811_v10  ;;  %v8548_v2 = vpop.eup %8547  ;;  %v12814_v10 = vld [vmem:[#allocation14_spill] sm:$0xff]  ;;  %v12817_v31 = vand.u32 4294901760, %v11373_v14 }
 0x756   : > { %v5631_v38 = vsub.f32 %v11347_v12, %v12810_v36  ;;  %v4960_v19 = vpop.xlane.xlu1 %4959  ;;  %v11387_v21 = vpack.c.bf16 %v5259_v49, %v5255_v45  ;;  %v11389_v36 = vsub.f32 %v5044_v11, %v5259_v49  ;;  %v11391_v26 = vpack.c.bf16 %v5261_v13, %v5257_v6 }
 0x757   : > { %v11393_v51 = vsub.f32 %v5043_v29, %v5261_v13  ;;  %8553 = vrcp.f32 %v4960_v19  ;;  %v5047_v37 = vmul.f32 %v8548_v2, %v12814_v10  ;;  %v5638_v15 = vand.u32 4294901760, %v5637_v5  ;;  %v12819_v19 = vld [vmem:[#allocation18_spill] sm:$0xff] }
 0x758   : > { %v5632_v20 = vand.u32 4294901760, %v5631_v38  ;;  %12812 = vst [vmem:[#allocation19_spill] sm:$0xff] %v11387_v21  ;;  %12813 = vst [vmem:[#allocation30_spill] sm:$0xff] %v11391_v26  ;;  %v12815_v38 = vld [vmem:[#allocation23_spill] sm:$0xff]  ;;  %7437 = vmatprep.subr.bf16.mxu0 %v11387_v21  ;;  %v5643_v45 = vsub.f32 %v11373_v14, %v12817_v31  ;;  %v12818_v6 = vand.u32 4294901760, %v11375_v4  ;;  %v12820_v31 = vld [vmem:[#allocation17_spill] sm:$0xff] }
 0x759   : > { %v5046_v39 = vmul.f32 %v8548_v2, %v12815_v38  ;;  %7439 = vmatpush1.bf16.msra.mxu0 %v11391_v26  ;;  %v5263_v29 = vand.u32 4294901760, %v5047_v37  ;;  %v11413_v49 = vpack.c.bf16 %v5638_v15, %v5626_v41  ;;  %v12822_v26 = vand.u32 4294901760, %v11389_v36 }
 0x75a   : > { %v11397_v59 = vpack.c.bf16 %v5632_v20, %v5620_v0  ;;  %v5649_v13 = vsub.f32 %v11375_v4, %v12818_v6  ;;  %v8550_v11 = vpop.eup %8549  ;;  %v4963_v20 = vpop.xlane.xlu0 %4962  ;;  %v5644_v21 = vand.u32 4294901760, %v5643_v45  ;;  %v12823_v9 = vand.u32 4294901760, %v11393_v51 }
 0x75b   : > { %v5265_v2 = vand.u32 4294901760, %v5046_v39  ;;  %v5050_v10 = vmul.f32 %v8550_v11, %v12819_v19  ;;  %v5049_v38 = vmul.f32 %v8550_v11, %v12820_v31  ;;  %12821 = vst [vmem:[#allocation23_spill] sm:$0xff] %v11413_v49  ;;  %8555 = vrcp.f32 %v4963_v20 }
 0x75c   : > { %12816 = vst [vmem:[#allocation14_spill] sm:$0xff] %v11397_v59  ;;  %v11415_v6 = vsub.f32 %v5047_v37, %v5263_v29  ;;  %v5655_v0 = vsub.f32 %v11389_v36, %v12822_v26  ;;  %v5650_v5 = vand.u32 4294901760, %v5649_v13  ;;  %v5661_v19 = vsub.f32 %v11393_v51, %v12823_v9  ;;  %v12826_v9 = vld [vmem:[#allocation26_spill] sm:$0xff] }
 0x75d   : > { %v11417_v30 = vsub.f32 %v5046_v39, %v5265_v2  ;;  %v5267_v59 = vand.u32 4294901760, %v5050_v10  ;;  %v5269_v60 = vand.u32 4294901760, %v5049_v38  ;;  %v8552_v11 = vpop.eup %8551 }
 0x75e   : > { %v5656_v41 = vand.u32 4294901760, %v5655_v0  ;;  %v4966_v45 = vpop.xlane.xlu1 %4965  ;;  %v5053_v49 = vmul.f32 %v8552_v11, %v12826_v9  ;;  %v12827_v0 = vld [vmem:[#allocation25_spill] sm:$0xff]  ;;  %v5662_v37 = vand.u32 4294901760, %v5661_v19  ;;  %v12829_v39 = vand.u32 4294901760, %v11415_v6  ;;  %v12832_v9 = vld [vmem:[#allocation31_spill] sm:$0xff] }
 0x75f   : > { %v11429_v20 = vpack.c.bf16 %v5267_v59, %v5263_v29  ;;  %v11431_v26 = vsub.f32 %v5050_v10, %v5267_v59  ;;  %v11433_v31 = vpack.c.bf16 %v5269_v60, %v5265_v2  ;;  %v11435_v13 = vsub.f32 %v5049_v38, %v5269_v60 }
 0x760   : > { %8557 = vrcp.f32 %v4966_v45  ;;  %v5052_v53 = vmul.f32 %v8552_v11, %v12827_v0  ;;  %v11439_v15 = vpack.c.bf16 %v5656_v41, %v5644_v21  ;;  %v5667_v29 = vsub.f32 %v11415_v6, %v12829_v39  ;;  %v12831_v41 = vld [vmem:[#allocation36_spill] sm:$0xff] }
 0x761   : > { %12824 = vst [vmem:[#allocation18_spill] sm:$0xff] %v11429_v20  ;;  %12825 = vst [vmem:[#allocation17_spill] sm:$0xff] %v11433_v31  ;;  %7441 = vmatprep.subr.bf16.mxu0 %v11429_v20  ;;  %v12830_v2 = vand.u32 4294901760, %v11417_v30  ;;  %v8554_v10 = vpop.eup %8553  ;;  %v5271_v38 = vand.u32 4294901760, %v5053_v49  ;;  %v11455_v0 = vpack.c.bf16 %v5662_v37, %v5650_v5  ;;  %v12836_v57 = vand.u32 4294901760, %v11435_v13 }
 0x762   : > { %12828 = vst [vmem:[#allocation26_spill] sm:$0xff] %v11439_v15  ;;  %7443 = vmatpush1.bf16.msra.mxu0 %v11433_v31  ;;  %v5273_v11 = vand.u32 4294901760, %v5052_v53  ;;  %v5056_v45 = vmul.f32 %v8554_v10, %v12831_v41  ;;  %v5055_v39 = vmul.f32 %v8554_v10, %v12832_v9  ;;  %v12835_v31 = vand.u32 4294901760, %v11431_v26 }
 0x763   : > { %v5673_v60 = vsub.f32 %v11417_v30, %v12830_v2  ;;  %12833 = vst [vmem:[#allocation25_spill] sm:$0xff] %v11455_v0  ;;  %v11457_v59 = vsub.f32 %v5053_v49, %v5271_v38  ;;  %v5668_v2 = vand.u32 4294901760, %v5667_v29  ;;  %v5685_v19 = vsub.f32 %v11435_v13, %v12836_v57 }
 0x764   : > { %v11459_v20 = vsub.f32 %v5052_v53, %v5273_v11  ;;  %v5679_v15 = vsub.f32 %v11431_v26, %v12835_v31  ;;  %v5275_v23 = vand.u32 4294901760, %v5056_v45  ;;  %v5277_v21 = vand.u32 4294901760, %v5055_v39 }
 0x765   : > { %v8556_v5 = vpop.eup %8555  ;;  %v5674_v49 = vand.u32 4294901760, %v5673_v60  ;;  %v12399_v53 = vand.u32 4294901760, %v11457_v59 }
 0x766   : > { %12834 = vst [vmem:[#allocation36_spill] sm:$0xff] %v11459_v20  ;;  %v5680_v37 = vand.u32 4294901760, %v5679_v15  ;;  %v12402_v29 = vand.u32 4294901760, %v11459_v20  ;;  %v11471_v41 = vpack.c.bf16 %v5275_v23, %v5271_v38  ;;  %v11473_v9 = vsub.f32 %v5056_v45, %v5275_v23 }
 0x767   : > { %v11475_v31 = vpack.c.bf16 %v5277_v21, %v5273_v11  ;;  %v11477_v0 = vsub.f32 %v5055_v39, %v5277_v21  ;;  %v5059_v57 = vmul.f32 %v8556_v5, %v12841_v42  ;;  %v5058_v43 = vmul.f32 %v8556_v5, %v12842_v58  ;;  %v12845_v39 = vld [vmem:[#allocation29_spill] sm:$0xff]  ;;  %v12846_v5 = vld [vmem:[#allocation28_spill] sm:$0xff] }
 0x768   : > { %12837 = vst [vmem:[#allocation31_spill] sm:$0xff] %v11471_v41  ;;  %12838 = vst [vmem:[#allocation89_spill] sm:$0xff] %v11473_v9  ;;  %v11481_v10 = vpack.c.bf16 %v5680_v37, %v5668_v2  ;;  %v5686_v15 = vand.u32 4294901760, %v5685_v19  ;;  %7445 = vmatprep.subr.bf16.mxu0 %v11471_v41  ;;  %v5691_v60 = vsub.f32 %v11457_v59, %v12399_v53  ;;  %v5702_v23 = vand.u32 4294901760, %v11473_v9 }
 0x769   : > { %12839 = vst [vmem:[#allocation90_spill] sm:$0xff] %v11475_v31  ;;  %12840 = vst [vmem:[#allocation91_spill] sm:$0xff] %v11477_v0  ;;  %v5697_v38 = vsub.f32 %v11459_v20, %v12402_v29  ;;  %v5708_v11 = vand.u32 4294901760, %v11477_v0  ;;  %7447 = vmatpush1.bf16.msra.mxu0 %v11475_v31  ;;  %v5279_v58 = vand.u32 4294901760, %v5059_v57  ;;  %v5281_v21 = vand.u32 4294901760, %v5058_v43 }
 0x76a   : > { %12843 = vst [vmem:[#allocation22_spill] sm:$0xff] %v11481_v10  ;;  %v8558_v42 = vpop.eup %8557  ;;  %v11493_v19 = vpack.c.bf16 %v5686_v15, %v5674_v49  ;;  %v5703_v53 = vsub.f32 %v11473_v9, %v5702_v23  ;;  %v5692_v10 = vand.u32 4294901760, %v5691_v60 }
 0x76b   : > { %v5062_v2 = vmul.f32 %v8558_v42, %v12845_v39  ;;  %v5061_v37 = vmul.f32 %v8558_v42, %v12846_v5  ;;  %v11500_v41 = vsub.f32 %v5059_v57, %v5279_v58  ;;  %v11502_v29 = vsub.f32 %v5058_v43, %v5281_v21 }
 0x76c   : > { %12844 = vst [vmem:[#allocation21_spill] sm:$0xff] %v11493_v19  ;;  %v5709_v31 = vsub.f32 %v11477_v0, %v5708_v11  ;;  %v5704_v49 = vand.u32 4294901760, %v5703_v53  ;;  %v5698_v45 = vand.u32 4294901760, %v5697_v38 }
 0x76d   : > { %12847 = vst [vmem:[#allocation29_spill] sm:$0xff] %v11500_v41  ;;  %12848 = vst [vmem:[#allocation28_spill] sm:$0xff] %v11502_v29  ;;  %v5283_v52 = vand.u32 4294901760, %v5062_v2  ;;  %v5285_v47 = vand.u32 4294901760, %v5061_v37  ;;  %v5714_v39 = vand.u32 4294901760, %v11500_v41  ;;  %v5720_v42 = vand.u32 4294901760, %v11502_v29 }
 0x76e   : > { %v5710_v19 = vand.u32 4294901760, %v5709_v31  ;;  %v11517_v9 = vpack.c.bf16 %v5704_v49, %v5692_v10  ;;  %v12853_v49 = vand.u32 4294901760, %v11201_v8 }
 0x76f   : > { %v11509_v5 = vpack.c.bf16 %v5283_v52, %v5279_v58  ;;  %v11511_v57 = vsub.f32 %v5062_v2, %v5283_v52  ;;  %v11513_v43 = vpack.c.bf16 %v5285_v47, %v5281_v21  ;;  %v11515_v60 = vsub.f32 %v5061_v37, %v5285_v47 }
 0x770   : > { %v11519_v53 = vpack.c.bf16 %v5710_v19, %v5698_v45  ;;  %v5715_v15 = vsub.f32 %v11500_v41, %v5714_v39  ;;  %v5721_v31 = vsub.f32 %v11502_v29, %v5720_v42  ;;  %v12856_v47 = vand.u32 4294901760, %v11203_v54 }
 0x771   : > { %12849 = vst [vmem:[#allocation92_spill] sm:$0xff] %v11509_v5  ;;  %12850 = vst [vmem:[#allocation93_spill] sm:$0xff] %v11511_v57  ;;  %7449 = vmatprep.subr.bf16.mxu0 %v11509_v5  ;;  %v5726_v38 = vand.u32 4294901760, %v11511_v57  ;;  %v5732_v58 = vand.u32 4294901760, %v11515_v60  ;;  %v12854_v5 = vand.u32 4294901760, %v11219_v48 }
 0x772   : > { %12851 = vst [vmem:[#allocation94_spill] sm:$0xff] %v11513_v43  ;;  %12852 = vst [vmem:[#allocation95_spill] sm:$0xff] %v11515_v60  ;;  %7451 = vmatpush1.bf16.msra.mxu0 %v11513_v43  ;;  %v5716_v19 = vand.u32 4294901760, %v5715_v15  ;;  %v5722_v2 = vand.u32 4294901760, %v5721_v31  ;;  %v12857_v43 = vand.u32 4294901760, %v11223_v16 }
 0x773   : > { %7453 = vmatprep.subr.bf16.mxu0 %v10908_v34  ;;  %v5727_v10 = vsub.f32 %v11511_v57, %v5726_v38  ;;  %v5733_v21 = vsub.f32 %v11515_v60, %v5732_v58  ;;  %v11538_v52 = vpack.c.bf16 %v12854_v5, %v12853_v49  ;;  %v12859_v34 = vand.u32 4294901760, %v11246_v61 }
 0x774   : > { %v11544_v29 = vpack.c.bf16 %v12857_v43, %v12856_v47  ;;  %v12860_v60 = vand.u32 4294901760, %v11263_v62  ;;  %v12863_v5 = vand.u32 4294901760, %v11267_v56  ;;  %v12866_v43 = vand.u32 4294901760, %v11305_v22 }
 0x775   : > { %v5728_v45 = vand.u32 4294901760, %v5727_v10  ;;  %v5734_v37 = vand.u32 4294901760, %v5733_v21  ;;  %12855 = vst [vmem:[#allocation96_spill] sm:$0xff] %v11538_v52  ;;  %v12862_v21 = vand.u32 4294901760, %v11248_v1  ;;  %v12865_v52 = vand.u32 4294901760, %v11289_v32 }
 0x776   : > { %12858 = vst [vmem:[#allocation97_spill] sm:$0xff] %v11544_v29  ;;  %v11550_v15 = vpack.c.bf16 %v12860_v60, %v12859_v34  ;;  %v12868_v29 = vand.u32 4294901760, %v11291_v27  ;;  %v12869_v60 = vand.u32 4294901760, %v11309_v7  ;;  %v12874_v34 = vand.u32 4294901760, %v11333_v17 }
 0x777   : > { %v11552_v31 = vpack.c.bf16 %v5728_v45, %v5716_v19  ;;  %v11554_v10 = vpack.c.bf16 %v5734_v37, %v5722_v2  ;;  %v11560_v49 = vpack.c.bf16 %v12863_v5, %v12862_v21  ;;  %v11566_v47 = vpack.c.bf16 %v12866_v43, %v12865_v52 }
 0x778   : > { %12861 = vst [vmem:[#allocation98_spill] sm:$0xff] %v11550_v15  ;;  %v11572_v19 = vpack.c.bf16 %v12869_v60, %v12868_v29  ;;  %v12871_v45 = vand.u32 4294901760, %v11331_v40  ;;  %v12872_v2 = vand.u32 4294901760, %v11347_v12  ;;  %v12875_v21 = vand.u32 4294901760, %v11351_v28 }
 0x779   : > { %12864 = vst [vmem:[#allocation99_spill] sm:$0xff] %v11560_v49  ;;  %12867 = vst [vmem:[#allocation100_spill] sm:$0xff] %v11566_v47  ;;  %v12877_v52 = vand.u32 4294901760, %v11373_v14  ;;  %v12878_v43 = vand.u32 4294901760, %v11389_v36  ;;  %v12880_v29 = vand.u32 4294901760, %v11375_v4  ;;  %v12881_v60 = vand.u32 4294901760, %v11393_v51 }
 0x77a   : > { %12870 = vst [vmem:[#allocation101_spill] sm:$0xff] %v11572_v19  ;;  %v11578_v37 = vpack.c.bf16 %v12872_v2, %v12871_v45  ;;  %v11584_v5 = vpack.c.bf16 %v12875_v21, %v12874_v34  ;;  %v12883_v45 = vand.u32 4294901760, %v11415_v6  ;;  %v12884_v2 = vand.u32 4294901760, %v11431_v26 }
 0x77b   : > { %v11590_v47 = vpack.c.bf16 %v12878_v43, %v12877_v52  ;;  %v11596_v19 = vpack.c.bf16 %v12881_v60, %v12880_v29  ;;  %v12886_v34 = vand.u32 4294901760, %v11417_v30  ;;  %v12887_v21 = vand.u32 4294901760, %v11435_v13 }
 0x77c   : > { %12873 = vst [vmem:[#allocation102_spill] sm:$0xff] %v11578_v37  ;;  %12876 = vst [vmem:[#allocation103_spill] sm:$0xff] %v11584_v5  ;;  %v11602_v37 = vpack.c.bf16 %v12884_v2, %v12883_v45  ;;  %v12889_v52 = vand.u32 4294901760, %v11457_v59  ;;  %v11618_v60 = vpack.c.bf16 %v5726_v38, %v5714_v39  ;;  %v5143_v45 = vpop.trf.xlu0 }
 0x77d   : > { %12879 = vst [vmem:[#allocation104_spill] sm:$0xff] %v11590_v47  ;;  %12882 = vst [vmem:[#allocation105_spill] sm:$0xff] %v11596_v19  ;;  %v11608_v5 = vpack.c.bf16 %v12887_v21, %v12886_v34  ;;  %v12891_v47 = vand.u32 4294901760, %v11459_v20  ;;  %v11620_v19 = vpack.c.bf16 %v5732_v58, %v5720_v42  ;;  %v11622_v2 = vand.u32 4294901760, %v5143_v45 }
 0x77e   : > { %12885 = vst [vmem:[#allocation106_spill] sm:$0xff] %v11602_v37  ;;  %v11612_v43 = vpack.c.bf16 %v5702_v23, %v12889_v52  ;;  %12893 = vst [vmem:[#allocation110_spill] sm:$0xff] %v11618_v60 }
 0x77f   : > { %12888 = vst [vmem:[#allocation107_spill] sm:$0xff] %v11608_v5  ;;  %v11616_v29 = vpack.c.bf16 %v5708_v11, %v12891_v47  ;;  %12894 = vst [vmem:[#allocation111_spill] sm:$0xff] %v11620_v19  ;;  %v11625_v37 = vsub.f32 %v5143_v45, %v11622_v2 }
 0x780   : > { %12890 = vst [vmem:[#allocation108_spill] sm:$0xff] %v11612_v43  ;;  %v5144_v34 = vpop.trf.xlu0 }
 0x781   : > { %12892 = vst [vmem:[#allocation109_spill] sm:$0xff] %v11616_v29  ;;  %v12412_v21 = vand.u32 4294901760, %v11625_v37  ;;  %v11628_v5 = vand.u32 4294901760, %v5144_v34 }
 0x783   : > { %12895 = vst [vmem:[#allocation112_spill] sm:$0xff] %v11628_v5  ;;  %v11631_v23 = vsub.f32 %v5144_v34, %v11628_v5  ;;  %v5290_v11 = vsub.f32 %v11625_v37, %v12412_v21 }
 0x784   : > { %v5145_v39 = vpop.trf.xlu0  ;;  %v5111_v58 = vpop.trf.xlu1 }
 0x785   : > { %12896 = vst [vmem:[#allocation113_spill] sm:$0xff] %v11631_v23  ;;  %v5291_v42 = vand.u32 4294901760, %v5290_v11  ;;  %v11636_v38 = vand.u32 4294901760, %v5145_v39  ;;  %v12414_v47 = vand.u32 4294901760, %v11631_v23  ;;  %v11639_v52 = vand.u32 4294901760, %v5111_v58 }
 0x787   : > { %12897 = vst [vmem:[#allocation114_spill] sm:$0xff] %v11636_v38  ;;  %12898 = vst [vmem:[#allocation115_spill] sm:$0xff] %v11639_v52  ;;  %5292 = vmatprep.mubr.f32.mxu0 %v5291_v42  ;;  %v11642_v45 = vsub.f32 %v5145_v39, %v11636_v38  ;;  %v11645_v34 = vsub.f32 %v5111_v58, %v11639_v52  ;;  %v5306_v29 = vsub.f32 %v11631_v23, %v12414_v47 }
 0x788   : > { %v5146_v19 = vpop.trf.xlu0  ;;  %v5112_v21 = vpop.trf.xlu1 }
 0x789   : > { %12899 = vst [vmem:[#allocation116_spill] sm:$0xff] %v11642_v45  ;;  %v11647_v60 = vand.u32 4294901760, %v5146_v19  ;;  %v12420_v43 = vand.u32 4294901760, %v11645_v34  ;;  %v11654_v49 = vand.u32 4294901760, %v5112_v21  ;;  %v5307_v41 = vand.u32 4294901760, %v5306_v29 }
 0x78a   : > { %v12902_v47 = vand.u32 4294901760, %v11642_v45 }
 0x78b   : > { %12900 = vst [vmem:[#allocation117_spill] sm:$0xff] %v11647_v60  ;;  %12901 = vst [vmem:[#allocation118_spill] sm:$0xff] %v11654_v49  ;;  %v11657_v39 = vsub.f32 %v5146_v19, %v11647_v60  ;;  %v5296_v42 = vsub.f32 %v11645_v34, %v12420_v43  ;;  %v11663_v58 = vsub.f32 %v5112_v21, %v11654_v49 }
 0x78c   : > { %v5113_v15 = vpop.trf.xlu1  ;;  %v5322_v23 = vsub.f32 %v11642_v45, %v12902_v47 }
 0x78d   : > { %v12424_v11 = vand.u32 4294901760, %v11657_v39  ;;  %v5297_v57 = vand.u32 4294901760, %v5296_v42  ;;  %v12426_v20 = vand.u32 4294901760, %v11663_v58  ;;  %v11670_v19 = vand.u32 4294901760, %v5113_v15 }
 0x78e   : > { %v5323_v43 = vand.u32 4294901760, %v5322_v23 }
 0x78f   : > { %12903 = vst [vmem:[#allocation119_spill] sm:$0xff] %v11670_v19  ;;  %v11673_v0 = vsub.f32 %v5113_v15, %v11670_v19  ;;  %5298 = vmatmul.mubr.f32.vlgmr.msra.gmra.mrb[32].mxu0 %v5297_v57  ;;  %v5312_v21 = vsub.f32 %v11663_v58, %v12426_v20  ;;  %v5338_v47 = vsub.f32 %v11657_v39, %v12424_v11 }
 0x790   : > { %7455 = vmatpush1.bf16.msra.mxu0 %v10911_v33  ;;  %v5114_v29 = vpop.trf.xlu1  ;;  %5308 = vmatprep.mubr.f32.mxu0 %v5307_v41 }
 0x791   : > { %v12425_v42 = vand.u32 4294901760, %v11673_v0  ;;  %7457 = vmatprep.subr.bf16.mxu0 %v10952_v24  ;;  %v11684_v15 = vand.u32 4294901760, %v5114_v29  ;;  %v5313_v57 = vand.u32 4294901760, %v5312_v21  ;;  %v5339_v41 = vand.u32 4294901760, %v5338_v47  ;;  %v12911_v47 = vld [vmem:[#allocation15_spill] sm:$0xff] }
 0x793   : > { %12904 = vst [vmem:[#allocation120_spill] sm:$0xff] %v11684_v15  ;;  %v11687_v45 = vsub.f32 %v5114_v29, %v11684_v15  ;;  %5314 = vmatmul.mubr.f32.gmra.mrb[34].mxu0 %v5313_v57  ;;  %v5328_v33 = vsub.f32 %v11673_v0, %v12425_v42  ;;  %v12916_v57 = vld [vmem:[#allocation23_spill] sm:$0xff]  ;;  %v12957_v42 = vld [vmem:[#allocation69_spill] sm:$0xff] }
 0x794   : > { %7459 = vmatpush1.bf16.msra.mxu0 %v10969_v25  ;;  %5324 = vmatprep.mubr.f32.mxu0 %v5323_v43  ;;  %v12905_v25 = vld [vmem:[#allocation78_spill] sm:$0xff] }
 0x795   : > { %v12423_v23 = vand.u32 4294901760, %v11687_v45  ;;  %7461 = vmatprep.subr.bf16.mxu0 %v10998_v18  ;;  %v5329_v24 = vand.u32 4294901760, %v5328_v33  ;;  %v12906_v18 = vld [vmem:[#allocation79_spill] sm:$0xff]  ;;  %v12909_v43 = vld [vmem:[#allocation86_spill] sm:$0xff] }
 0x796   : > { %v12917_v33 = vld [vmem:[#allocation26_spill] sm:$0xff] }
 0x797   : > { %5330 = vmatmul.mubr.f32.gmra.mrb[36].mxu0 %v5329_v24  ;;  %v5344_v21 = vsub.f32 %v11687_v45, %v12423_v23  ;;  %v12919_v24 = vld [vmem:[#allocation22_spill] sm:$0xff]  ;;  %v12955_v23 = vld [vmem:[#allocation61_spill] sm:$0xff] }
 0x798   : > { %7463 = vmatpush1.bf16.msra.mxu0 %v11015_v44  ;;  %5340 = vmatprep.mubr.f32.mxu0 %v5339_v41  ;;  %v12907_v44 = vld [vmem:[#allocation82_spill] sm:$0xff]  ;;  %v12918_v41 = vld [vmem:[#allocation25_spill] sm:$0xff] }
 0x799   : > { %7465 = vmatprep.subr.bf16.mxu0 %v11044_v35  ;;  %v5345_v29 = vand.u32 4294901760, %v5344_v21  ;;  %v12908_v35 = vld [vmem:[#allocation83_spill] sm:$0xff]  ;;  %v12920_v21 = vld [vmem:[#allocation21_spill] sm:$0xff] }
 0x79b   : > { %5346 = vmatmul.mubr.f32.gmra.mrb[38].mxu0 %v5345_v29  ;;  %v12921_v29 = vld [vmem:[#allocation35_spill] sm:$0xff] }
 0x79c   : > { %7467 = vmatpush1.bf16.msra.mxu0 %v11061_v63  ;;  %5737 = vmatprep.mubr.f32.mxu0 %v11622_v2  ;;  %v12910_v63 = vld [vmem:[#allocation12_spill] sm:$0xff] }
 0x79d   : > { %7469 = vmatprep.subr.bf16.mxu0 %v11090_v50  ;;  %v12912_v50 = vld [vmem:[#allocation13_spill] sm:$0xff] }
 0x7a0   : > { %7471 = vmatpush1.bf16.msra.mxu0 %v11107_v46  ;;  %v12913_v46 = vld [vmem:[#allocation27_spill] sm:$0xff] }
 0x7a1   : > { %7473 = vmatprep.subr.bf16.mxu0 %v11136_v55  ;;  %v12914_v55 = vld [vmem:[#allocation24_spill] sm:$0xff] }
 0x7a4   : > { %7475 = vmatpush1.bf16.msra.mxu0 %v11153_v3  ;;  %v12915_v3 = vld [vmem:[#allocation14_spill] sm:$0xff] }
 0x7a5   : > { %7477 = vmatprep.subr.bf16.mxu0 %v12905_v25  ;;  %v12922_v25 = vld [vmem:[#allocation32_spill] sm:$0xff] }
 0x7a8   : > { %7479 = vmatpush1.bf16.msra.mxu0 %v12906_v18  ;;  %v12923_v18 = vpack.c.bf16 %v12921_v29, %v12922_v25  ;;  %v12942_v29 = vld [vmem:[#allocation53_spill] sm:$0xff] }
 0x7a9   : > { %7481 = vmatprep.subr.bf16.mxu0 %v12907_v44  ;;  %v12924_v44 = vld [vmem:[#allocation38_spill] sm:$0xff]  ;;  %v12943_v25 = vld [vmem:[#allocation49_spill] sm:$0xff] }
 0x7ac   : > { %7483 = vmatpush1.bf16.msra.mxu0 %v12908_v35  ;;  %v12925_v35 = vld [vmem:[#allocation33_spill] sm:$0xff] }
 0x7ad   : > { %7485 = vmatprep.subr.bf16.mxu0 %v12909_v43  ;;  %v12926_v43 = vpack.c.bf16 %v12924_v44, %v12925_v35  ;;  %v12945_v44 = vld [vmem:[#allocation57_spill] sm:$0xff]  ;;  %v12946_v35 = vld [vmem:[#allocation54_spill] sm:$0xff] }
 0x7b0   : > { %7487 = vmatpush1.bf16.msra.mxu0 %v12910_v63  ;;  %v12927_v63 = vld [vmem:[#allocation10_spill] sm:$0xff] }
 0x7b1   : > { %7489 = vmatprep.subr.bf16.mxu0 %v12911_v47 }
 0x7b4   : > { %7491 = vmatpush1.bf16.msra.mxu0 %v12912_v50  ;;  %v12933_v50 = vld [vmem:[#allocation45_spill] sm:$0xff] }
 0x7b5   : > { %7493 = vmatprep.subr.bf16.mxu0 %v12913_v46  ;;  %v12934_v46 = vld [vmem:[#allocation41_spill] sm:$0xff] }
 0x7b8   : > { %7495 = vmatpush1.bf16.msra.mxu0 %v12914_v55  ;;  %v12935_v55 = vpack.c.bf16 %v12933_v50, %v12934_v46 }
 0x7b9   : > { %7497 = vmatprep.subr.bf16.mxu0 %v12915_v3  ;;  %v12936_v3 = vld [vmem:[#allocation47_spill] sm:$0xff] }
 0x7bc   : > { %7499 = vmatpush1.bf16.msra.mxu0 %v12916_v57  ;;  %v12937_v57 = vld [vmem:[#allocation42_spill] sm:$0xff] }
 0x7bd   : > { %7501 = vmatprep.subr.bf16.mxu0 %v12917_v33  ;;  %v12938_v33 = vpack.c.bf16 %v12936_v3, %v12937_v57 }
 0x7c0   : > { %7503 = vmatpush1.bf16.msra.mxu0 %v12918_v41  ;;  %v12939_v41 = vld [vmem:[#allocation51_spill] sm:$0xff] }
 0x7c1   : > { %7505 = vmatprep.subr.bf16.mxu0 %v12919_v24  ;;  %v12940_v24 = vld [vmem:[#allocation48_spill] sm:$0xff] }
 0x7c4   : > { %7507 = vmatpush1.bf16.msra.mxu0 %v12920_v21  ;;  %v12941_v21 = vpack.c.bf16 %v12939_v41, %v12940_v24 }
 0x7c5   : > { %7509 = vmatprep.subr.bf16.mxu0 %v11517_v9  ;;  %v12928_v9 = vld [vmem:[#allocation39_spill] sm:$0xff] }
 0x7c6   : > { %v12929_v47 = vpack.c.bf16 %v12927_v63, %v12928_v9  ;;  %v12948_v63 = vld [vmem:[#allocation59_spill] sm:$0xff] }
 0x7c7   : > { %v12949_v9 = vld [vmem:[#allocation55_spill] sm:$0xff] }
 0x7c8   : > { %7511 = vmatpush1.bf16.msra.mxu0 %v11519_v53  ;;  %v12930_v53 = vld [vmem:[#allocation40_spill] sm:$0xff] }
 0x7c9   : > { %7513 = vmatprep.subr.bf16.mxu0 %v11552_v31  ;;  %v12931_v31 = vld [vmem:[#allocation6_spill] sm:$0xff] }
 0x7cc   : > { %7515 = vmatpush1.bf16.msra.mxu0 %v11554_v10  ;;  %v12932_v10 = vpack.c.bf16 %v12930_v53, %v12931_v31 }
 0x7cd   : > { %7517 = vmatprep.subr.bf16.mxu0 %v12923_v18  ;;  %v12944_v18 = vpack.c.bf16 %v12942_v29, %v12943_v25 }
 0x7cf   : > { %5739 = vmatmul.mubr.f32.vlgmr.msra.gmra.mrb[32].mxu0 %v11639_v52 }
 0x7d0   : > { %5745 = vmatprep.mubr.f32.mxu0 %v11628_v5  ;;  %7519 = vmatpush1.bf16.msra.mxu0 %v12926_v43  ;;  %v12947_v43 = vpack.c.bf16 %v12945_v44, %v12946_v35  ;;  %v12967_v5 = vld [vmem:[#allocation73_spill] sm:$0xff] }
 0x7d1   : > { %7521 = vmatprep.subr.bf16.mxu0 %v12929_v47  ;;  %v12950_v47 = vpack.c.bf16 %v12948_v63, %v12949_v9 }
 0x7d3   : > { %5747 = vmatmul.mubr.f32.gmra.mrb[34].mxu0 %v11654_v49 }
 0x7d4   : > { %5753 = vmatprep.mubr.f32.mxu0 %v11636_v38  ;;  %7523 = vmatpush1.bf16.msra.mxu0 %v12932_v10  ;;  %v12951_v10 = vld [vmem:[#allocation63_spill] sm:$0xff]  ;;  %v12964_v38 = vld [vmem:[#allocation72_spill] sm:$0xff] }
 0x7d5   : > { %7525 = vmatprep.subr.bf16.mxu0 %v12935_v55  ;;  %v12952_v55 = vld [vmem:[#allocation60_spill] sm:$0xff] }
 0x7d7   : > { %5755 = vmatmul.mubr.f32.gmra.mrb[36].mxu0 %v11670_v19 }
 0x7d8   : > { %5761 = vmatprep.mubr.f32.mxu0 %v11647_v60  ;;  %7527 = vmatpush1.bf16.msra.mxu0 %v12938_v33  ;;  %v12953_v33 = vpack.c.bf16 %v12951_v10, %v12952_v55  ;;  %v12961_v60 = vld [vmem:[#allocation67_spill] sm:$0xff] }
 0x7d9   : > { %7529 = vmatprep.subr.bf16.mxu0 %v12941_v21  ;;  %v12954_v21 = vld [vmem:[#allocation65_spill] sm:$0xff] }
 0x7da   : > { %v12956_v11 = vpack.c.bf16 %v12954_v21, %v12955_v23 }
 0x7db   : > { %5763 = vmatmul.mubr.f32.gmra.mrb[38].mxu0 %v11684_v15  ;;  %v12960_v15 = vld [vmem:[#allocation71_spill] sm:$0xff] }
 0x7dc   : > { %7531 = vmatpush1.bf16.msra.mxu0 %v12944_v18  ;;  %5963 = vmatprep.mubr.f32.mxu0 %v11625_v37  ;;  %v12958_v18 = vld [vmem:[#allocation66_spill] sm:$0xff]  ;;  %v12962_v19 = vpack.c.bf16 %v12960_v15, %v12961_v60 }
 0x7dd   : > { %7533 = vmatprep.subr.bf16.mxu0 %v12947_v43  ;;  %v12959_v20 = vpack.c.bf16 %v12957_v42, %v12958_v18  ;;  %v12963_v43 = vld [vmem:[#allocation75_spill] sm:$0xff] }
 0x7de   : > { %v12965_v49 = vpack.c.bf16 %v12963_v43, %v12964_v38 }
 0x7e0   : > { %7535 = vmatpush1.bf16.msra.mxu0 %v12950_v47  ;;  %v12966_v47 = vld [vmem:[#allocation77_spill] sm:$0xff] }
 0x7e1   : > { %7537 = vmatprep.subr.bf16.mxu0 %v12953_v33  ;;  %v12968_v52 = vpack.c.bf16 %v12966_v47, %v12967_v5  ;;  %v12969_v33 = vpack.c.bf16 %v11219_v48, %v11201_v8  ;;  %v12974_v8 = vpack.c.bf16 %v11309_v7, %v11291_v27  ;;  %v12980_v48 = vpack.c.bf16 %v11435_v13, %v11417_v30  ;;  %v12984_v27 = vld [vmem:[#allocation36_spill] sm:$0xff]  ;;  %v12986_v7 = vld [vmem:[#allocation93_spill] sm:$0xff]  ;;  %v12997_v13 = vld [vmem:[#allocation11_spill] sm:$0xff] }
 0x7e2   : > { %v12993_v30 = vld [vmem:[#allocation113_spill] sm:$0xff] }
 0x7e4   : > { %7539 = vmatpush1.bf16.msra.mxu0 %v12956_v11  ;;  %v12970_v11 = vpack.c.bf16 %v11223_v16, %v11203_v54  ;;  %v12975_v16 = vpack.c.bf16 %v11347_v12, %v11331_v40  ;;  %v12976_v54 = vpack.c.bf16 %v11351_v28, %v11333_v17  ;;  %v12987_v40 = vld [vmem:[#allocation29_spill] sm:$0xff]  ;;  %v12989_v12 = vld [vmem:[#allocation95_spill] sm:$0xff]  ;;  %v12990_v28 = vld [vmem:[#allocation28_spill] sm:$0xff] }
 0x7e5   : > { %7541 = vmatprep.subr.bf16.mxu0 %v12959_v20  ;;  %v12971_v20 = vpack.c.bf16 %v11263_v62, %v11246_v61  ;;  %v12979_v61 = vpack.c.bf16 %v11431_v26, %v11415_v6  ;;  %v12983_v62 = vld [vmem:[#allocation91_spill] sm:$0xff]  ;;  %v12995_v6 = vld [vmem:[#allocation9_spill] sm:$0xff]  ;;  %v12996_v26 = vld [vmem:[#allocation116_spill] sm:$0xff] }
 0x7e8   : > { %7543 = vmatpush1.bf16.msra.mxu0 %v12962_v19  ;;  %v12972_v19 = vpack.c.bf16 %v11267_v56, %v11248_v1  ;;  %v12977_v56 = vpack.c.bf16 %v11389_v36, %v11373_v14  ;;  %v12978_v1 = vpack.c.bf16 %v11393_v51, %v11375_v4  ;;  %v12988_v4 = vpack.c.bf16 %v12986_v7, %v12987_v40  ;;  %v12992_v36 = vld [vmem:[#allocation34_spill] sm:$0xff]  ;;  %v12994_v51 = vld [vmem:[#allocation37_spill] sm:$0xff]  ;;  %v13018_v7 = vld [vmem:[#allocation16_spill] sm:$0xff] }
 0x7e9   : > { %7545 = vmatprep.subr.bf16.mxu0 %v12965_v49  ;;  %v12973_v49 = vpack.c.bf16 %v11305_v22, %v11289_v32  ;;  %v12981_v32 = vld [vmem:[#allocation89_spill] sm:$0xff]  ;;  %v12985_v22 = vpack.c.bf16 %v12983_v62, %v12984_v27  ;;  %v12991_v14 = vpack.c.bf16 %v12989_v12, %v12990_v28  ;;  %v13015_v62 = vld [vmem:[#allocation87_spill] sm:$0xff]  ;;  %v13016_v27 = vld [vmem:[#allocation88_spill] sm:$0xff] }
 0x7ea   : > { %v12982_v17 = vpack.c.bf16 %v12981_v32, %v11457_v59  ;;  %v12998_v59 = vld [vmem:[#allocation44_spill] sm:$0xff]  ;;  %v13019_v40 = vld [vmem:[#allocation19_spill] sm:$0xff]  ;;  %v13021_v12 = vld [vmem:[#allocation18_spill] sm:$0xff] }
 0x7eb   : > { %v13013_v32 = vld [vmem:[#allocation84_spill] sm:$0xff]  ;;  %v13022_v28 = vld [vmem:[#allocation17_spill] sm:$0xff] }
 0x7ec   : > { %7547 = vmatpush1.bf16.msra.mxu0 %v12968_v52  ;;  %v12999_v52 = vld [vmem:[#allocation46_spill] sm:$0xff] }
 0x7ed   : > { %7549 = vmatprep.subr.bf16.mxu0 %v12969_v33  ;;  %v13000_v33 = vld [vmem:[#allocation50_spill] sm:$0xff] }
 0x7f0   : > { %7551 = vmatpush1.bf16.msra.mxu0 %v12970_v11  ;;  %v13001_v11 = vld [vmem:[#allocation52_spill] sm:$0xff] }
 0x7f1   : > { %7553 = vmatprep.subr.bf16.mxu0 %v12971_v20  ;;  %v13002_v20 = vand.u32 4294901760, %v11625_v37  ;;  %v13012_v37 = vld [vmem:[#allocation81_spill] sm:$0xff] }
 0x7f4   : > { %7555 = vmatpush1.bf16.msra.mxu0 %v12972_v19  ;;  %v13003_v19 = vld [vmem:[#allocation56_spill] sm:$0xff] }
 0x7f5   : > { %7557 = vmatprep.subr.bf16.mxu0 %v12973_v49  ;;  %v13004_v49 = vld [vmem:[#allocation58_spill] sm:$0xff] }
 0x7f8   : > { %7559 = vmatpush1.bf16.msra.mxu0 %v12974_v8  ;;  %v13005_v8 = vld [vmem:[#allocation62_spill] sm:$0xff] }
 0x7f9   : > { %7561 = vmatprep.subr.bf16.mxu0 %v12975_v16  ;;  %v13006_v16 = vld [vmem:[#allocation64_spill] sm:$0xff] }
 0x7fc   : > { %7563 = vmatpush1.bf16.msra.mxu0 %v12976_v54  ;;  %v13007_v54 = vld [vmem:[#allocation68_spill] sm:$0xff] }
 0x7fd   : > { %7565 = vmatprep.subr.bf16.mxu0 %v12977_v56  ;;  %v13008_v56 = vld [vmem:[#allocation70_spill] sm:$0xff] }
 0x800   : > { %7567 = vmatpush1.bf16.msra.mxu0 %v12978_v1  ;;  %v13009_v1 = vld [vmem:[#allocation74_spill] sm:$0xff] }
 0x801   : > { %7569 = vmatprep.subr.bf16.mxu0 %v12979_v61  ;;  %v13010_v61 = vld [vmem:[#allocation76_spill] sm:$0xff] }
 0x804   : > { %7571 = vmatpush1.bf16.msra.mxu0 %v12980_v48  ;;  %v13011_v48 = vld [vmem:[#allocation80_spill] sm:$0xff] }
 0x805   : > { %7573 = vmatprep.subr.bf16.mxu0 %v12982_v17  ;;  %v13014_v17 = vld [vmem:[#allocation85_spill] sm:$0xff] }
 0x808   : > { %7575 = vmatpush1.bf16.msra.mxu0 %v12985_v22  ;;  %v13017_v22 = vld [vmem:[#allocation20_spill] sm:$0xff] }
 0x809   : > { %7577 = vmatprep.subr.bf16.mxu0 %v12988_v4  ;;  %v13020_v4 = vld [vmem:[#allocation30_spill] sm:$0xff] }
 0x80c   : > { %7579 = vmatpush1.bf16.msra.mxu0 %v12991_v14  ;;  %v13023_v14 = vld [vmem:[#allocation31_spill] sm:$0xff] }
 0x80d   : > { %7581 = vmatprep.subr.bf16.mxu0 %v12992_v36 }
 0x80f   : > { %5966 = vmatmul.mubr.f32.vlgmr.msra.gmra.mrb[32].mxu0 %v11645_v34 }
 0x810   : > { %5973 = vmatprep.mubr.f32.mxu0 %v12993_v30  ;;  %7583 = vmatpush1.bf16.msra.mxu0 %v12994_v51 }
 0x811   : > { %7585 = vmatprep.subr.bf16.mxu0 %v12995_v6 }
 0x813   : > { %5976 = vmatmul.mubr.f32.gmra.mrb[34].mxu0 %v11663_v58 }
 0x814   : > { %5983 = vmatprep.mubr.f32.mxu0 %v12996_v26  ;;  %7587 = vmatpush1.bf16.msra.mxu0 %v12997_v13 }
 0x815   : > { %7589 = vmatprep.subr.bf16.mxu0 %v12998_v59 }
 0x817   : > { %5986 = vmatmul.mubr.f32.gmra.mrb[36].mxu0 %v11673_v0 }
 0x818   : > { %5993 = vmatprep.mubr.f32.mxu0 %v11657_v39  ;;  %7591 = vmatpush1.bf16.msra.mxu0 %v12999_v52 }
 0x819   : > { %7593 = vmatprep.subr.bf16.mxu0 %v13000_v33 }
 0x81b   : > { %5996 = vmatmul.mubr.f32.gmra.mrb[38].mxu0 %v11687_v45 }
 0x81c   : > { %7595 = vmatpush1.bf16.msra.mxu0 %v13001_v11  ;;  %6133 = vmatprep.mubr.f32.mxu0 %v13002_v20  ;;  %v13024_v20 = vld [vmem:[#allocation90_spill] sm:$0xff] }
 0x81d   : > { %7597 = vmatprep.subr.bf16.mxu0 %v13003_v19 }
 0x820   : > { %7599 = vmatpush1.bf16.msra.mxu0 %v13004_v49 }
 0x821   : > { %7601 = vmatprep.subr.bf16.mxu0 %v13005_v8 }
 0x824   : > { %7603 = vmatpush1.bf16.msra.mxu0 %v13006_v16 }
 0x825   : > { %7605 = vmatprep.subr.bf16.mxu0 %v13007_v54 }
 0x828   : > { %7607 = vmatpush1.bf16.msra.mxu0 %v13008_v56 }
 0x829   : > { %7609 = vmatprep.subr.bf16.mxu0 %v13009_v1 }
 0x82c   : > { %7611 = vmatpush1.bf16.msra.mxu0 %v13010_v61 }
 0x82d   : > { %7613 = vmatprep.subr.bf16.mxu0 %v13011_v48 }
 0x830   : > { %7615 = vmatpush1.bf16.msra.mxu0 %v13012_v37 }
 0x831   : > { %7617 = vmatprep.subr.bf16.mxu0 %v13013_v32 }
 0x834   : > { %7619 = vmatpush1.bf16.msra.mxu0 %v13014_v17  ;;  %v13025_v17 = vld [vmem:[#allocation92_spill] sm:$0xff] }
 0x835   : > { %7621 = vmatprep.subr.bf16.mxu0 %v13015_v62  ;;  %v13026_v62 = vld [vmem:[#allocation94_spill] sm:$0xff] }
 0x838   : > { %7623 = vmatpush1.bf16.msra.mxu0 %v13016_v27  ;;  %v13027_v27 = vld [vmem:[#allocation7_spill] sm:$0xff] }
 0x839   : > { %7625 = vmatprep.subr.bf16.mxu0 %v13017_v22 }
 0x83c   : > { %7627 = vmatpush1.bf16.msra.mxu0 %v13018_v7  ;;  %v13028_v7 = vand.u32 4294901760, %v11645_v34  ;;  %v13036_v34 = vand.u32 4294901760, %v12933_v50  ;;  %v13043_v50 = vand.u32 4294901760, %v11657_v39  ;;  %v13049_v39 = vand.u32 4294901760, %v12949_v9 }
 0x83d   : > { %7629 = vmatprep.subr.bf16.mxu0 %v13019_v40  ;;  %v13029_v40 = vand.u32 4294901760, %v12993_v30  ;;  %v13037_v30 = vand.u32 4294901760, %v12996_v26  ;;  %v13044_v26 = vand.u32 4294901760, %v12943_v25 }
 0x840   : > { %7631 = vmatpush1.bf16.msra.mxu0 %v13020_v4  ;;  %v13030_v4 = vld [vmem:[#allocation8_spill] sm:$0xff] }
 0x841   : > { %7633 = vmatprep.subr.bf16.mxu0 %v13021_v12  ;;  %v13031_v12 = vld [vmem:[#allocation43_spill] sm:$0xff] }
 0x844   : > { %7635 = vmatpush1.bf16.msra.mxu0 %v13022_v28 }
 0x845   : > { %7637 = vmatprep.subr.bf16.mxu0 %v13023_v14  ;;  %v13032_v14 = vand.u32 4294901760, %v12931_v31  ;;  %v13039_v31 = vand.u32 4294901760, %v12936_v3  ;;  %v13046_v3 = vand.u32 4294901760, %v11687_v45 }
 0x848   : > { %7639 = vmatpush1.bf16.msra.mxu0 %v13024_v20  ;;  %v13033_v20 = vand.u32 4294901760, %v12930_v53  ;;  %v13040_v53 = vand.u32 4294901760, %v11673_v0  ;;  %v13047_v0 = vand.u32 4294901760, %v12946_v35  ;;  %v13053_v35 = vand.u32 4294901760, %v12955_v23 }
 0x849   : > { %7641 = vmatprep.subr.bf16.mxu0 %v13025_v17  ;;  %v13034_v17 = vand.u32 4294901760, %v11663_v58  ;;  %v13041_v58 = vand.u32 4294901760, %v12940_v24  ;;  %v13048_v24 = vand.u32 4294901760, %v12945_v44  ;;  %v13054_v44 = vand.u32 4294901760, %v12954_v21 }
 0x84a   : > { %v7650_v28 = vpack.c.bf16 %v13033_v20, %v13032_v14  ;;  %v13052_v14 = vand.u32 4294901760, %v12951_v10  ;;  %v13061_v21 = vand.u32 4294901760, %v12967_v5  ;;  %v13071_v5 = vld [vmem:[#allocation104_spill] sm:$0xff] }
 0x84b   : > { %v7666_v20 = vpack.c.bf16 %v13054_v44, %v13053_v35 }
 0x84c   : > { %7643 = vmatpush1.bf16.msra.mxu0 %v13026_v62 }
 0x84d   : > { %7645 = vmatprep.subr.bf16.mxu0 %v13027_v27  ;;  %v13035_v27 = vand.u32 4294901760, %v12934_v46  ;;  %v13042_v46 = vand.u32 4294901760, %v12939_v41  ;;  %v13050_v41 = vand.u32 4294901760, %v12948_v63  ;;  %v13057_v63 = vand.u32 4294901760, %v12961_v60  ;;  %v13065_v60 = vld [vmem:[#allocation98_spill] sm:$0xff] }
 0x84f   : > { %6137 = vmatmul.mubr.f32.vlgmr.msra.gmra.mrb[32].mxu0 %v13028_v7  ;;  %v7652_v7 = vpack.c.bf16 %v13036_v34, %v13035_v27  ;;  %v7662_v25 = vpack.c.bf16 %v13050_v41, %v13049_v39  ;;  %v13055_v27 = vand.u32 4294901760, %v12958_v18  ;;  %v13056_v34 = vand.u32 4294901760, %v12957_v42  ;;  %v13084_v39 = vld [vmem:[#allocation117_spill] sm:$0xff] }
 0x850   : > { %6145 = vmatprep.mubr.f32.mxu0 %v13029_v40  ;;  %7647 = vmatpush1.bf16.msra.mxu0 %v13030_v4  ;;  %v13038_v40 = vand.u32 4294901760, %v12937_v57  ;;  %v13045_v57 = vand.u32 4294901760, %v12942_v29  ;;  %v13051_v29 = vand.u32 4294901760, %v12952_v55  ;;  %v13058_v55 = vand.u32 4294901760, %v12960_v15  ;;  %v13066_v15 = vld [vmem:[#allocation99_spill] sm:$0xff] }
 0x851   : > { %7649 = vmatprep.subr.bf16.mxu0 %v13031_v12  ;;  %v7668_v9 = vpack.c.bf16 %v13056_v34, %v13055_v27  ;;  %v13062_v18 = vand.u32 4294901760, %v12966_v47  ;;  %v13072_v47 = vld [vmem:[#allocation105_spill] sm:$0xff] }
 0x852   : > { %v7654_v4 = vpack.c.bf16 %v13039_v31, %v13038_v40  ;;  %v7658_v12 = vpack.c.bf16 %v13045_v57, %v13044_v26  ;;  %v7664_v45 = vpack.c.bf16 %v13052_v14, %v13051_v29  ;;  %v7670_v10 = vpack.c.bf16 %v13058_v55, %v13057_v63  ;;  %v13063_v40 = vld [vmem:[#allocation96_spill] sm:$0xff]  ;;  %v13064_v31 = vld [vmem:[#allocation97_spill] sm:$0xff]  ;;  %v13077_v26 = vld [vmem:[#allocation110_spill] sm:$0xff] }
 0x853   : > { %6149 = vmatmul.mubr.f32.gmra.mrb[34].mxu0 %v13034_v17  ;;  %v7656_v17 = vpack.c.bf16 %v13042_v46, %v13041_v58  ;;  %v7674_v42 = vpack.c.bf16 %v13062_v18, %v13061_v21  ;;  %v13073_v58 = vld [vmem:[#allocation106_spill] sm:$0xff]  ;;  %v13074_v46 = vld [vmem:[#allocation107_spill] sm:$0xff] }
 0x854   : > { %6157 = vmatprep.mubr.f32.mxu0 %v13037_v30  ;;  %7651 = vmatpush1.bf16.msra.mxu0 %v7650_v28  ;;  %v7660_v28 = vpack.c.bf16 %v13048_v24, %v13047_v0  ;;  %v13060_v30 = vand.u32 4294901760, %v12963_v43  ;;  %v13068_v43 = vld [vmem:[#allocation101_spill] sm:$0xff]  ;;  %v13078_v57 = vld [vmem:[#allocation111_spill] sm:$0xff]  ;;  %v13081_v0 = vld [vmem:[#allocation118_spill] sm:$0xff] }
 0x855   : > { %7653 = vmatprep.subr.bf16.mxu0 %v7652_v7  ;;  %v13059_v7 = vand.u32 4294901760, %v12964_v38  ;;  %v13067_v38 = vld [vmem:[#allocation100_spill] sm:$0xff]  ;;  %v13082_v24 = vld [vmem:[#allocation114_spill] sm:$0xff] }
 0x857   : > { %6161 = vmatmul.mubr.f32.gmra.mrb[36].mxu0 %v13040_v53  ;;  %v7672_v23 = vpack.c.bf16 %v13060_v30, %v13059_v7  ;;  %v13070_v53 = vld [vmem:[#allocation103_spill] sm:$0xff] }
 0x858   : > { %6169 = vmatprep.mubr.f32.mxu0 %v13043_v50  ;;  %7655 = vmatpush1.bf16.msra.mxu0 %v7654_v4  ;;  %v13069_v4 = vld [vmem:[#allocation102_spill] sm:$0xff]  ;;  %v13076_v50 = vld [vmem:[#allocation109_spill] sm:$0xff] }
 0x859   : > { %7657 = vmatprep.subr.bf16.mxu0 %v7656_v17  ;;  %v13075_v17 = vld [vmem:[#allocation108_spill] sm:$0xff] }
 0x85b   : > { %6173 = vmatmul.mubr.f32.gmra.mrb[38].mxu0 %v13046_v3  ;;  %v13080_v3 = vld [vmem:[#allocation112_spill] sm:$0xff] }
 0x85c   : > { %7659 = vmatpush1.bf16.msra.mxu0 %v7658_v12  ;;  %6436 = vmatprep.mubr.f32.mxu0 %v11622_v2  ;;  %v13079_v12 = vld [vmem:[#allocation115_spill] sm:$0xff] }
 0x85d   : > { %7661 = vmatprep.subr.bf16.mxu0 %v7660_v28  ;;  %v13083_v28 = vld [vmem:[#allocation119_spill] sm:$0xff] }
 0x860   : > { %7663 = vmatpush1.bf16.msra.mxu0 %v7662_v25 }
 0x861   : > { %7665 = vmatprep.subr.bf16.mxu0 %v7664_v45 }
 0x864   : > { %7667 = vmatpush1.bf16.msra.mxu0 %v7666_v20 }
 0x865   : > { %7669 = vmatprep.subr.bf16.mxu0 %v7668_v9 }
 0x868   : > { %7671 = vmatpush1.bf16.msra.mxu0 %v7670_v10 }
 0x869   : > { %7673 = vmatprep.subr.bf16.mxu0 %v7672_v23 }
 0x86c   : > { %7675 = vmatpush1.bf16.msra.mxu0 %v7674_v42 }
 0x86d   : > { %7677 = vmatprep.subr.bf16.mxu0 %v13063_v40 }
 0x870   : > { %7679 = vmatpush1.bf16.msra.mxu0 %v13064_v31 }
 0x871   : > { %7681 = vmatprep.subr.bf16.mxu0 %v13065_v60 }
 0x874   : > { %7683 = vmatpush1.bf16.msra.mxu0 %v13066_v15 }
 0x875   : > { %7685 = vmatprep.subr.bf16.mxu0 %v13067_v38 }
 0x878   : > { %7687 = vmatpush1.bf16.msra.mxu0 %v13068_v43 }
 0x879   : > { %7689 = vmatprep.subr.bf16.mxu0 %v13069_v4 }
 0x87c   : > { %7691 = vmatpush1.bf16.msra.mxu0 %v13070_v53 }
 0x87d   : > { %7693 = vmatprep.subr.bf16.mxu0 %v13071_v5 }
 0x880   : > { %7695 = vmatpush1.bf16.msra.mxu0 %v13072_v47 }
 0x881   : > { %7697 = vmatprep.subr.bf16.mxu0 %v13073_v58 }
 0x884   : > { %7699 = vmatpush1.bf16.msra.mxu0 %v13074_v46 }
 0x885   : > { %7701 = vmatprep.subr.bf16.mxu0 %v13075_v17 }
 0x888   : > { %7703 = vmatpush1.bf16.msra.mxu0 %v13076_v50 }
 0x889   : > { %7705 = vmatprep.subr.bf16.mxu0 %v13077_v26 }
 0x88c   : > { %7707 = vmatpush1.bf16.msra.mxu0 %v13078_v57 }
 0x88d   : > { %7709 = vmatprep.subr.bf16.mxu0 %v12992_v36  ;;  %v13085_v36 = vld [vmem:[#allocation120_spill] sm:$0xff] }
 0x88f   : > { %6438 = vmatmul.mubr.f32.vlgmr.msra.gmra.mrb[32].mxu0 %v13079_v12 }
 0x890   : > { %6444 = vmatprep.mubr.f32.mxu0 %v13080_v3  ;;  %7711 = vmatpush1.bf16.msra.mxu0 %v12994_v51  ;;  %v13087_v51 = vld [vmem:[#allocation87_spill] sm:$0xff] }
 0x891   : > { %7713 = vmatprep.subr.bf16.mxu0 %v12995_v6  ;;  %v13088_v6 = vld [vmem:[#allocation88_spill] sm:$0xff] }
 0x893   : > { %6446 = vmatmul.mubr.f32.gmra.mrb[34].mxu0 %v13081_v0 }
 0x894   : > { %6452 = vmatprep.mubr.f32.mxu0 %v13082_v24  ;;  %7715 = vmatpush1.bf16.msra.mxu0 %v12997_v13  ;;  %v13089_v13 = vld [vmem:[#allocation16_spill] sm:$0xff] }
 0x895   : > { %7717 = vmatprep.subr.bf16.mxu0 %v12998_v59  ;;  %v13090_v59 = vld [vmem:[#allocation19_spill] sm:$0xff] }
 0x897   : > { %6454 = vmatmul.mubr.f32.gmra.mrb[36].mxu0 %v13083_v28 }
 0x898   : > { %6460 = vmatprep.mubr.f32.mxu0 %v13084_v39  ;;  %7719 = vmatpush1.bf16.msra.mxu0 %v12999_v52  ;;  %v13091_v52 = vld [vmem:[#allocation30_spill] sm:$0xff] }
 0x899   : > { %7721 = vmatprep.subr.bf16.mxu0 %v13000_v33  ;;  %v13092_v33 = vld [vmem:[#allocation18_spill] sm:$0xff] }
 0x89b   : > { %6462 = vmatmul.mubr.f32.gmra.mrb[38].mxu0 %v13085_v36 }
 0x89c   : > { %7723 = vmatpush1.bf16.msra.mxu0 %v13001_v11  ;;  %6597 = vmatprep.mubr.f32.mxu0 %v11622_v2  ;;  %v13086_v2 = vld [vmem:[#allocation85_spill] sm:$0xff] }
 0x89d   : > { %7725 = vmatprep.subr.bf16.mxu0 %v13003_v19  ;;  %v13093_v11 = vld [vmem:[#allocation17_spill] sm:$0xff]  ;;  %v13094_v19 = vld [vmem:[#allocation31_spill] sm:$0xff] }
 0x8a0   : > { %7727 = vmatpush1.bf16.msra.mxu0 %v13004_v49  ;;  %v13095_v49 = vld [vmem:[#allocation90_spill] sm:$0xff] }
 0x8a1   : > { %7729 = vmatprep.subr.bf16.mxu0 %v13005_v8  ;;  %v13096_v8 = vld [vmem:[#allocation92_spill] sm:$0xff] }
 0x8a4   : > { %7731 = vmatpush1.bf16.msra.mxu0 %v13006_v16 }
 0x8a5   : > { %7733 = vmatprep.subr.bf16.mxu0 %v13007_v54 }
 0x8a8   : > { %7735 = vmatpush1.bf16.msra.mxu0 %v13008_v56 }
 0x8a9   : > { %7737 = vmatprep.subr.bf16.mxu0 %v13009_v1 }
 0x8ac   : > { %7739 = vmatpush1.bf16.msra.mxu0 %v13010_v61 }
 0x8ad   : > { %7741 = vmatprep.subr.bf16.mxu0 %v13011_v48 }
 0x8b0   : > { %7743 = vmatpush1.bf16.msra.mxu0 %v13012_v37 }
 0x8b1   : > { %7745 = vmatprep.subr.bf16.mxu0 %v13013_v32 }
 0x8b4   : > { %7747 = vmatpush1.bf16.msra.mxu0 %v13086_v2 }
 0x8b5   : > { %7749 = vmatprep.subr.bf16.mxu0 %v13087_v51 }
 0x8b8   : > { %7751 = vmatpush1.bf16.msra.mxu0 %v13088_v6 }
 0x8b9   : > { %7753 = vmatprep.subr.bf16.mxu0 %v13017_v22 }
 0x8bc   : > { %7755 = vmatpush1.bf16.msra.mxu0 %v13089_v13 }
 0x8bd   : > { %7757 = vmatprep.subr.bf16.mxu0 %v13090_v59 }
 0x8c0   : > { %7759 = vmatpush1.bf16.msra.mxu0 %v13091_v52 }
 0x8c1   : > { %7761 = vmatprep.subr.bf16.mxu0 %v13092_v33 }
 0x8c4   : > { %7763 = vmatpush1.bf16.msra.mxu0 %v13093_v11 }
 0x8c5   : > { %7765 = vmatprep.subr.bf16.mxu0 %v13094_v19 }
 0x8c8   : > { %7767 = vmatpush1.bf16.msra.mxu0 %v13095_v49 }
 0x8c9   : > { %7769 = vmatprep.subr.bf16.mxu0 %v13096_v8 }
 0x8cc   : > { %7771 = vmatpush1.bf16.msra.mxu0 %v13026_v62 }
 0x8cf   : > { %6599 = vmatmul.mubr.f32.vlgmr.msra.gmra.mrb[32].mxu0 %v13079_v12 }
 0x8d0   : > { %6605 = vmatprep.mubr.f32.mxu0 %v13080_v3 }
 0x8d3   : > { %6607 = vmatmul.mubr.f32.gmra.mrb[34].mxu0 %v13081_v0 }
 0x8d4   : > { %6613 = vmatprep.mubr.f32.mxu0 %v13082_v24 }
 0x8d7   : > { %6615 = vmatmul.mubr.f32.gmra.mrb[36].mxu0 %v13083_v28 }
 0x8d8   : > { %6621 = vmatprep.mubr.f32.mxu0 %v13084_v39 }
 0x8db   : > { %6623 = vmatmul.mubr.f32.gmra.mrb[38].mxu0 %v13085_v36 }
 0x9a2   : > { %v6600_v16 = vpop.f32.mrb[32].mxu0 }
 0x9a3   : > { %6629 = vst [vmem:[%s307_s10] sm:$0xff] %v6600_v16  ;;  %v6602_v54 = vpop.f32.mrb[33].mxu0 }
 0x9a4   : > { %6630 = vst [vmem:[%s307_s10 + $0x8] sm:$0xff] %v6602_v54 }
 0x9a6   : > { %v6608_v56 = vpop.f32.mrb[34].mxu0 }
 0x9a7   : > { %6631 = vst [vmem:[%s307_s10 + $0x10] sm:$0xff] %v6608_v56  ;;  %v6610_v1 = vpop.f32.mrb[35].mxu0 }
 0x9a8   : > { %6632 = vst [vmem:[%s307_s10 + $0x18] sm:$0xff] %v6610_v1 }
 0x9aa   : > { %v6616_v61 = vpop.f32.mrb[36].mxu0 }
 0x9ab   : > { %6633 = vst [vmem:[%s307_s10 + $0x20] sm:$0xff] %v6616_v61  ;;  %v6618_v48 = vpop.f32.mrb[37].mxu0 }
 0x9ac   : > { %6634 = vst [vmem:[%s307_s10 + $0x28] sm:$0xff] %v6618_v48 }
 0x9ae   : > { %v6624_v37 = vpop.f32.mrb[38].mxu0 }
 0x9af   : > { %6635 = vst [vmem:[%s307_s10 + $0x30] sm:$0xff] %v6624_v37  ;;  %v6626_v32 = vpop.f32.mrb[39].mxu0 }
 0x9b0   : > { %6636 = vst [vmem:[%s307_s10 + $0x38] sm:$0xff] %v6626_v32 }
 0x9b1   : > { %8572 = shalt.err (!%p8569_p7)
}
 0x9b2   : > { %s8573_s15 = scalar_lea.hbm %s12011_s29, 1024  ;;  %s8577_s28 = scalar_lea.hbm %s12061_s6, 2048 }
 0x9b3   : > { %p8574_p10 = scmp.ne.s32.totalorder %s12011_s29, %s8573_s15  ;;  %p8578_p13 = scmp.lt.u32.totalorder %s12011_s29, %s12061_s6 }
 0x9b4   : > { %p8579_p0 = scmp.lt.u32.totalorder %s8577_s28, %s8573_s15  ;;  %p8581_p2 = scmp.lt.u32.totalorder %s8573_s15, %s12011_s29 }
 0x9b5   : > { %p8575_p11 = pnand %p8574_p10, %p8702_p6 }
 0x9b6   : > { %p8580_p1 = por %p8579_p0, %p8578_p13 }
 0x9b7   : > { %p8576_p12 = pneg %p8575_p11 }
 0x9b8   : > { %p8582_p3 = por %p8581_p2, %p8580_p1 }
 0x9ba   : > { %p8583_p4 = pnand %p8582_p3, %p8576_p12 }
 0x9bc   : > { %8586 = shalt.err (!%p8583_p4)
}
 0x9bd   : > { %s8625_s20 = smov 256   ;;  %s8626_s26 = smov 512  }
 0x9be   : > { %s8627_s11 = smov 16  }
 0x9bf   : > { %8324 = dma.vmem_to_hbm [thread:$0]  (%p8702_p6), %s12006_s18, 1024, %s12011_s29, %s6638_s9, %s8625_s20, %s8626_s26, %s8627_s11  }
 0x9c0 PF: > { %s6666_s25 = sand.u32 1, %s8609_s21   ;;  %p8327_p5 = pnand %p6745_p9, %p8706_p8 }
 0x9c1   : > { %s6667_s12 = scalar_lea.sflag [#allocation4], %s6666_s25 }
 0x9c2   : > { %8604 = dma.done.wait (!%p8327_p5), %s6667_s12, 1024  }
 0x9c3   : > { %8606 = vsyncadd (!%p8327_p5), %s6667_s12, 4294966272  ;;  %p16_p7 = scmp.ge.s32.totalorder %s8688_s27, 4   ;;  %s13097_s21 = smov %s8613_s22 }
 0x9c4   : > { %s13098_s22 = smov %s8617_s23  ;;  %s13099_s23 = smov %s8700_s30 }
 0x9c5   : > { %s13100_s24 = smov %s8688_s27  ;;  %18 = sbr.rel (!%p16_p7) target bundleno = 3 (0x3), region = 113 }
 0x9cc   :  { %6672 = vsyncpa [#allocation4], 1 }
 0x9cd   :  { %6674 = vsyncpa [#allocation4 + $0x1], 1 }

</bundles_post_ra>
